<compile_context>
chip_gen: v6e
topology: v6e:2x2x1
jax: 0.10.0
libtpu: 0.0.40
codegen_flags: <defaults>
</compile_context>

<pallas_src>
import jax
import jax.numpy as jnp
import numpy as np
from jax.experimental import pallas as pl
from jax.experimental.pallas import tpu as pltpu

# ----------------------- small config (consistent with the module) -----------------------
B = 2            # batch
N_MEL = 16       # n_mel_channels (small stand-in for 80)
N_FRAMES = 1     # n_frames_per_step
M = N_MEL * N_FRAMES
ENC_DIM = 32     # encoder_embedding_dim
ATT_RNN = 32     # attention_rnn_dim
DEC_RNN = 32     # decoder_rnn_dim
PRENET = 32      # prenet_dim
ATT_DIM = 16     # attention_dim
LOC_F = 8        # attention_location_n_filters
LOC_K = 5        # attention_location_kernel_size
T_TEXT = 8       # max_text_len
T_MEL = 8        # max_mel_len
T_STEPS = T_MEL // N_FRAMES

MG = M + 1                           # fused mel+gate projection width
MG_PAD = ((MG + 127) // 128) * 128   # lane-dense padded output width

# column offsets inside the packed LSTM / LSA input rows
A_X0, A_C0, A_H0, A_ONE = 0, PRENET, PRENET + ENC_DIM, PRENET + ENC_DIM + ATT_RNN
D_X0, D_C0, D_H0, D_ONE = 0, ATT_RNN, ATT_RNN + ENC_DIM, ATT_RNN + ENC_DIM + DEC_RNN
L_W0, L_WC, L_Q = 0, T_TEXT, 2 * T_TEXT


# ----------------------------------- the kernel -----------------------------------
def decoder_kernel(
    # inputs (all resident VMEM blocks)
    truth_ref,        # (T*B, M)            teacher-forced frames, time-major flattened
    memory_ref,       # (B, T_text, E)
    pmem_ref,         # (B, T_text*A)       processed_memory, flattened
    bias_ref,         # (B, T_text)         additive mask bias (0 valid / -1e9 pad)
    pre_w1_ref,       # (M, P)
    pre_w2_ref,       # (P, P)
    arnn_w_ref,       # (P+E+H_att+1, 4*H_att)   rows: [wih_x ; wih_ctx ; whh ; bias]
    drnn_w_ref,       # (H_att+E+H_dec+1, 4*H_dec)
    lsa_w_ref,        # (2*T_text+H_att, T_text*A) rows: [band0 ; band1 ; qrep]
    vmat_ref,         # (T_text*A, T_text)  block-diagonal v
    mg_w_ref,         # (H_dec+E, MG_PAD)   [mel_w | gate_w^T | 0-pad]
    mg_b_ref,         # (1, MG_PAD)
    # outputs (written back once)
    melgate_out_ref,  # (T*B, MG_PAD)       lane-dense fused mel+gate output
    align_out_ref,    # (T, B, T_text)
    # scratch
    h2_all,           # (T*B, P)            prenet output for all steps
    dhctx_all,        # (T*B, H_dec+E)      [d_h | ctx] stash for deferred projection
    att_in,           # (B, P+E+H_att+1)    packed att-LSTM input row (with const-1 col)
    att_c,            # (B, H_att)
    dec_in,           # (B, H_att+E+H_dec+1)
    dec_c,            # (B, H_dec)
    lsa_in,           # (B, 2*T_text+H_att) packed LSA input row [aw | aw_cum | a_h]
):
    f32 = jnp.float32
    n_steps = align_out_ref.shape[0]
    Bx = align_out_ref.shape[1]

    # ---- initialize_decoder_states() ----
    att_in[...] = jnp.zeros_like(att_in)
    att_in[:, A_ONE:A_ONE + 1] = jnp.ones((Bx, 1), f32)   # bias folded via constant-1 column
    att_c[...] = jnp.zeros_like(att_c)
    dec_in[...] = jnp.zeros_like(dec_in)
    dec_in[:, D_ONE:D_ONE + 1] = jnp.ones((Bx, 1), f32)
    dec_c[...] = jnp.zeros_like(dec_c)
    lsa_in[...] = jnp.zeros_like(lsa_in)                  # aw = aw_cum = 0

    # ---- Prenet hoisted out of the recurrence: one batched matmul over all steps ----
    # TODO(synk): Prenet dropout (active even at inference in Tacotron2) omitted.
    x = truth_ref[...]
    h1 = jnp.maximum(jnp.dot(x, pre_w1_ref[...], preferred_element_type=f32), 0.0)
    h2_all[...] = jnp.maximum(jnp.dot(h1, pre_w2_ref[...], preferred_element_type=f32), 0.0)

    def lstm_gates(g, c_prev, H):
        i = jax.nn.sigmoid(g[:, 0:H])
        f = jax.nn.sigmoid(g[:, H:2 * H])
        gg = jnp.tanh(g[:, 2 * H:3 * H])
        o = jax.nn.sigmoid(g[:, 3 * H:4 * H])
        c_new = f * c_prev + i * gg
        return o * jnp.tanh(c_new), c_new

    # ---- Time recurrence, FULLY UNROLLED (n_steps is static).
    # Equivalent to pl.loop(0, n_steps, unroll=True): all slices static, scheduler sees
    # across iterations.
    for t in range(n_steps):
        r0 = t * Bx

        # ---- Attention RNN (LSTMCell): one fused matmul vs packed slab ----
        att_in[:, A_X0:A_X0 + PRENET] = h2_all[r0:r0 + Bx, :]
        g_att = jnp.dot(att_in[...], arnn_w_ref[...], preferred_element_type=f32)
        a_h, a_c = lstm_gates(g_att, att_c[...], ATT_RNN)
        att_c[...] = a_c
        att_in[:, A_H0:A_H0 + ATT_RNN] = a_h
        # F.dropout(attention_rnn_h, p, training=False) -> identity in eval mode.

        # ---- Location-sensitive attention: conv + loc-linear + query as ONE matmul ----
        lsa_in[:, L_Q:L_Q + ATT_RNN] = a_h
        proc = (jnp.dot(lsa_in[...], lsa_w_ref[...], preferred_element_type=f32)
                + pmem_ref[...])                                      # (B, T_text*A)
        th = jnp.tanh(proc)
        energies = jnp.dot(th, vmat_ref[...], preferred_element_type=f32) + bias_ref[...]
        m = jnp.max(energies, axis=-1, keepdims=True)
        p = jnp.exp(energies - m)
        w_att = p * pl.reciprocal(jnp.sum(p, axis=-1, keepdims=True), approx=False)
        # TODO(synk): at production sizes compute context as a batched dot_general (MXU).
        context = jnp.sum(w_att[:, :, None] * memory_ref[...], axis=1)  # (B, E)

        lsa_in[:, L_W0:L_W0 + T_TEXT] = w_att                          # attention_weights
        lsa_in[:, L_WC:L_WC + T_TEXT] = lsa_in[:, L_WC:L_WC + T_TEXT] + w_att  # cum
        att_in[:, A_C0:A_C0 + ENC_DIM] = context                       # for next att step
        align_out_ref[t] = w_att

        # ---- Decoder RNN (LSTMCell): one fused matmul vs packed slab ----
        dec_in[:, D_X0:D_X0 + ATT_RNN] = a_h
        dec_in[:, D_C0:D_C0 + ENC_DIM] = context
        g_dec = jnp.dot(dec_in[...], drnn_w_ref[...], preferred_element_type=f32)
        d_h, d_c = lstm_gates(g_dec, dec_c[...], DEC_RNN)
        dec_c[...] = d_c
        dec_in[:, D_H0:D_H0 + DEC_RNN] = d_h

        # stash [d_h | context] for the deferred post-loop mel+gate projection
        dhctx_all[r0:r0 + Bx, 0:DEC_RNN] = d_h
        dhctx_all[r0:r0 + Bx, DEC_RNN:DEC_RNN + ENC_DIM] = context

    # ---- Deferred fused mel+gate projection: one (T*B, H+E) x (H+E, 128) matmul,
    # one lane-dense contiguous store ----
    mg = jnp.dot(dhctx_all[...], mg_w_ref[...], preferred_element_type=f32) + mg_b_ref[...]
    melgate_out_ref[...] = mg


# ----------------------------- host-side weight folding -----------------------------
def _build_location_bands(loc_conv_w, loc_lin_w, Tt):
    """Fold conv1d(K taps, 2 in-ch, F out-ch, same-pad) + Linear(F->A) into two
    (Tt, Tt*A) banded matrices so the whole location branch is a matmul."""
    K = loc_conv_w.shape[0] // 2
    A = loc_lin_w.shape[1]
    pad = (K - 1) // 2
    wl0 = loc_conv_w[:K] @ loc_lin_w    # (K, A)  prev-weights channel
    wl1 = loc_conv_w[K:] @ loc_lin_w    # (K, A)  cum-weights channel
    band0 = np.zeros((Tt, Tt, A), np.float32)
    band1 = np.zeros((Tt, Tt, A), np.float32)
    for t in range(Tt):
        for k in range(K):
            s = t + k - pad
            if 0 <= s < Tt:
                band0[s, t, :] = wl0[k]
                band1[s, t, :] = wl1[k]
    return jnp.asarray(band0.reshape(Tt, Tt * A)), jnp.asarray(band1.reshape(Tt, Tt * A))


def _build_v_matrix(v_w, Tt):
    """Block-diagonal (Tt*A, Tt) matrix so energies = tanh(...) @ vmat (MXU, no lane reduce)."""
    A = v_w.shape[1]
    vm = np.zeros((Tt, A, Tt), np.float32)
    for t in range(Tt):
        vm[t, :, t] = v_w[0]
    return jnp.asarray(vm.reshape(Tt * A, Tt))


def _full_spec(shape):
    nd = len(shape)
    return pl.BlockSpec(shape, lambda i, _nd=nd: (0,) * _nd)


# ----------------------------------- wrapper -----------------------------------
def decoder_forward(memory, processed_memory, memory_lens, mel_truth, params):
    """Mirrors Decoder.forward (teacher-forced)."""
    Bx, Tt, E = memory.shape
    A = processed_memory.shape[2]
    n_mel, t_mel = mel_truth.shape[1], mel_truth.shape[2]
    Mx = n_mel * N_FRAMES

    # parse_mel_truth + go frame (plain-JAX glue)
    truth = jnp.transpose(mel_truth, (0, 2, 1)).reshape(Bx, t_mel // N_FRAMES, Mx)
    truth = jnp.transpose(truth, (1, 0, 2))                      # (T_steps, B, M)
    go = jnp.zeros((1, Bx, Mx), jnp.float32)
    truth = jnp.concatenate([go, truth], axis=0)
    n_steps = truth.shape[0] - 1
    truth_flat = truth[:n_steps].reshape(n_steps * Bx, Mx)       # time-major (T*B, M)

    # additive mask bias (0 valid / -1e9 padded)
    mask = (jnp.arange(Tt)[None, :] < memory_lens[:, None]).astype(jnp.float32)
    bias = (1.0 - mask) * (-1e9)
    pmem_flat = processed_memory.reshape(Bx, Tt * A)

    # ---- weight packing / folding (host-side, one-time) ----
    H_att = params['arnn_whh'].shape[0]
    H_dec = params['drnn_whh'].shape[0]
    # LSTM slabs with bias folded in as a trailing row (input carries a constant-1 column)
    arnn_w = jnp.concatenate([params['arnn_wih'], params['arnn_whh'], params['arnn_b']], axis=0)
    drnn_w = jnp.concatenate([params['drnn_wih'], params['drnn_whh'], params['drnn_b']], axis=0)
    # fused mel+gate projection, zero-padded to a lane-dense MG_PAD output width
    mg_w = jnp.concatenate([params['mel_w'], jnp.transpose(params['gate_w'])], axis=1)
    mg_b = jnp.concatenate([params['mel_b'], params['gate_b']], axis=1)
    mg_w = jnp.pad(mg_w, ((0, 0), (0, MG_PAD - MG)))
    mg_b = jnp.pad(mg_b, ((0, 0), (0, MG_PAD - MG)))
    # location conv + loc-linear + query folded into ONE (2*Tt+H_att, Tt*A) slab
    band0, band1 = _build_location_bands(np.asarray(params['loc_conv_w']),
                                         np.asarray(params['loc_lin_w']), Tt)
    qrep_w = jnp.tile(params['query_w'], (1, Tt))                # (H_att, Tt*A)
    lsa_w = jnp.concatenate([band0, band1, qrep_w], axis=0)
    vmat = _build_v_matrix(np.asarray(params['v_w']), Tt)

    # TODO(synk): at production Tacotron2 sizes, cast weight slabs to bf16 (keep f32 state &
    # softmax), replace the tiled-query/banded folding with pltpu.roll + broadcast adds, and
    # shard the batch across the two v7x TensorCores with a parallel grid axis.

    inputs = (truth_flat, memory, pmem_flat, bias,
              params['pre_w1'], params['pre_w2'],
              arnn_w, drnn_w, lsa_w, vmat, mg_w, mg_b)

    in_specs = [_full_spec(x.shape) for x in inputs]
    out_specs = [
        pl.BlockSpec((n_steps * Bx, MG_PAD), lambda i: (0, 0)),
        pl.BlockSpec((n_steps, Bx, Tt), lambda i: (0, 0, 0)),
    ]
    out_shape = [
        jax.ShapeDtypeStruct((n_steps * Bx, MG_PAD), jnp.float32),
        jax.ShapeDtypeStruct((n_steps, Bx, Tt), jnp.float32),
    ]
    scratch_shapes = [
        pltpu.VMEM((n_steps * Bx, PRENET), jnp.float32),            # h2_all
        pltpu.VMEM((n_steps * Bx, H_dec + E), jnp.float32),         # dhctx_all
        pltpu.VMEM((Bx, PRENET + E + H_att + 1), jnp.float32),      # att_in
        pltpu.VMEM((Bx, H_att), jnp.float32),                       # att_c
        pltpu.VMEM((Bx, H_att + E + H_dec + 1), jnp.float32),       # dec_in
        pltpu.VMEM((Bx, H_dec), jnp.float32),                       # dec_c
        pltpu.VMEM((Bx, 2 * Tt + H_att), jnp.float32),              # lsa_in
    ]

    melgate_flat, align_seq = pl.pallas_call(
        decoder_kernel,
        out_shape=out_shape,
        grid_spec=pltpu.PrefetchScalarGridSpec(
            num_scalar_prefetch=0,
            grid=(1,),                      # time loop internalized (and unrolled) in the kernel
            in_specs=in_specs,
            out_specs=out_specs,
            scratch_shapes=scratch_shapes,
        ),
        compiler_params=pltpu.CompilerParams(
            dimension_semantics=("arbitrary",),
            vmem_limit_bytes=32 * 1024 * 1024,
        ),
    )(*inputs)

    # parse_outputs (plain-JAX glue)
    melgate = melgate_flat.reshape(n_steps, Bx, MG_PAD)
    mel_seq = melgate[:, :, :Mx]                                  # (T, B, M)
    gate_seq = melgate[:, :, Mx]                                  # (T, B)
    mel_outputs = jnp.transpose(mel_seq, (1, 0, 2)).reshape(Bx, n_steps * N_FRAMES, n_mel)
    mel_outputs = jnp.transpose(mel_outputs, (0, 2, 1))           # (B, n_mel, T*n_frames)
    gate_outputs = jnp.transpose(gate_seq, (1, 0))                # (B, T)
    alignments = jnp.transpose(align_seq, (1, 0, 2))              # (B, T, T_text)
    return mel_outputs, gate_outputs, alignments


# ----------------------------- pure-JAX reference (for checking) -----------------------------
def decoder_forward_ref(memory, processed_memory, memory_lens, mel_truth, p):
    Bx, Tt, E = memory.shape
    n_mel, t_mel = mel_truth.shape[1], mel_truth.shape[2]
    Mx = n_mel * N_FRAMES
    truth = jnp.transpose(mel_truth, (0, 2, 1)).reshape(Bx, t_mel // N_FRAMES, Mx)
    truth = jnp.transpose(truth, (1, 0, 2))
    truth = jnp.concatenate([jnp.zeros((1, Bx, Mx), jnp.float32), truth], axis=0)
    n_steps = truth.shape[0] - 1
    mask = (jnp.arange(Tt)[None, :] < memory_lens[:, None])

    a_h = jnp.zeros((Bx, ATT_RNN)); a_c = jnp.zeros((Bx, ATT_RNN))
    d_h = jnp.zeros((Bx, DEC_RNN)); d_c = jnp.zeros((Bx, DEC_RNN))
    aw = jnp.zeros((Bx, Tt)); aw_cum = jnp.zeros((Bx, Tt)); ctx = jnp.zeros((Bx, E))
    mels, gates, aligns = [], [], []
    pad = (LOC_K - 1) // 2

    def lstm(x, h, c, wih, whh, b):
        H = h.shape[-1]
        g = x @ wih + h @ whh + b
        i = jax.nn.sigmoid(g[:, :H]); f = jax.nn.sigmoid(g[:, H:2*H])
        gg = jnp.tanh(g[:, 2*H:3*H]); o = jax.nn.sigmoid(g[:, 3*H:])
        c2 = f * c + i * gg
        return o * jnp.tanh(c2), c2

    for t in range(n_steps):
        frame = truth[t]
        h1 = jax.nn.relu(frame @ p['pre_w1'])
        h2 = jax.nn.relu(h1 @ p['pre_w2'])
        a_h, a_c = lstm(jnp.concatenate([h2, ctx], -1), a_h, a_c,
                        p['arnn_wih'], p['arnn_whh'], p['arnn_b'][0])
        zp = jnp.zeros((Bx, pad))
        pp = jnp.concatenate([zp, aw, zp], 1)
        pc = jnp.concatenate([zp, aw_cum, zp], 1)
        loc = jnp.zeros((Bx, Tt, LOC_F))
        for k in range(LOC_K):
            loc = loc + pp[:, k:k+Tt, None] * p['loc_conv_w'][k][None, None, :]
            loc = loc + pc[:, k:k+Tt, None] * p['loc_conv_w'][LOC_K + k][None, None, :]
        proc_loc = loc.reshape(Bx*Tt, LOC_F) @ p['loc_lin_w']
        proc_loc = proc_loc.reshape(Bx, Tt, ATT_DIM)
        q = a_h @ p['query_w']
        th = jnp.tanh(q[:, None, :] + proc_loc + processed_memory)
        e = jnp.sum(th * p['v_w'][:, None, :], -1)
        e = jnp.where(mask, e, -1e9)
        w = jax.nn.softmax(e, axis=-1)
        ctx = jnp.sum(w[:, :, None] * memory, axis=1)
        aw = w; aw_cum = aw_cum + w
        d_h, d_c = lstm(jnp.concatenate([a_h, ctx], -1), d_h, d_c,
                        p['drnn_wih'], p['drnn_whh'], p['drnn_b'][0])
        dh = jnp.concatenate([d_h, ctx], -1)
        mels.append(dh @ p['mel_w'] + p['mel_b'][0])
        gates.append(jnp.sum(dh * p['gate_w'], -1, keepdims=True) + p['gate_b'][0])
        aligns.append(w)

    mel = jnp.stack(mels).transpose(1, 0, 2).reshape(Bx, n_steps*N_FRAMES, n_mel).transpose(0, 2, 1)
    gate = jnp.stack(gates)[..., 0].transpose(1, 0)
    ali = jnp.stack(aligns).transpose(1, 0, 2)
    return mel, gate, ali


# ----------------------------- parameter init & main -----------------------------
def init_params(key):
    ks = jax.random.split(key, 16)
    s = 0.1
    p = {
        'pre_w1':     s * jax.random.normal(ks[0], (M, PRENET), jnp.float32),
        'pre_w2':     s * jax.random.normal(ks[1], (PRENET, PRENET), jnp.float32),
        'arnn_wih':   s * jax.random.normal(ks[2], (PRENET + ENC_DIM, 4 * ATT_RNN), jnp.float32),
        'arnn_whh':   s * jax.random.normal(ks[3], (ATT_RNN, 4 * ATT_RNN), jnp.float32),
        'arnn_b':     s * jax.random.normal(ks[4], (1, 4 * ATT_RNN), jnp.float32),
        'drnn_wih':   s * jax.random.normal(ks[5], (ATT_RNN + ENC_DIM, 4 * DEC_RNN), jnp.float32),
        'drnn_whh':   s * jax.random.normal(ks[6], (DEC_RNN, 4 * DEC_RNN), jnp.float32),
        'drnn_b':     s * jax.random.normal(ks[7], (1, 4 * DEC_RNN), jnp.float32),
        'query_w':    s * jax.random.normal(ks[8], (ATT_RNN, ATT_DIM), jnp.float32),
        'loc_conv_w': s * jax.random.normal(ks[9], (2 * LOC_K, LOC_F), jnp.float32),  # [c*K+k, f]
        'loc_lin_w':  s * jax.random.normal(ks[10], (LOC_F, ATT_DIM), jnp.float32),
        'v_w':        s * jax.random.normal(ks[11], (1, ATT_DIM), jnp.float32),
        'mel_w':      s * jax.random.normal(ks[12], (DEC_RNN + ENC_DIM, M), jnp.float32),
        'mel_b':      s * jax.random.normal(ks[13], (1, M), jnp.float32),
        'gate_w':     s * jax.random.normal(ks[14], (1, DEC_RNN + ENC_DIM), jnp.float32),
        'gate_b':     s * jax.random.normal(ks[15], (1, 1), jnp.float32),
    }
    return p


if __name__ == "__main__":
    key = jax.random.PRNGKey(0)
    k1, k2, k3, kp = jax.random.split(key, 4)

    memory = jax.random.normal(k1, (B, T_TEXT, ENC_DIM), jnp.float32)
    processed_memory = jax.random.normal(k2, (B, T_TEXT, ATT_DIM), jnp.float32)
    memory_lens = jnp.array([T_TEXT, T_TEXT - 2], dtype=jnp.int32)
    mel_truth = jax.random.normal(k3, (B, N_MEL, T_MEL), jnp.float32)
    params = init_params(kp)

    mel_out, gate_out, align_out = jax.block_until_ready(
        decoder_forward(memory, processed_memory, memory_lens, mel_truth, params))

    mel_ref, gate_ref, align_ref = decoder_forward_ref(
        memory, processed_memory, memory_lens, mel_truth, params)

    assert mel_out.shape == (B, N_MEL, T_STEPS * N_FRAMES)
    assert gate_out.shape == (B, T_STEPS)
    assert align_out.shape == (B, T_STEPS, T_TEXT)
    np.testing.assert_allclose(np.asarray(mel_out), np.asarray(mel_ref), rtol=5e-2, atol=5e-3)
    np.testing.assert_allclose(np.asarray(gate_out), np.asarray(gate_ref), rtol=5e-2, atol=5e-3)
    np.testing.assert_allclose(np.asarray(align_out), np.asarray(align_ref), rtol=5e-2, atol=5e-3)

    print("KERNEL_OK")
</pallas_src>

<mosaic_0001>
module attributes {stable_mosaic.version = 11 : i64} {
  func.func @decoder_kernel(%arg0: i32, %arg1: memref<16x16xf32, #tpu.memory_space<vmem>>, %arg2: memref<2x8x32xf32, #tpu.memory_space<vmem>>, %arg3: memref<2x128xf32, #tpu.memory_space<vmem>>, %arg4: memref<2x8xf32, #tpu.memory_space<vmem>>, %arg5: memref<16x32xf32, #tpu.memory_space<vmem>>, %arg6: memref<32x32xf32, #tpu.memory_space<vmem>>, %arg7: memref<97x128xf32, #tpu.memory_space<vmem>>, %arg8: memref<97x128xf32, #tpu.memory_space<vmem>>, %arg9: memref<48x128xf32, #tpu.memory_space<vmem>>, %arg10: memref<128x8xf32, #tpu.memory_space<vmem>>, %arg11: memref<64x128xf32, #tpu.memory_space<vmem>>, %arg12: memref<1x128xf32, #tpu.memory_space<vmem>>, %arg13: memref<16x128xf32, #tpu.memory_space<vmem>>, %arg14: memref<8x2x8xf32, #tpu.memory_space<vmem>>, %arg15: memref<16x32xf32, #tpu.memory_space<vmem>>, %arg16: memref<16x64xf32, #tpu.memory_space<vmem>>, %arg17: memref<2x97xf32, #tpu.memory_space<vmem>>, %arg18: memref<2x32xf32, #tpu.memory_space<vmem>>, %arg19: memref<2x97xf32, #tpu.memory_space<vmem>>, %arg20: memref<2x32xf32, #tpu.memory_space<vmem>>, %arg21: memref<2x48xf32, #tpu.memory_space<vmem>>) attributes {dimension_semantics = [#tpu.dimension_semantics<arbitrary>], iteration_bounds = array<i64: 1>, scalar_prefetch = 0 : i64, scratch_operands = 7 : i64, tpu.core_type = #tpu.core_type<tc>, window_params = [{pipeline_mode = #tpu.pipeline_mode<synchronous>, transform_indices = @transform_0, window_bounds = array<i64: 16, 16>}, {pipeline_mode = #tpu.pipeline_mode<synchronous>, transform_indices = @transform_1, window_bounds = array<i64: 2, 8, 32>}, {pipeline_mode = #tpu.pipeline_mode<synchronous>, transform_indices = @transform_2, window_bounds = array<i64: 2, 128>}, {pipeline_mode = #tpu.pipeline_mode<synchronous>, transform_indices = @transform_3, window_bounds = array<i64: 2, 8>}, {pipeline_mode = #tpu.pipeline_mode<synchronous>, transform_indices = @transform_4, window_bounds = array<i64: 16, 32>}, {pipeline_mode = #tpu.pipeline_mode<synchronous>, transform_indices = @transform_5, window_bounds = array<i64: 32, 32>}, {pipeline_mode = #tpu.pipeline_mode<synchronous>, transform_indices = @transform_6, window_bounds = array<i64: 97, 128>}, {pipeline_mode = #tpu.pipeline_mode<synchronous>, transform_indices = @transform_7, window_bounds = array<i64: 97, 128>}, {pipeline_mode = #tpu.pipeline_mode<synchronous>, transform_indices = @transform_8, window_bounds = array<i64: 48, 128>}, {pipeline_mode = #tpu.pipeline_mode<synchronous>, transform_indices = @transform_9, window_bounds = array<i64: 128, 8>}, {pipeline_mode = #tpu.pipeline_mode<synchronous>, transform_indices = @transform_10, window_bounds = array<i64: 64, 128>}, {pipeline_mode = #tpu.pipeline_mode<synchronous>, transform_indices = @transform_11, window_bounds = array<i64: 1, 128>}, {pipeline_mode = #tpu.pipeline_mode<synchronous>, transform_indices = @transform_12, window_bounds = array<i64: 16, 128>}, {pipeline_mode = #tpu.pipeline_mode<synchronous>, transform_indices = @transform_13, window_bounds = array<i64: 8, 2, 8>}]} {
    %cst = arith.constant 0.000000e+00 : f32
    %0 = vector.broadcast %cst : f32 to vector<2x97xf32>
    %c0 = arith.constant 0 : index
    %c0_0 = arith.constant 0 : index
    %1 = vector.load %arg17[%c0, %c0_0] : memref<2x97xf32, #tpu.memory_space<vmem>>, vector<2x97xf32>
    tpu.vector_store %arg17[%c0, %c0_0], %0 {strides = array<i32>} : memref<2x97xf32, #tpu.memory_space<vmem>>, vector<2x97xf32>,
    %cst_1 = arith.constant 1.000000e+00 : f32
    %2 = vector.broadcast %cst_1 : f32 to vector<2x1xf32>
    %c0_2 = arith.constant 0 : index
    %c96 = arith.constant 96 : index
    %3 = vector.load %arg17[%c0_2, %c96] : memref<2x97xf32, #tpu.memory_space<vmem>>, vector<2x1xf32>
    tpu.vector_store %arg17[%c0_2, %c96], %2 {strides = array<i32>} : memref<2x97xf32, #tpu.memory_space<vmem>>, vector<2x1xf32>,
    %cst_3 = arith.constant 0.000000e+00 : f32
    %4 = vector.broadcast %cst_3 : f32 to vector<2x32xf32>
    %c0_4 = arith.constant 0 : index
    %c0_5 = arith.constant 0 : index
    %5 = vector.load %arg18[%c0_4, %c0_5] : memref<2x32xf32, #tpu.memory_space<vmem>>, vector<2x32xf32>
    tpu.vector_store %arg18[%c0_4, %c0_5], %4 {strides = array<i32>} : memref<2x32xf32, #tpu.memory_space<vmem>>, vector<2x32xf32>,
    %cst_6 = arith.constant 0.000000e+00 : f32
    %6 = vector.broadcast %cst_6 : f32 to vector<2x97xf32>
    %c0_7 = arith.constant 0 : index
    %c0_8 = arith.constant 0 : index
    %7 = vector.load %arg19[%c0_7, %c0_8] : memref<2x97xf32, #tpu.memory_space<vmem>>, vector<2x97xf32>
    tpu.vector_store %arg19[%c0_7, %c0_8], %6 {strides = array<i32>} : memref<2x97xf32, #tpu.memory_space<vmem>>, vector<2x97xf32>,
    %cst_9 = arith.constant 1.000000e+00 : f32
    %8 = vector.broadcast %cst_9 : f32 to vector<2x1xf32>
    %c0_10 = arith.constant 0 : index
    %c96_11 = arith.constant 96 : index
    %9 = vector.load %arg19[%c0_10, %c96_11] : memref<2x97xf32, #tpu.memory_space<vmem>>, vector<2x1xf32>
    tpu.vector_store %arg19[%c0_10, %c96_11], %8 {strides = array<i32>} : memref<2x97xf32, #tpu.memory_space<vmem>>, vector<2x1xf32>,
    %cst_12 = arith.constant 0.000000e+00 : f32
    %10 = vector.broadcast %cst_12 : f32 to vector<2x32xf32>
    %c0_13 = arith.constant 0 : index
    %c0_14 = arith.constant 0 : index
    %11 = vector.load %arg20[%c0_13, %c0_14] : memref<2x32xf32, #tpu.memory_space<vmem>>, vector<2x32xf32>
    tpu.vector_store %arg20[%c0_13, %c0_14], %10 {strides = array<i32>} : memref<2x32xf32, #tpu.memory_space<vmem>>, vector<2x32xf32>,
    %cst_15 = arith.constant 0.000000e+00 : f32
    %12 = vector.broadcast %cst_15 : f32 to vector<2x48xf32>
    %c0_16 = arith.constant 0 : index
    %c0_17 = arith.constant 0 : index
    %13 = vector.load %arg21[%c0_16, %c0_17] : memref<2x48xf32, #tpu.memory_space<vmem>>, vector<2x48xf32>
    tpu.vector_store %arg21[%c0_16, %c0_17], %12 {strides = array<i32>} : memref<2x48xf32, #tpu.memory_space<vmem>>, vector<2x48xf32>,
    %c0_18 = arith.constant 0 : index
    %c0_19 = arith.constant 0 : index
    %14 = vector.load %arg1[%c0_18, %c0_19] : memref<16x16xf32, #tpu.memory_space<vmem>>, vector<16x16xf32>
    %c0_20 = arith.constant 0 : index
    %c0_21 = arith.constant 0 : index
    %15 = vector.load %arg5[%c0_20, %c0_21] : memref<16x32xf32, #tpu.memory_space<vmem>>, vector<16x32xf32>
    %cst_22 = arith.constant dense<0.000000e+00> : vector<16x32xf32>
    %16 = tpu.matmul %14, %15, %cst_22 {dimension_numbers = #tpu.dot_dimension_numbers<[1], [0], [0], [1], [0, 0, 1, 1], [], []>} : vector<16x16xf32>, vector<16x32xf32>, vector<16x32xf32> -> vector<16x32xf32>
    %cst_23 = arith.constant 0.000000e+00 : f32
    %17 = vector.broadcast %cst_23 : f32 to vector<16x32xf32>
    %18 = arith.maximumf %16, %17 : vector<16x32xf32>
    %c0_24 = arith.constant 0 : index
    %c0_25 = arith.constant 0 : index
    %19 = vector.load %arg6[%c0_24, %c0_25] : memref<32x32xf32, #tpu.memory_space<vmem>>, vector<32x32xf32>
    %cst_26 = arith.constant dense<0.000000e+00> : vector<16x32xf32>
    %20 = tpu.matmul %18, %19, %cst_26 {dimension_numbers = #tpu.dot_dimension_numbers<[1], [0], [0], [1], [0, 0, 1, 1], [], []>} : vector<16x32xf32>, vector<32x32xf32>, vector<16x32xf32> -> vector<16x32xf32>
    %cst_27 = arith.constant 0.000000e+00 : f32
    %21 = vector.broadcast %cst_27 : f32 to vector<16x32xf32>
    %22 = arith.maximumf %20, %21 : vector<16x32xf32>
    %c0_28 = arith.constant 0 : index
    %c0_29 = arith.constant 0 : index
    %23 = vector.load %arg15[%c0_28, %c0_29] : memref<16x32xf32, #tpu.memory_space<vmem>>, vector<16x32xf32>
    tpu.vector_store %arg15[%c0_28, %c0_29], %22 {strides = array<i32>} : memref<16x32xf32, #tpu.memory_space<vmem>>, vector<16x32xf32>,
    %c0_30 = arith.constant 0 : index
    %c0_31 = arith.constant 0 : index
    %24 = vector.load %arg15[%c0_30, %c0_31] : memref<16x32xf32, #tpu.memory_space<vmem>>, vector<2x32xf32>
    %c0_32 = arith.constant 0 : index
    %c0_33 = arith.constant 0 : index
    %25 = vector.load %arg17[%c0_32, %c0_33] : memref<2x97xf32, #tpu.memory_space<vmem>>, vector<2x32xf32>
    tpu.vector_store %arg17[%c0_32, %c0_33], %24 {strides = array<i32>} : memref<2x97xf32, #tpu.memory_space<vmem>>, vector<2x32xf32>,
    %c0_34 = arith.constant 0 : index
    %c0_35 = arith.constant 0 : index
    %26 = vector.load %arg17[%c0_34, %c0_35] : memref<2x97xf32, #tpu.memory_space<vmem>>, vector<2x97xf32>
    %c0_36 = arith.constant 0 : index
    %c0_37 = arith.constant 0 : index
    %27 = vector.load %arg7[%c0_36, %c0_37] : memref<97x128xf32, #tpu.memory_space<vmem>>, vector<97x128xf32>
    %cst_38 = arith.constant dense<0.000000e+00> : vector<2x128xf32>
    %28 = tpu.matmul %26, %27, %cst_38 {dimension_numbers = #tpu.dot_dimension_numbers<[1], [0], [0], [1], [0, 0, 1, 1], [], []>} : vector<2x97xf32>, vector<97x128xf32>, vector<2x128xf32> -> vector<2x128xf32>
    %c0_39 = arith.constant 0 : index
    %c0_40 = arith.constant 0 : index
    %29 = vector.load %arg18[%c0_39, %c0_40] : memref<2x32xf32, #tpu.memory_space<vmem>>, vector<2x32xf32>
    %30 = vector.extract_strided_slice %28 {offsets = [0, 0], sizes = [2, 32], strides = [1, 1]} : vector<2x128xf32> to vector<2x32xf32>
    %31 = arith.negf %30 : vector<2x32xf32>
    %32 = math.exp %31 : vector<2x32xf32>
    %cst_41 = arith.constant 1.000000e+00 : f32
    %33 = vector.broadcast %cst_41 : f32 to vector<2x32xf32>
    %34 = arith.addf %33, %32 : vector<2x32xf32>
    %35 = arith.divf %33, %34 : vector<2x32xf32>
    %36 = vector.extract_strided_slice %28 {offsets = [0, 32], sizes = [2, 32], strides = [1, 1]} : vector<2x128xf32> to vector<2x32xf32>
    %37 = arith.negf %36 : vector<2x32xf32>
    %38 = math.exp %37 : vector<2x32xf32>
    %cst_42 = arith.constant 1.000000e+00 : f32
    %39 = vector.broadcast %cst_42 : f32 to vector<2x32xf32>
    %40 = arith.addf %39, %38 : vector<2x32xf32>
    %41 = arith.divf %39, %40 : vector<2x32xf32>
    %42 = vector.extract_strided_slice %28 {offsets = [0, 64], sizes = [2, 32], strides = [1, 1]} : vector<2x128xf32> to vector<2x32xf32>
    %43 = math.tanh %42 : vector<2x32xf32>
    %44 = vector.extract_strided_slice %28 {offsets = [0, 96], sizes = [2, 32], strides = [1, 1]} : vector<2x128xf32> to vector<2x32xf32>
    %45 = arith.negf %44 : vector<2x32xf32>
    %46 = math.exp %45 : vector<2x32xf32>
    %cst_43 = arith.constant 1.000000e+00 : f32
    %47 = vector.broadcast %cst_43 : f32 to vector<2x32xf32>
    %48 = arith.addf %47, %46 : vector<2x32xf32>
    %49 = arith.divf %47, %48 : vector<2x32xf32>
    %50 = arith.mulf %41, %29 : vector<2x32xf32>
    %51 = arith.mulf %35, %43 : vector<2x32xf32>
    %52 = arith.addf %50, %51 : vector<2x32xf32>
    %53 = math.tanh %52 : vector<2x32xf32>
    %54 = arith.mulf %49, %53 : vector<2x32xf32>
    %c0_44 = arith.constant 0 : index
    %c0_45 = arith.constant 0 : index
    %55 = vector.load %arg18[%c0_44, %c0_45] : memref<2x32xf32, #tpu.memory_space<vmem>>, vector<2x32xf32>
    tpu.vector_store %arg18[%c0_44, %c0_45], %52 {strides = array<i32>} : memref<2x32xf32, #tpu.memory_space<vmem>>, vector<2x32xf32>,
    %c0_46 = arith.constant 0 : index
    %c64 = arith.constant 64 : index
    %56 = vector.load %arg17[%c0_46, %c64] : memref<2x97xf32, #tpu.memory_space<vmem>>, vector<2x32xf32>
    tpu.vector_store %arg17[%c0_46, %c64], %54 {strides = array<i32>} : memref<2x97xf32, #tpu.memory_space<vmem>>, vector<2x32xf32>,
    %c0_47 = arith.constant 0 : index
    %c16 = arith.constant 16 : index
    %57 = vector.load %arg21[%c0_47, %c16] : memref<2x48xf32, #tpu.memory_space<vmem>>, vector<2x32xf32>
    tpu.vector_store %arg21[%c0_47, %c16], %54 {strides = array<i32>} : memref<2x48xf32, #tpu.memory_space<vmem>>, vector<2x32xf32>,
    %c0_48 = arith.constant 0 : index
    %c0_49 = arith.constant 0 : index
    %58 = vector.load %arg21[%c0_48, %c0_49] : memref<2x48xf32, #tpu.memory_space<vmem>>, vector<2x48xf32>
    %c0_50 = arith.constant 0 : index
    %c0_51 = arith.constant 0 : index
    %59 = vector.load %arg9[%c0_50, %c0_51] : memref<48x128xf32, #tpu.memory_space<vmem>>, vector<48x128xf32>
    %cst_52 = arith.constant dense<0.000000e+00> : vector<2x128xf32>
    %60 = tpu.matmul %58, %59, %cst_52 {dimension_numbers = #tpu.dot_dimension_numbers<[1], [0], [0], [1], [0, 0, 1, 1], [], []>} : vector<2x48xf32>, vector<48x128xf32>, vector<2x128xf32> -> vector<2x128xf32>
    %c0_53 = arith.constant 0 : index
    %c0_54 = arith.constant 0 : index
    %61 = vector.load %arg3[%c0_53, %c0_54] : memref<2x128xf32, #tpu.memory_space<vmem>>, vector<2x128xf32>
    %62 = arith.addf %60, %61 : vector<2x128xf32>
    %63 = math.tanh %62 : vector<2x128xf32>
    %c0_55 = arith.constant 0 : index
    %c0_56 = arith.constant 0 : index
    %64 = vector.load %arg10[%c0_55, %c0_56] : memref<128x8xf32, #tpu.memory_space<vmem>>, vector<128x8xf32>
    %cst_57 = arith.constant dense<0.000000e+00> : vector<2x8xf32>
    %65 = tpu.matmul %63, %64, %cst_57 {dimension_numbers = #tpu.dot_dimension_numbers<[1], [0], [0], [1], [0, 0, 1, 1], [], []>} : vector<2x128xf32>, vector<128x8xf32>, vector<2x8xf32> -> vector<2x8xf32>
    %c0_58 = arith.constant 0 : index
    %c0_59 = arith.constant 0 : index
    %66 = vector.load %arg4[%c0_58, %c0_59] : memref<2x8xf32, #tpu.memory_space<vmem>>, vector<2x8xf32>
    %67 = arith.addf %65, %66 : vector<2x8xf32>
    %cst_60 = arith.constant dense<0xFF800000> : vector<2xf32>
    %68 = vector.multi_reduction <maximumf>, %67, %cst_60 [1] : vector<2x8xf32> to vector<2xf32>
    %69 = vector.shape_cast %68 : vector<2xf32> to vector<2x1xf32>
    %70 = vector.broadcast %69 : vector<2x1xf32> to vector<2x8xf32>
    %71 = arith.subf %67, %70 : vector<2x8xf32>
    %72 = math.exp %71 : vector<2x8xf32>
    %cst_61 = arith.constant dense<0.000000e+00> : vector<2xf32>
    %73 = vector.multi_reduction <add>, %72, %cst_61 [1] : vector<2x8xf32> to vector<2xf32>
    %74 = vector.shape_cast %73 : vector<2xf32> to vector<2x1xf32>
    %75 = tpu.reciprocal %74 : vector<2x1xf32> -> vector<2x1xf32>
    %76 = vector.broadcast %75 : vector<2x1xf32> to vector<2x8xf32>
    %77 = arith.mulf %72, %76 : vector<2x8xf32>
    %78 = vector.shape_cast %77 : vector<2x8xf32> to vector<2x8x1xf32>
    %c0_62 = arith.constant 0 : index
    %c0_63 = arith.constant 0 : index
    %c0_64 = arith.constant 0 : index
    %79 = vector.load %arg2[%c0_62, %c0_63, %c0_64] : memref<2x8x32xf32, #tpu.memory_space<vmem>>, vector<2x8x32xf32>
    %80 = vector.broadcast %78 : vector<2x8x1xf32> to vector<2x8x32xf32>
    %81 = arith.mulf %80, %79 : vector<2x8x32xf32>
    %cst_65 = arith.constant dense<0.000000e+00> : vector<2x32xf32>
    %82 = vector.multi_reduction <add>, %81, %cst_65 [1] : vector<2x8x32xf32> to vector<2x32xf32>
    %c0_66 = arith.constant 0 : index
    %c0_67 = arith.constant 0 : index
    %83 = vector.load %arg21[%c0_66, %c0_67] : memref<2x48xf32, #tpu.memory_space<vmem>>, vector<2x8xf32>
    tpu.vector_store %arg21[%c0_66, %c0_67], %77 {strides = array<i32>} : memref<2x48xf32, #tpu.memory_space<vmem>>, vector<2x8xf32>,
    %c0_68 = arith.constant 0 : index
    %c8 = arith.constant 8 : index
    %84 = vector.load %arg21[%c0_68, %c8] : memref<2x48xf32, #tpu.memory_space<vmem>>, vector<2x8xf32>
    %85 = arith.addf %84, %77 : vector<2x8xf32>
    %c0_69 = arith.constant 0 : index
    %c8_70 = arith.constant 8 : index
    %86 = vector.load %arg21[%c0_69, %c8_70] : memref<2x48xf32, #tpu.memory_space<vmem>>, vector<2x8xf32>
    tpu.vector_store %arg21[%c0_69, %c8_70], %85 {strides = array<i32>} : memref<2x48xf32, #tpu.memory_space<vmem>>, vector<2x8xf32>,
    %c0_71 = arith.constant 0 : index
    %c32 = arith.constant 32 : index
    %87 = vector.load %arg17[%c0_71, %c32] : memref<2x97xf32, #tpu.memory_space<vmem>>, vector<2x32xf32>
    tpu.vector_store %arg17[%c0_71, %c32], %82 {strides = array<i32>} : memref<2x97xf32, #tpu.memory_space<vmem>>, vector<2x32xf32>,
    %c0_72 = arith.constant 0 : index
    %c0_73 = arith.constant 0 : index
    %c0_74 = arith.constant 0 : index
    %88 = vector.load %arg14[%c0_72, %c0_73, %c0_74] : memref<8x2x8xf32, #tpu.memory_space<vmem>>, vector<1x2x8xf32>
    %89 = vector.shape_cast %88 : vector<1x2x8xf32> to vector<2x8xf32>
    %90 = vector.shape_cast %77 : vector<2x8xf32> to vector<1x2x8xf32>
    tpu.vector_store %arg14[%c0_72, %c0_73, %c0_74], %90 {strides = array<i32>} : memref<8x2x8xf32, #tpu.memory_space<vmem>>, vector<1x2x8xf32>,
    %c0_75 = arith.constant 0 : index
    %c0_76 = arith.constant 0 : index
    %91 = vector.load %arg19[%c0_75, %c0_76] : memref<2x97xf32, #tpu.memory_space<vmem>>, vector<2x32xf32>
    tpu.vector_store %arg19[%c0_75, %c0_76], %54 {strides = array<i32>} : memref<2x97xf32, #tpu.memory_space<vmem>>, vector<2x32xf32>,
    %c0_77 = arith.constant 0 : index
    %c32_78 = arith.constant 32 : index
    %92 = vector.load %arg19[%c0_77, %c32_78] : memref<2x97xf32, #tpu.memory_space<vmem>>, vector<2x32xf32>
    tpu.vector_store %arg19[%c0_77, %c32_78], %82 {strides = array<i32>} : memref<2x97xf32, #tpu.memory_space<vmem>>, vector<2x32xf32>,
    %c0_79 = arith.constant 0 : index
    %c0_80 = arith.constant 0 : index
    %93 = vector.load %arg19[%c0_79, %c0_80] : memref<2x97xf32, #tpu.memory_space<vmem>>, vector<2x97xf32>
    %c0_81 = arith.constant 0 : index
    %c0_82 = arith.constant 0 : index
    %94 = vector.load %arg8[%c0_81, %c0_82] : memref<97x128xf32, #tpu.memory_space<vmem>>, vector<97x128xf32>
    %cst_83 = arith.constant dense<0.000000e+00> : vector<2x128xf32>
    %95 = tpu.matmul %93, %94, %cst_83 {dimension_numbers = #tpu.dot_dimension_numbers<[1], [0], [0], [1], [0, 0, 1, 1], [], []>} : vector<2x97xf32>, vector<97x128xf32>, vector<2x128xf32> -> vector<2x128xf32>
    %c0_84 = arith.constant 0 : index
    %c0_85 = arith.constant 0 : index
    %96 = vector.load %arg20[%c0_84, %c0_85] : memref<2x32xf32, #tpu.memory_space<vmem>>, vector<2x32xf32>
    %97 = vector.extract_strided_slice %95 {offsets = [0, 0], sizes = [2, 32], strides = [1, 1]} : vector<2x128xf32> to vector<2x32xf32>
    %98 = arith.negf %97 : vector<2x32xf32>
    %99 = math.exp %98 : vector<2x32xf32>
    %cst_86 = arith.constant 1.000000e+00 : f32
    %100 = vector.broadcast %cst_86 : f32 to vector<2x32xf32>
    %101 = arith.addf %100, %99 : vector<2x32xf32>
    %102 = arith.divf %100, %101 : vector<2x32xf32>
    %103 = vector.extract_strided_slice %95 {offsets = [0, 32], sizes = [2, 32], strides = [1, 1]} : vector<2x128xf32> to vector<2x32xf32>
    %104 = arith.negf %103 : vector<2x32xf32>
    %105 = math.exp %104 : vector<2x32xf32>
    %cst_87 = arith.constant 1.000000e+00 : f32
    %106 = vector.broadcast %cst_87 : f32 to vector<2x32xf32>
    %107 = arith.addf %106, %105 : vector<2x32xf32>
    %108 = arith.divf %106, %107 : vector<2x32xf32>
    %109 = vector.extract_strided_slice %95 {offsets = [0, 64], sizes = [2, 32], strides = [1, 1]} : vector<2x128xf32> to vector<2x32xf32>
    %110 = math.tanh %109 : vector<2x32xf32>
    %111 = vector.extract_strided_slice %95 {offsets = [0, 96], sizes = [2, 32], strides = [1, 1]} : vector<2x128xf32> to vector<2x32xf32>
    %112 = arith.negf %111 : vector<2x32xf32>
    %113 = math.exp %112 : vector<2x32xf32>
    %cst_88 = arith.constant 1.000000e+00 : f32
    %114 = vector.broadcast %cst_88 : f32 to vector<2x32xf32>
    %115 = arith.addf %114, %113 : vector<2x32xf32>
    %116 = arith.divf %114, %115 : vector<2x32xf32>
    %117 = arith.mulf %108, %96 : vector<2x32xf32>
    %118 = arith.mulf %102, %110 : vector<2x32xf32>
    %119 = arith.addf %117, %118 : vector<2x32xf32>
    %120 = math.tanh %119 : vector<2x32xf32>
    %121 = arith.mulf %116, %120 : vector<2x32xf32>
    %c0_89 = arith.constant 0 : index
    %c0_90 = arith.constant 0 : index
    %122 = vector.load %arg20[%c0_89, %c0_90] : memref<2x32xf32, #tpu.memory_space<vmem>>, vector<2x32xf32>
    tpu.vector_store %arg20[%c0_89, %c0_90], %119 {strides = array<i32>} : memref<2x32xf32, #tpu.memory_space<vmem>>, vector<2x32xf32>,
    %c0_91 = arith.constant 0 : index
    %c64_92 = arith.constant 64 : index
    %123 = vector.load %arg19[%c0_91, %c64_92] : memref<2x97xf32, #tpu.memory_space<vmem>>, vector<2x32xf32>
    tpu.vector_store %arg19[%c0_91, %c64_92], %121 {strides = array<i32>} : memref<2x97xf32, #tpu.memory_space<vmem>>, vector<2x32xf32>,
    %c0_93 = arith.constant 0 : index
    %c0_94 = arith.constant 0 : index
    %124 = vector.load %arg16[%c0_93, %c0_94] : memref<16x64xf32, #tpu.memory_space<vmem>>, vector<2x32xf32>
    tpu.vector_store %arg16[%c0_93, %c0_94], %121 {strides = array<i32>} : memref<16x64xf32, #tpu.memory_space<vmem>>, vector<2x32xf32>,
    %c0_95 = arith.constant 0 : index
    %c32_96 = arith.constant 32 : index
    %125 = vector.load %arg16[%c0_95, %c32_96] : memref<16x64xf32, #tpu.memory_space<vmem>>, vector<2x32xf32>
    tpu.vector_store %arg16[%c0_95, %c32_96], %82 {strides = array<i32>} : memref<16x64xf32, #tpu.memory_space<vmem>>, vector<2x32xf32>,
    %c2 = arith.constant 2 : index
    %c0_97 = arith.constant 0 : index
    %126 = vector.load %arg15[%c2, %c0_97] : memref<16x32xf32, #tpu.memory_space<vmem>>, vector<2x32xf32>
    %c0_98 = arith.constant 0 : index
    %c0_99 = arith.constant 0 : index
    %127 = vector.load %arg17[%c0_98, %c0_99] : memref<2x97xf32, #tpu.memory_space<vmem>>, vector<2x32xf32>
    tpu.vector_store %arg17[%c0_98, %c0_99], %126 {strides = array<i32>} : memref<2x97xf32, #tpu.memory_space<vmem>>, vector<2x32xf32>,
    %c0_100 = arith.constant 0 : index
    %c0_101 = arith.constant 0 : index
    %128 = vector.load %arg17[%c0_100, %c0_101] : memref<2x97xf32, #tpu.memory_space<vmem>>, vector<2x97xf32>
    %c0_102 = arith.constant 0 : index
    %c0_103 = arith.constant 0 : index
    %129 = vector.load %arg7[%c0_102, %c0_103] : memref<97x128xf32, #tpu.memory_space<vmem>>, vector<97x128xf32>
    %cst_104 = arith.constant dense<0.000000e+00> : vector<2x128xf32>
    %130 = tpu.matmul %128, %129, %cst_104 {dimension_numbers = #tpu.dot_dimension_numbers<[1], [0], [0], [1], [0, 0, 1, 1], [], []>} : vector<2x97xf32>, vector<97x128xf32>, vector<2x128xf32> -> vector<2x128xf32>
    %c0_105 = arith.constant 0 : index
    %c0_106 = arith.constant 0 : index
    %131 = vector.load %arg18[%c0_105, %c0_106] : memref<2x32xf32, #tpu.memory_space<vmem>>, vector<2x32xf32>
    %132 = vector.extract_strided_slice %130 {offsets = [0, 0], sizes = [2, 32], strides = [1, 1]} : vector<2x128xf32> to vector<2x32xf32>
    %133 = arith.negf %132 : vector<2x32xf32>
    %134 = math.exp %133 : vector<2x32xf32>
    %cst_107 = arith.constant 1.000000e+00 : f32
    %135 = vector.broadcast %cst_107 : f32 to vector<2x32xf32>
    %136 = arith.addf %135, %134 : vector<2x32xf32>
    %137 = arith.divf %135, %136 : vector<2x32xf32>
    %138 = vector.extract_strided_slice %130 {offsets = [0, 32], sizes = [2, 32], strides = [1, 1]} : vector<2x128xf32> to vector<2x32xf32>
    %139 = arith.negf %138 : vector<2x32xf32>
    %140 = math.exp %139 : vector<2x32xf32>
    %cst_108 = arith.constant 1.000000e+00 : f32
    %141 = vector.broadcast %cst_108 : f32 to vector<2x32xf32>
    %142 = arith.addf %141, %140 : vector<2x32xf32>
    %143 = arith.divf %141, %142 : vector<2x32xf32>
    %144 = vector.extract_strided_slice %130 {offsets = [0, 64], sizes = [2, 32], strides = [1, 1]} : vector<2x128xf32> to vector<2x32xf32>
    %145 = math.tanh %144 : vector<2x32xf32>
    %146 = vector.extract_strided_slice %130 {offsets = [0, 96], sizes = [2, 32], strides = [1, 1]} : vector<2x128xf32> to vector<2x32xf32>
    %147 = arith.negf %146 : vector<2x32xf32>
    %148 = math.exp %147 : vector<2x32xf32>
    %cst_109 = arith.constant 1.000000e+00 : f32
    %149 = vector.broadcast %cst_109 : f32 to vector<2x32xf32>
    %150 = arith.addf %149, %148 : vector<2x32xf32>
    %151 = arith.divf %149, %150 : vector<2x32xf32>
    %152 = arith.mulf %143, %131 : vector<2x32xf32>
    %153 = arith.mulf %137, %145 : vector<2x32xf32>
    %154 = arith.addf %152, %153 : vector<2x32xf32>
    %155 = math.tanh %154 : vector<2x32xf32>
    %156 = arith.mulf %151, %155 : vector<2x32xf32>
    %c0_110 = arith.constant 0 : index
    %c0_111 = arith.constant 0 : index
    %157 = vector.load %arg18[%c0_110, %c0_111] : memref<2x32xf32, #tpu.memory_space<vmem>>, vector<2x32xf32>
    tpu.vector_store %arg18[%c0_110, %c0_111], %154 {strides = array<i32>} : memref<2x32xf32, #tpu.memory_space<vmem>>, vector<2x32xf32>,
    %c0_112 = arith.constant 0 : index
    %c64_113 = arith.constant 64 : index
    %158 = vector.load %arg17[%c0_112, %c64_113] : memref<2x97xf32, #tpu.memory_space<vmem>>, vector<2x32xf32>
    tpu.vector_store %arg17[%c0_112, %c64_113], %156 {strides = array<i32>} : memref<2x97xf32, #tpu.memory_space<vmem>>, vector<2x32xf32>,
    %c0_114 = arith.constant 0 : index
    %c16_115 = arith.constant 16 : index
    %159 = vector.load %arg21[%c0_114, %c16_115] : memref<2x48xf32, #tpu.memory_space<vmem>>, vector<2x32xf32>
    tpu.vector_store %arg21[%c0_114, %c16_115], %156 {strides = array<i32>} : memref<2x48xf32, #tpu.memory_space<vmem>>, vector<2x32xf32>,
    %c0_116 = arith.constant 0 : index
    %c0_117 = arith.constant 0 : index
    %160 = vector.load %arg21[%c0_116, %c0_117] : memref<2x48xf32, #tpu.memory_space<vmem>>, vector<2x48xf32>
    %c0_118 = arith.constant 0 : index
    %c0_119 = arith.constant 0 : index
    %161 = vector.load %arg9[%c0_118, %c0_119] : memref<48x128xf32, #tpu.memory_space<vmem>>, vector<48x128xf32>
    %cst_120 = arith.constant dense<0.000000e+00> : vector<2x128xf32>
    %162 = tpu.matmul %160, %161, %cst_120 {dimension_numbers = #tpu.dot_dimension_numbers<[1], [0], [0], [1], [0, 0, 1, 1], [], []>} : vector<2x48xf32>, vector<48x128xf32>, vector<2x128xf32> -> vector<2x128xf32>
    %c0_121 = arith.constant 0 : index
    %c0_122 = arith.constant 0 : index
    %163 = vector.load %arg3[%c0_121, %c0_122] : memref<2x128xf32, #tpu.memory_space<vmem>>, vector<2x128xf32>
    %164 = arith.addf %162, %163 : vector<2x128xf32>
    %165 = math.tanh %164 : vector<2x128xf32>
    %c0_123 = arith.constant 0 : index
    %c0_124 = arith.constant 0 : index
    %166 = vector.load %arg10[%c0_123, %c0_124] : memref<128x8xf32, #tpu.memory_space<vmem>>, vector<128x8xf32>
    %cst_125 = arith.constant dense<0.000000e+00> : vector<2x8xf32>
    %167 = tpu.matmul %165, %166, %cst_125 {dimension_numbers = #tpu.dot_dimension_numbers<[1], [0], [0], [1], [0, 0, 1, 1], [], []>} : vector<2x128xf32>, vector<128x8xf32>, vector<2x8xf32> -> vector<2x8xf32>
    %c0_126 = arith.constant 0 : index
    %c0_127 = arith.constant 0 : index
    %168 = vector.load %arg4[%c0_126, %c0_127] : memref<2x8xf32, #tpu.memory_space<vmem>>, vector<2x8xf32>
    %169 = arith.addf %167, %168 : vector<2x8xf32>
    %cst_128 = arith.constant dense<0xFF800000> : vector<2xf32>
    %170 = vector.multi_reduction <maximumf>, %169, %cst_128 [1] : vector<2x8xf32> to vector<2xf32>
    %171 = vector.shape_cast %170 : vector<2xf32> to vector<2x1xf32>
    %172 = vector.broadcast %171 : vector<2x1xf32> to vector<2x8xf32>
    %173 = arith.subf %169, %172 : vector<2x8xf32>
    %174 = math.exp %173 : vector<2x8xf32>
    %cst_129 = arith.constant dense<0.000000e+00> : vector<2xf32>
    %175 = vector.multi_reduction <add>, %174, %cst_129 [1] : vector<2x8xf32> to vector<2xf32>
    %176 = vector.shape_cast %175 : vector<2xf32> to vector<2x1xf32>
    %177 = tpu.reciprocal %176 : vector<2x1xf32> -> vector<2x1xf32>
    %178 = vector.broadcast %177 : vector<2x1xf32> to vector<2x8xf32>
    %179 = arith.mulf %174, %178 : vector<2x8xf32>
    %180 = vector.shape_cast %179 : vector<2x8xf32> to vector<2x8x1xf32>
    %c0_130 = arith.constant 0 : index
    %c0_131 = arith.constant 0 : index
    %c0_132 = arith.constant 0 : index
    %181 = vector.load %arg2[%c0_130, %c0_131, %c0_132] : memref<2x8x32xf32, #tpu.memory_space<vmem>>, vector<2x8x32xf32>
    %182 = vector.broadcast %180 : vector<2x8x1xf32> to vector<2x8x32xf32>
    %183 = arith.mulf %182, %181 : vector<2x8x32xf32>
    %cst_133 = arith.constant dense<0.000000e+00> : vector<2x32xf32>
    %184 = vector.multi_reduction <add>, %183, %cst_133 [1] : vector<2x8x32xf32> to vector<2x32xf32>
    %c0_134 = arith.constant 0 : index
    %c0_135 = arith.constant 0 : index
    %185 = vector.load %arg21[%c0_134, %c0_135] : memref<2x48xf32, #tpu.memory_space<vmem>>, vector<2x8xf32>
    tpu.vector_store %arg21[%c0_134, %c0_135], %179 {strides = array<i32>} : memref<2x48xf32, #tpu.memory_space<vmem>>, vector<2x8xf32>,
    %c0_136 = arith.constant 0 : index
    %c8_137 = arith.constant 8 : index
    %186 = vector.load %arg21[%c0_136, %c8_137] : memref<2x48xf32, #tpu.memory_space<vmem>>, vector<2x8xf32>
    %187 = arith.addf %186, %179 : vector<2x8xf32>
    %c0_138 = arith.constant 0 : index
    %c8_139 = arith.constant 8 : index
    %188 = vector.load %arg21[%c0_138, %c8_139] : memref<2x48xf32, #tpu.memory_space<vmem>>, vector<2x8xf32>
    tpu.vector_store %arg21[%c0_138, %c8_139], %187 {strides = array<i32>} : memref<2x48xf32, #tpu.memory_space<vmem>>, vector<2x8xf32>,
    %c0_140 = arith.constant 0 : index
    %c32_141 = arith.constant 32 : index
    %189 = vector.load %arg17[%c0_140, %c32_141] : memref<2x97xf32, #tpu.memory_space<vmem>>, vector<2x32xf32>
    tpu.vector_store %arg17[%c0_140, %c32_141], %184 {strides = array<i32>} : memref<2x97xf32, #tpu.memory_space<vmem>>, vector<2x32xf32>,
    %c1 = arith.constant 1 : index
    %c0_142 = arith.constant 0 : index
    %c0_143 = arith.constant 0 : index
    %190 = vector.load %arg14[%c1, %c0_142, %c0_143] : memref<8x2x8xf32, #tpu.memory_space<vmem>>, vector<1x2x8xf32>
    %191 = vector.shape_cast %190 : vector<1x2x8xf32> to vector<2x8xf32>
    %192 = vector.shape_cast %179 : vector<2x8xf32> to vector<1x2x8xf32>
    tpu.vector_store %arg14[%c1, %c0_142, %c0_143], %192 {strides = array<i32>} : memref<8x2x8xf32, #tpu.memory_space<vmem>>, vector<1x2x8xf32>,
    %c0_144 = arith.constant 0 : index
    %c0_145 = arith.constant 0 : index
    %193 = vector.load %arg19[%c0_144, %c0_145] : memref<2x97xf32, #tpu.memory_space<vmem>>, vector<2x32xf32>
    tpu.vector_store %arg19[%c0_144, %c0_145], %156 {strides = array<i32>} : memref<2x97xf32, #tpu.memory_space<vmem>>, vector<2x32xf32>,
    %c0_146 = arith.constant 0 : index
    %c32_147 = arith.constant 32 : index
    %194 = vector.load %arg19[%c0_146, %c32_147] : memref<2x97xf32, #tpu.memory_space<vmem>>, vector<2x32xf32>
    tpu.vector_store %arg19[%c0_146, %c32_147], %184 {strides = array<i32>} : memref<2x97xf32, #tpu.memory_space<vmem>>, vector<2x32xf32>,
    %c0_148 = arith.constant 0 : index
    %c0_149 = arith.constant 0 : index
    %195 = vector.load %arg19[%c0_148, %c0_149] : memref<2x97xf32, #tpu.memory_space<vmem>>, vector<2x97xf32>
    %c0_150 = arith.constant 0 : index
    %c0_151 = arith.constant 0 : index
    %196 = vector.load %arg8[%c0_150, %c0_151] : memref<97x128xf32, #tpu.memory_space<vmem>>, vector<97x128xf32>
    %cst_152 = arith.constant dense<0.000000e+00> : vector<2x128xf32>
    %197 = tpu.matmul %195, %196, %cst_152 {dimension_numbers = #tpu.dot_dimension_numbers<[1], [0], [0], [1], [0, 0, 1, 1], [], []>} : vector<2x97xf32>, vector<97x128xf32>, vector<2x128xf32> -> vector<2x128xf32>
    %c0_153 = arith.constant 0 : index
    %c0_154 = arith.constant 0 : index
    %198 = vector.load %arg20[%c0_153, %c0_154] : memref<2x32xf32, #tpu.memory_space<vmem>>, vector<2x32xf32>
    %199 = vector.extract_strided_slice %197 {offsets = [0, 0], sizes = [2, 32], strides = [1, 1]} : vector<2x128xf32> to vector<2x32xf32>
    %200 = arith.negf %199 : vector<2x32xf32>
    %201 = math.exp %200 : vector<2x32xf32>
    %cst_155 = arith.constant 1.000000e+00 : f32
    %202 = vector.broadcast %cst_155 : f32 to vector<2x32xf32>
    %203 = arith.addf %202, %201 : vector<2x32xf32>
    %204 = arith.divf %202, %203 : vector<2x32xf32>
    %205 = vector.extract_strided_slice %197 {offsets = [0, 32], sizes = [2, 32], strides = [1, 1]} : vector<2x128xf32> to vector<2x32xf32>
    %206 = arith.negf %205 : vector<2x32xf32>
    %207 = math.exp %206 : vector<2x32xf32>
    %cst_156 = arith.constant 1.000000e+00 : f32
    %208 = vector.broadcast %cst_156 : f32 to vector<2x32xf32>
    %209 = arith.addf %208, %207 : vector<2x32xf32>
    %210 = arith.divf %208, %209 : vector<2x32xf32>
    %211 = vector.extract_strided_slice %197 {offsets = [0, 64], sizes = [2, 32], strides = [1, 1]} : vector<2x128xf32> to vector<2x32xf32>
    %212 = math.tanh %211 : vector<2x32xf32>
    %213 = vector.extract_strided_slice %197 {offsets = [0, 96], sizes = [2, 32], strides = [1, 1]} : vector<2x128xf32> to vector<2x32xf32>
    %214 = arith.negf %213 : vector<2x32xf32>
    %215 = math.exp %214 : vector<2x32xf32>
    %cst_157 = arith.constant 1.000000e+00 : f32
    %216 = vector.broadcast %cst_157 : f32 to vector<2x32xf32>
    %217 = arith.addf %216, %215 : vector<2x32xf32>
    %218 = arith.divf %216, %217 : vector<2x32xf32>
    %219 = arith.mulf %210, %198 : vector<2x32xf32>
    %220 = arith.mulf %204, %212 : vector<2x32xf32>
    %221 = arith.addf %219, %220 : vector<2x32xf32>
    %222 = math.tanh %221 : vector<2x32xf32>
    %223 = arith.mulf %218, %222 : vector<2x32xf32>
    %c0_158 = arith.constant 0 : index
    %c0_159 = arith.constant 0 : index
    %224 = vector.load %arg20[%c0_158, %c0_159] : memref<2x32xf32, #tpu.memory_space<vmem>>, vector<2x32xf32>
    tpu.vector_store %arg20[%c0_158, %c0_159], %221 {strides = array<i32>} : memref<2x32xf32, #tpu.memory_space<vmem>>, vector<2x32xf32>,
    %c0_160 = arith.constant 0 : index
    %c64_161 = arith.constant 64 : index
    %225 = vector.load %arg19[%c0_160, %c64_161] : memref<2x97xf32, #tpu.memory_space<vmem>>, vector<2x32xf32>
    tpu.vector_store %arg19[%c0_160, %c64_161], %223 {strides = array<i32>} : memref<2x97xf32, #tpu.memory_space<vmem>>, vector<2x32xf32>,
    %c2_162 = arith.constant 2 : index
    %c0_163 = arith.constant 0 : index
    %226 = vector.load %arg16[%c2_162, %c0_163] : memref<16x64xf32, #tpu.memory_space<vmem>>, vector<2x32xf32>
    tpu.vector_store %arg16[%c2_162, %c0_163], %223 {strides = array<i32>} : memref<16x64xf32, #tpu.memory_space<vmem>>, vector<2x32xf32>,
    %c2_164 = arith.constant 2 : index
    %c32_165 = arith.constant 32 : index
    %227 = vector.load %arg16[%c2_164, %c32_165] : memref<16x64xf32, #tpu.memory_space<vmem>>, vector<2x32xf32>
    tpu.vector_store %arg16[%c2_164, %c32_165], %184 {strides = array<i32>} : memref<16x64xf32, #tpu.memory_space<vmem>>, vector<2x32xf32>,
    %c4 = arith.constant 4 : index
    %c0_166 = arith.constant 0 : index
    %228 = vector.load %arg15[%c4, %c0_166] : memref<16x32xf32, #tpu.memory_space<vmem>>, vector<2x32xf32>
    %c0_167 = arith.constant 0 : index
    %c0_168 = arith.constant 0 : index
    %229 = vector.load %arg17[%c0_167, %c0_168] : memref<2x97xf32, #tpu.memory_space<vmem>>, vector<2x32xf32>
    tpu.vector_store %arg17[%c0_167, %c0_168], %228 {strides = array<i32>} : memref<2x97xf32, #tpu.memory_space<vmem>>, vector<2x32xf32>,
    %c0_169 = arith.constant 0 : index
    %c0_170 = arith.constant 0 : index
    %230 = vector.load %arg17[%c0_169, %c0_170] : memref<2x97xf32, #tpu.memory_space<vmem>>, vector<2x97xf32>
    %c0_171 = arith.constant 0 : index
    %c0_172 = arith.constant 0 : index
    %231 = vector.load %arg7[%c0_171, %c0_172] : memref<97x128xf32, #tpu.memory_space<vmem>>, vector<97x128xf32>
    %cst_173 = arith.constant dense<0.000000e+00> : vector<2x128xf32>
    %232 = tpu.matmul %230, %231, %cst_173 {dimension_numbers = #tpu.dot_dimension_numbers<[1], [0], [0], [1], [0, 0, 1, 1], [], []>} : vector<2x97xf32>, vector<97x128xf32>, vector<2x128xf32> -> vector<2x128xf32>
    %c0_174 = arith.constant 0 : index
    %c0_175 = arith.constant 0 : index
    %233 = vector.load %arg18[%c0_174, %c0_175] : memref<2x32xf32, #tpu.memory_space<vmem>>, vector<2x32xf32>
    %234 = vector.extract_strided_slice %232 {offsets = [0, 0], sizes = [2, 32], strides = [1, 1]} : vector<2x128xf32> to vector<2x32xf32>
    %235 = arith.negf %234 : vector<2x32xf32>
    %236 = math.exp %235 : vector<2x32xf32>
    %cst_176 = arith.constant 1.000000e+00 : f32
    %237 = vector.broadcast %cst_176 : f32 to vector<2x32xf32>
    %238 = arith.addf %237, %236 : vector<2x32xf32>
    %239 = arith.divf %237, %238 : vector<2x32xf32>
    %240 = vector.extract_strided_slice %232 {offsets = [0, 32], sizes = [2, 32], strides = [1, 1]} : vector<2x128xf32> to vector<2x32xf32>
    %241 = arith.negf %240 : vector<2x32xf32>
    %242 = math.exp %241 : vector<2x32xf32>
    %cst_177 = arith.constant 1.000000e+00 : f32
    %243 = vector.broadcast %cst_177 : f32 to vector<2x32xf32>
    %244 = arith.addf %243, %242 : vector<2x32xf32>
    %245 = arith.divf %243, %244 : vector<2x32xf32>
    %246 = vector.extract_strided_slice %232 {offsets = [0, 64], sizes = [2, 32], strides = [1, 1]} : vector<2x128xf32> to vector<2x32xf32>
    %247 = math.tanh %246 : vector<2x32xf32>
    %248 = vector.extract_strided_slice %232 {offsets = [0, 96], sizes = [2, 32], strides = [1, 1]} : vector<2x128xf32> to vector<2x32xf32>
    %249 = arith.negf %248 : vector<2x32xf32>
    %250 = math.exp %249 : vector<2x32xf32>
    %cst_178 = arith.constant 1.000000e+00 : f32
    %251 = vector.broadcast %cst_178 : f32 to vector<2x32xf32>
    %252 = arith.addf %251, %250 : vector<2x32xf32>
    %253 = arith.divf %251, %252 : vector<2x32xf32>
    %254 = arith.mulf %245, %233 : vector<2x32xf32>
    %255 = arith.mulf %239, %247 : vector<2x32xf32>
    %256 = arith.addf %254, %255 : vector<2x32xf32>
    %257 = math.tanh %256 : vector<2x32xf32>
    %258 = arith.mulf %253, %257 : vector<2x32xf32>
    %c0_179 = arith.constant 0 : index
    %c0_180 = arith.constant 0 : index
    %259 = vector.load %arg18[%c0_179, %c0_180] : memref<2x32xf32, #tpu.memory_space<vmem>>, vector<2x32xf32>
    tpu.vector_store %arg18[%c0_179, %c0_180], %256 {strides = array<i32>} : memref<2x32xf32, #tpu.memory_space<vmem>>, vector<2x32xf32>,
    %c0_181 = arith.constant 0 : index
    %c64_182 = arith.constant 64 : index
    %260 = vector.load %arg17[%c0_181, %c64_182] : memref<2x97xf32, #tpu.memory_space<vmem>>, vector<2x32xf32>
    tpu.vector_store %arg17[%c0_181, %c64_182], %258 {strides = array<i32>} : memref<2x97xf32, #tpu.memory_space<vmem>>, vector<2x32xf32>,
    %c0_183 = arith.constant 0 : index
    %c16_184 = arith.constant 16 : index
    %261 = vector.load %arg21[%c0_183, %c16_184] : memref<2x48xf32, #tpu.memory_space<vmem>>, vector<2x32xf32>
    tpu.vector_store %arg21[%c0_183, %c16_184], %258 {strides = array<i32>} : memref<2x48xf32, #tpu.memory_space<vmem>>, vector<2x32xf32>,
    %c0_185 = arith.constant 0 : index
    %c0_186 = arith.constant 0 : index
    %262 = vector.load %arg21[%c0_185, %c0_186] : memref<2x48xf32, #tpu.memory_space<vmem>>, vector<2x48xf32>
    %c0_187 = arith.constant 0 : index
    %c0_188 = arith.constant 0 : index
    %263 = vector.load %arg9[%c0_187, %c0_188] : memref<48x128xf32, #tpu.memory_space<vmem>>, vector<48x128xf32>
    %cst_189 = arith.constant dense<0.000000e+00> : vector<2x128xf32>
    %264 = tpu.matmul %262, %263, %cst_189 {dimension_numbers = #tpu.dot_dimension_numbers<[1], [0], [0], [1], [0, 0, 1, 1], [], []>} : vector<2x48xf32>, vector<48x128xf32>, vector<2x128xf32> -> vector<2x128xf32>
    %c0_190 = arith.constant 0 : index
    %c0_191 = arith.constant 0 : index
    %265 = vector.load %arg3[%c0_190, %c0_191] : memref<2x128xf32, #tpu.memory_space<vmem>>, vector<2x128xf32>
    %266 = arith.addf %264, %265 : vector<2x128xf32>
    %267 = math.tanh %266 : vector<2x128xf32>
    %c0_192 = arith.constant 0 : index
    %c0_193 = arith.constant 0 : index
    %268 = vector.load %arg10[%c0_192, %c0_193] : memref<128x8xf32, #tpu.memory_space<vmem>>, vector<128x8xf32>
    %cst_194 = arith.constant dense<0.000000e+00> : vector<2x8xf32>
    %269 = tpu.matmul %267, %268, %cst_194 {dimension_numbers = #tpu.dot_dimension_numbers<[1], [0], [0], [1], [0, 0, 1, 1], [], []>} : vector<2x128xf32>, vector<128x8xf32>, vector<2x8xf32> -> vector<2x8xf32>
    %c0_195 = arith.constant 0 : index
    %c0_196 = arith.constant 0 : index
    %270 = vector.load %arg4[%c0_195, %c0_196] : memref<2x8xf32, #tpu.memory_space<vmem>>, vector<2x8xf32>
    %271 = arith.addf %269, %270 : vector<2x8xf32>
    %cst_197 = arith.constant dense<0xFF800000> : vector<2xf32>
    %272 = vector.multi_reduction <maximumf>, %271, %cst_197 [1] : vector<2x8xf32> to vector<2xf32>
    %273 = vector.shape_cast %272 : vector<2xf32> to vector<2x1xf32>
    %274 = vector.broadcast %273 : vector<2x1xf32> to vector<2x8xf32>
    %275 = arith.subf %271, %274 : vector<2x8xf32>
    %276 = math.exp %275 : vector<2x8xf32>
    %cst_198 = arith.constant dense<0.000000e+00> : vector<2xf32>
    %277 = vector.multi_reduction <add>, %276, %cst_198 [1] : vector<2x8xf32> to vector<2xf32>
    %278 = vector.shape_cast %277 : vector<2xf32> to vector<2x1xf32>
    %279 = tpu.reciprocal %278 : vector<2x1xf32> -> vector<2x1xf32>
    %280 = vector.broadcast %279 : vector<2x1xf32> to vector<2x8xf32>
    %281 = arith.mulf %276, %280 : vector<2x8xf32>
    %282 = vector.shape_cast %281 : vector<2x8xf32> to vector<2x8x1xf32>
    %c0_199 = arith.constant 0 : index
    %c0_200 = arith.constant 0 : index
    %c0_201 = arith.constant 0 : index
    %283 = vector.load %arg2[%c0_199, %c0_200, %c0_201] : memref<2x8x32xf32, #tpu.memory_space<vmem>>, vector<2x8x32xf32>
    %284 = vector.broadcast %282 : vector<2x8x1xf32> to vector<2x8x32xf32>
    %285 = arith.mulf %284, %283 : vector<2x8x32xf32>
    %cst_202 = arith.constant dense<0.000000e+00> : vector<2x32xf32>
    %286 = vector.multi_reduction <add>, %285, %cst_202 [1] : vector<2x8x32xf32> to vector<2x32xf32>
    %c0_203 = arith.constant 0 : index
    %c0_204 = arith.constant 0 : index
    %287 = vector.load %arg21[%c0_203, %c0_204] : memref<2x48xf32, #tpu.memory_space<vmem>>, vector<2x8xf32>
    tpu.vector_store %arg21[%c0_203, %c0_204], %281 {strides = array<i32>} : memref<2x48xf32, #tpu.memory_space<vmem>>, vector<2x8xf32>,
    %c0_205 = arith.constant 0 : index
    %c8_206 = arith.constant 8 : index
    %288 = vector.load %arg21[%c0_205, %c8_206] : memref<2x48xf32, #tpu.memory_space<vmem>>, vector<2x8xf32>
    %289 = arith.addf %288, %281 : vector<2x8xf32>
    %c0_207 = arith.constant 0 : index
    %c8_208 = arith.constant 8 : index
    %290 = vector.load %arg21[%c0_207, %c8_208] : memref<2x48xf32, #tpu.memory_space<vmem>>, vector<2x8xf32>
    tpu.vector_store %arg21[%c0_207, %c8_208], %289 {strides = array<i32>} : memref<2x48xf32, #tpu.memory_space<vmem>>, vector<2x8xf32>,
    %c0_209 = arith.constant 0 : index
    %c32_210 = arith.constant 32 : index
    %291 = vector.load %arg17[%c0_209, %c32_210] : memref<2x97xf32, #tpu.memory_space<vmem>>, vector<2x32xf32>
    tpu.vector_store %arg17[%c0_209, %c32_210], %286 {strides = array<i32>} : memref<2x97xf32, #tpu.memory_space<vmem>>, vector<2x32xf32>,
    %c2_211 = arith.constant 2 : index
    %c0_212 = arith.constant 0 : index
    %c0_213 = arith.constant 0 : index
    %292 = vector.load %arg14[%c2_211, %c0_212, %c0_213] : memref<8x2x8xf32, #tpu.memory_space<vmem>>, vector<1x2x8xf32>
    %293 = vector.shape_cast %292 : vector<1x2x8xf32> to vector<2x8xf32>
    %294 = vector.shape_cast %281 : vector<2x8xf32> to vector<1x2x8xf32>
    tpu.vector_store %arg14[%c2_211, %c0_212, %c0_213], %294 {strides = array<i32>} : memref<8x2x8xf32, #tpu.memory_space<vmem>>, vector<1x2x8xf32>,
    %c0_214 = arith.constant 0 : index
    %c0_215 = arith.constant 0 : index
    %295 = vector.load %arg19[%c0_214, %c0_215] : memref<2x97xf32, #tpu.memory_space<vmem>>, vector<2x32xf32>
    tpu.vector_store %arg19[%c0_214, %c0_215], %258 {strides = array<i32>} : memref<2x97xf32, #tpu.memory_space<vmem>>, vector<2x32xf32>,
    %c0_216 = arith.constant 0 : index
    %c32_217 = arith.constant 32 : index
    %296 = vector.load %arg19[%c0_216, %c32_217] : memref<2x97xf32, #tpu.memory_space<vmem>>, vector<2x32xf32>
    tpu.vector_store %arg19[%c0_216, %c32_217], %286 {strides = array<i32>} : memref<2x97xf32, #tpu.memory_space<vmem>>, vector<2x32xf32>,
    %c0_218 = arith.constant 0 : index
    %c0_219 = arith.constant 0 : index
    %297 = vector.load %arg19[%c0_218, %c0_219] : memref<2x97xf32, #tpu.memory_space<vmem>>, vector<2x97xf32>
    %c0_220 = arith.constant 0 : index
    %c0_221 = arith.constant 0 : index
    %298 = vector.load %arg8[%c0_220, %c0_221] : memref<97x128xf32, #tpu.memory_space<vmem>>, vector<97x128xf32>
    %cst_222 = arith.constant dense<0.000000e+00> : vector<2x128xf32>
    %299 = tpu.matmul %297, %298, %cst_222 {dimension_numbers = #tpu.dot_dimension_numbers<[1], [0], [0], [1], [0, 0, 1, 1], [], []>} : vector<2x97xf32>, vector<97x128xf32>, vector<2x128xf32> -> vector<2x128xf32>
    %c0_223 = arith.constant 0 : index
    %c0_224 = arith.constant 0 : index
    %300 = vector.load %arg20[%c0_223, %c0_224] : memref<2x32xf32, #tpu.memory_space<vmem>>, vector<2x32xf32>
    %301 = vector.extract_strided_slice %299 {offsets = [0, 0], sizes = [2, 32], strides = [1, 1]} : vector<2x128xf32> to vector<2x32xf32>
    %302 = arith.negf %301 : vector<2x32xf32>
    %303 = math.exp %302 : vector<2x32xf32>
    %cst_225 = arith.constant 1.000000e+00 : f32
    %304 = vector.broadcast %cst_225 : f32 to vector<2x32xf32>
    %305 = arith.addf %304, %303 : vector<2x32xf32>
    %306 = arith.divf %304, %305 : vector<2x32xf32>
    %307 = vector.extract_strided_slice %299 {offsets = [0, 32], sizes = [2, 32], strides = [1, 1]} : vector<2x128xf32> to vector<2x32xf32>
    %308 = arith.negf %307 : vector<2x32xf32>
    %309 = math.exp %308 : vector<2x32xf32>
    %cst_226 = arith.constant 1.000000e+00 : f32
    %310 = vector.broadcast %cst_226 : f32 to vector<2x32xf32>
    %311 = arith.addf %310, %309 : vector<2x32xf32>
    %312 = arith.divf %310, %311 : vector<2x32xf32>
    %313 = vector.extract_strided_slice %299 {offsets = [0, 64], sizes = [2, 32], strides = [1, 1]} : vector<2x128xf32> to vector<2x32xf32>
    %314 = math.tanh %313 : vector<2x32xf32>
    %315 = vector.extract_strided_slice %299 {offsets = [0, 96], sizes = [2, 32], strides = [1, 1]} : vector<2x128xf32> to vector<2x32xf32>
    %316 = arith.negf %315 : vector<2x32xf32>
    %317 = math.exp %316 : vector<2x32xf32>
    %cst_227 = arith.constant 1.000000e+00 : f32
    %318 = vector.broadcast %cst_227 : f32 to vector<2x32xf32>
    %319 = arith.addf %318, %317 : vector<2x32xf32>
    %320 = arith.divf %318, %319 : vector<2x32xf32>
    %321 = arith.mulf %312, %300 : vector<2x32xf32>
    %322 = arith.mulf %306, %314 : vector<2x32xf32>
    %323 = arith.addf %321, %322 : vector<2x32xf32>
    %324 = math.tanh %323 : vector<2x32xf32>
    %325 = arith.mulf %320, %324 : vector<2x32xf32>
    %c0_228 = arith.constant 0 : index
    %c0_229 = arith.constant 0 : index
    %326 = vector.load %arg20[%c0_228, %c0_229] : memref<2x32xf32, #tpu.memory_space<vmem>>, vector<2x32xf32>
    tpu.vector_store %arg20[%c0_228, %c0_229], %323 {strides = array<i32>} : memref<2x32xf32, #tpu.memory_space<vmem>>, vector<2x32xf32>,
    %c0_230 = arith.constant 0 : index
    %c64_231 = arith.constant 64 : index
    %327 = vector.load %arg19[%c0_230, %c64_231] : memref<2x97xf32, #tpu.memory_space<vmem>>, vector<2x32xf32>
    tpu.vector_store %arg19[%c0_230, %c64_231], %325 {strides = array<i32>} : memref<2x97xf32, #tpu.memory_space<vmem>>, vector<2x32xf32>,
    %c4_232 = arith.constant 4 : index
    %c0_233 = arith.constant 0 : index
    %328 = vector.load %arg16[%c4_232, %c0_233] : memref<16x64xf32, #tpu.memory_space<vmem>>, vector<2x32xf32>
    tpu.vector_store %arg16[%c4_232, %c0_233], %325 {strides = array<i32>} : memref<16x64xf32, #tpu.memory_space<vmem>>, vector<2x32xf32>,
    %c4_234 = arith.constant 4 : index
    %c32_235 = arith.constant 32 : index
    %329 = vector.load %arg16[%c4_234, %c32_235] : memref<16x64xf32, #tpu.memory_space<vmem>>, vector<2x32xf32>
    tpu.vector_store %arg16[%c4_234, %c32_235], %286 {strides = array<i32>} : memref<16x64xf32, #tpu.memory_space<vmem>>, vector<2x32xf32>,
    %c6 = arith.constant 6 : index
    %c0_236 = arith.constant 0 : index
    %330 = vector.load %arg15[%c6, %c0_236] : memref<16x32xf32, #tpu.memory_space<vmem>>, vector<2x32xf32>
    %c0_237 = arith.constant 0 : index
    %c0_238 = arith.constant 0 : index
    %331 = vector.load %arg17[%c0_237, %c0_238] : memref<2x97xf32, #tpu.memory_space<vmem>>, vector<2x32xf32>
    tpu.vector_store %arg17[%c0_237, %c0_238], %330 {strides = array<i32>} : memref<2x97xf32, #tpu.memory_space<vmem>>, vector<2x32xf32>,
    %c0_239 = arith.constant 0 : index
    %c0_240 = arith.constant 0 : index
    %332 = vector.load %arg17[%c0_239, %c0_240] : memref<2x97xf32, #tpu.memory_space<vmem>>, vector<2x97xf32>
    %c0_241 = arith.constant 0 : index
    %c0_242 = arith.constant 0 : index
    %333 = vector.load %arg7[%c0_241, %c0_242] : memref<97x128xf32, #tpu.memory_space<vmem>>, vector<97x128xf32>
    %cst_243 = arith.constant dense<0.000000e+00> : vector<2x128xf32>
    %334 = tpu.matmul %332, %333, %cst_243 {dimension_numbers = #tpu.dot_dimension_numbers<[1], [0], [0], [1], [0, 0, 1, 1], [], []>} : vector<2x97xf32>, vector<97x128xf32>, vector<2x128xf32> -> vector<2x128xf32>
    %c0_244 = arith.constant 0 : index
    %c0_245 = arith.constant 0 : index
    %335 = vector.load %arg18[%c0_244, %c0_245] : memref<2x32xf32, #tpu.memory_space<vmem>>, vector<2x32xf32>
    %336 = vector.extract_strided_slice %334 {offsets = [0, 0], sizes = [2, 32], strides = [1, 1]} : vector<2x128xf32> to vector<2x32xf32>
    %337 = arith.negf %336 : vector<2x32xf32>
    %338 = math.exp %337 : vector<2x32xf32>
    %cst_246 = arith.constant 1.000000e+00 : f32
    %339 = vector.broadcast %cst_246 : f32 to vector<2x32xf32>
    %340 = arith.addf %339, %338 : vector<2x32xf32>
    %341 = arith.divf %339, %340 : vector<2x32xf32>
    %342 = vector.extract_strided_slice %334 {offsets = [0, 32], sizes = [2, 32], strides = [1, 1]} : vector<2x128xf32> to vector<2x32xf32>
    %343 = arith.negf %342 : vector<2x32xf32>
    %344 = math.exp %343 : vector<2x32xf32>
    %cst_247 = arith.constant 1.000000e+00 : f32
    %345 = vector.broadcast %cst_247 : f32 to vector<2x32xf32>
    %346 = arith.addf %345, %344 : vector<2x32xf32>
    %347 = arith.divf %345, %346 : vector<2x32xf32>
    %348 = vector.extract_strided_slice %334 {offsets = [0, 64], sizes = [2, 32], strides = [1, 1]} : vector<2x128xf32> to vector<2x32xf32>
    %349 = math.tanh %348 : vector<2x32xf32>
    %350 = vector.extract_strided_slice %334 {offsets = [0, 96], sizes = [2, 32], strides = [1, 1]} : vector<2x128xf32> to vector<2x32xf32>
    %351 = arith.negf %350 : vector<2x32xf32>
    %352 = math.exp %351 : vector<2x32xf32>
    %cst_248 = arith.constant 1.000000e+00 : f32
    %353 = vector.broadcast %cst_248 : f32 to vector<2x32xf32>
    %354 = arith.addf %353, %352 : vector<2x32xf32>
    %355 = arith.divf %353, %354 : vector<2x32xf32>
    %356 = arith.mulf %347, %335 : vector<2x32xf32>
    %357 = arith.mulf %341, %349 : vector<2x32xf32>
    %358 = arith.addf %356, %357 : vector<2x32xf32>
    %359 = math.tanh %358 : vector<2x32xf32>
    %360 = arith.mulf %355, %359 : vector<2x32xf32>
    %c0_249 = arith.constant 0 : index
    %c0_250 = arith.constant 0 : index
    %361 = vector.load %arg18[%c0_249, %c0_250] : memref<2x32xf32, #tpu.memory_space<vmem>>, vector<2x32xf32>
    tpu.vector_store %arg18[%c0_249, %c0_250], %358 {strides = array<i32>} : memref<2x32xf32, #tpu.memory_space<vmem>>, vector<2x32xf32>,
    %c0_251 = arith.constant 0 : index
    %c64_252 = arith.constant 64 : index
    %362 = vector.load %arg17[%c0_251, %c64_252] : memref<2x97xf32, #tpu.memory_space<vmem>>, vector<2x32xf32>
    tpu.vector_store %arg17[%c0_251, %c64_252], %360 {strides = array<i32>} : memref<2x97xf32, #tpu.memory_space<vmem>>, vector<2x32xf32>,
    %c0_253 = arith.constant 0 : index
    %c16_254 = arith.constant 16 : index
    %363 = vector.load %arg21[%c0_253, %c16_254] : memref<2x48xf32, #tpu.memory_space<vmem>>, vector<2x32xf32>
    tpu.vector_store %arg21[%c0_253, %c16_254], %360 {strides = array<i32>} : memref<2x48xf32, #tpu.memory_space<vmem>>, vector<2x32xf32>,
    %c0_255 = arith.constant 0 : index
    %c0_256 = arith.constant 0 : index
    %364 = vector.load %arg21[%c0_255, %c0_256] : memref<2x48xf32, #tpu.memory_space<vmem>>, vector<2x48xf32>
    %c0_257 = arith.constant 0 : index
    %c0_258 = arith.constant 0 : index
    %365 = vector.load %arg9[%c0_257, %c0_258] : memref<48x128xf32, #tpu.memory_space<vmem>>, vector<48x128xf32>
    %cst_259 = arith.constant dense<0.000000e+00> : vector<2x128xf32>
    %366 = tpu.matmul %364, %365, %cst_259 {dimension_numbers = #tpu.dot_dimension_numbers<[1], [0], [0], [1], [0, 0, 1, 1], [], []>} : vector<2x48xf32>, vector<48x128xf32>, vector<2x128xf32> -> vector<2x128xf32>
    %c0_260 = arith.constant 0 : index
    %c0_261 = arith.constant 0 : index
    %367 = vector.load %arg3[%c0_260, %c0_261] : memref<2x128xf32, #tpu.memory_space<vmem>>, vector<2x128xf32>
    %368 = arith.addf %366, %367 : vector<2x128xf32>
    %369 = math.tanh %368 : vector<2x128xf32>
    %c0_262 = arith.constant 0 : index
    %c0_263 = arith.constant 0 : index
    %370 = vector.load %arg10[%c0_262, %c0_263] : memref<128x8xf32, #tpu.memory_space<vmem>>, vector<128x8xf32>
    %cst_264 = arith.constant dense<0.000000e+00> : vector<2x8xf32>
    %371 = tpu.matmul %369, %370, %cst_264 {dimension_numbers = #tpu.dot_dimension_numbers<[1], [0], [0], [1], [0, 0, 1, 1], [], []>} : vector<2x128xf32>, vector<128x8xf32>, vector<2x8xf32> -> vector<2x8xf32>
    %c0_265 = arith.constant 0 : index
    %c0_266 = arith.constant 0 : index
    %372 = vector.load %arg4[%c0_265, %c0_266] : memref<2x8xf32, #tpu.memory_space<vmem>>, vector<2x8xf32>
    %373 = arith.addf %371, %372 : vector<2x8xf32>
    %cst_267 = arith.constant dense<0xFF800000> : vector<2xf32>
    %374 = vector.multi_reduction <maximumf>, %373, %cst_267 [1] : vector<2x8xf32> to vector<2xf32>
    %375 = vector.shape_cast %374 : vector<2xf32> to vector<2x1xf32>
    %376 = vector.broadcast %375 : vector<2x1xf32> to vector<2x8xf32>
    %377 = arith.subf %373, %376 : vector<2x8xf32>
    %378 = math.exp %377 : vector<2x8xf32>
    %cst_268 = arith.constant dense<0.000000e+00> : vector<2xf32>
    %379 = vector.multi_reduction <add>, %378, %cst_268 [1] : vector<2x8xf32> to vector<2xf32>
    %380 = vector.shape_cast %379 : vector<2xf32> to vector<2x1xf32>
    %381 = tpu.reciprocal %380 : vector<2x1xf32> -> vector<2x1xf32>
    %382 = vector.broadcast %381 : vector<2x1xf32> to vector<2x8xf32>
    %383 = arith.mulf %378, %382 : vector<2x8xf32>
    %384 = vector.shape_cast %383 : vector<2x8xf32> to vector<2x8x1xf32>
    %c0_269 = arith.constant 0 : index
    %c0_270 = arith.constant 0 : index
    %c0_271 = arith.constant 0 : index
    %385 = vector.load %arg2[%c0_269, %c0_270, %c0_271] : memref<2x8x32xf32, #tpu.memory_space<vmem>>, vector<2x8x32xf32>
    %386 = vector.broadcast %384 : vector<2x8x1xf32> to vector<2x8x32xf32>
    %387 = arith.mulf %386, %385 : vector<2x8x32xf32>
    %cst_272 = arith.constant dense<0.000000e+00> : vector<2x32xf32>
    %388 = vector.multi_reduction <add>, %387, %cst_272 [1] : vector<2x8x32xf32> to vector<2x32xf32>
    %c0_273 = arith.constant 0 : index
    %c0_274 = arith.constant 0 : index
    %389 = vector.load %arg21[%c0_273, %c0_274] : memref<2x48xf32, #tpu.memory_space<vmem>>, vector<2x8xf32>
    tpu.vector_store %arg21[%c0_273, %c0_274], %383 {strides = array<i32>} : memref<2x48xf32, #tpu.memory_space<vmem>>, vector<2x8xf32>,
    %c0_275 = arith.constant 0 : index
    %c8_276 = arith.constant 8 : index
    %390 = vector.load %arg21[%c0_275, %c8_276] : memref<2x48xf32, #tpu.memory_space<vmem>>, vector<2x8xf32>
    %391 = arith.addf %390, %383 : vector<2x8xf32>
    %c0_277 = arith.constant 0 : index
    %c8_278 = arith.constant 8 : index
    %392 = vector.load %arg21[%c0_277, %c8_278] : memref<2x48xf32, #tpu.memory_space<vmem>>, vector<2x8xf32>
    tpu.vector_store %arg21[%c0_277, %c8_278], %391 {strides = array<i32>} : memref<2x48xf32, #tpu.memory_space<vmem>>, vector<2x8xf32>,
    %c0_279 = arith.constant 0 : index
    %c32_280 = arith.constant 32 : index
    %393 = vector.load %arg17[%c0_279, %c32_280] : memref<2x97xf32, #tpu.memory_space<vmem>>, vector<2x32xf32>
    tpu.vector_store %arg17[%c0_279, %c32_280], %388 {strides = array<i32>} : memref<2x97xf32, #tpu.memory_space<vmem>>, vector<2x32xf32>,
    %c3 = arith.constant 3 : index
    %c0_281 = arith.constant 0 : index
    %c0_282 = arith.constant 0 : index
    %394 = vector.load %arg14[%c3, %c0_281, %c0_282] : memref<8x2x8xf32, #tpu.memory_space<vmem>>, vector<1x2x8xf32>
    %395 = vector.shape_cast %394 : vector<1x2x8xf32> to vector<2x8xf32>
    %396 = vector.shape_cast %383 : vector<2x8xf32> to vector<1x2x8xf32>
    tpu.vector_store %arg14[%c3, %c0_281, %c0_282], %396 {strides = array<i32>} : memref<8x2x8xf32, #tpu.memory_space<vmem>>, vector<1x2x8xf32>,
    %c0_283 = arith.constant 0 : index
    %c0_284 = arith.constant 0 : index
    %397 = vector.load %arg19[%c0_283, %c0_284] : memref<2x97xf32, #tpu.memory_space<vmem>>, vector<2x32xf32>
    tpu.vector_store %arg19[%c0_283, %c0_284], %360 {strides = array<i32>} : memref<2x97xf32, #tpu.memory_space<vmem>>, vector<2x32xf32>,
    %c0_285 = arith.constant 0 : index
    %c32_286 = arith.constant 32 : index
    %398 = vector.load %arg19[%c0_285, %c32_286] : memref<2x97xf32, #tpu.memory_space<vmem>>, vector<2x32xf32>
    tpu.vector_store %arg19[%c0_285, %c32_286], %388 {strides = array<i32>} : memref<2x97xf32, #tpu.memory_space<vmem>>, vector<2x32xf32>,
    %c0_287 = arith.constant 0 : index
    %c0_288 = arith.constant 0 : index
    %399 = vector.load %arg19[%c0_287, %c0_288] : memref<2x97xf32, #tpu.memory_space<vmem>>, vector<2x97xf32>
    %c0_289 = arith.constant 0 : index
    %c0_290 = arith.constant 0 : index
    %400 = vector.load %arg8[%c0_289, %c0_290] : memref<97x128xf32, #tpu.memory_space<vmem>>, vector<97x128xf32>
    %cst_291 = arith.constant dense<0.000000e+00> : vector<2x128xf32>
    %401 = tpu.matmul %399, %400, %cst_291 {dimension_numbers = #tpu.dot_dimension_numbers<[1], [0], [0], [1], [0, 0, 1, 1], [], []>} : vector<2x97xf32>, vector<97x128xf32>, vector<2x128xf32> -> vector<2x128xf32>
    %c0_292 = arith.constant 0 : index
    %c0_293 = arith.constant 0 : index
    %402 = vector.load %arg20[%c0_292, %c0_293] : memref<2x32xf32, #tpu.memory_space<vmem>>, vector<2x32xf32>
    %403 = vector.extract_strided_slice %401 {offsets = [0, 0], sizes = [2, 32], strides = [1, 1]} : vector<2x128xf32> to vector<2x32xf32>
    %404 = arith.negf %403 : vector<2x32xf32>
    %405 = math.exp %404 : vector<2x32xf32>
    %cst_294 = arith.constant 1.000000e+00 : f32
    %406 = vector.broadcast %cst_294 : f32 to vector<2x32xf32>
    %407 = arith.addf %406, %405 : vector<2x32xf32>
    %408 = arith.divf %406, %407 : vector<2x32xf32>
    %409 = vector.extract_strided_slice %401 {offsets = [0, 32], sizes = [2, 32], strides = [1, 1]} : vector<2x128xf32> to vector<2x32xf32>
    %410 = arith.negf %409 : vector<2x32xf32>
    %411 = math.exp %410 : vector<2x32xf32>
    %cst_295 = arith.constant 1.000000e+00 : f32
    %412 = vector.broadcast %cst_295 : f32 to vector<2x32xf32>
    %413 = arith.addf %412, %411 : vector<2x32xf32>
    %414 = arith.divf %412, %413 : vector<2x32xf32>
    %415 = vector.extract_strided_slice %401 {offsets = [0, 64], sizes = [2, 32], strides = [1, 1]} : vector<2x128xf32> to vector<2x32xf32>
    %416 = math.tanh %415 : vector<2x32xf32>
    %417 = vector.extract_strided_slice %401 {offsets = [0, 96], sizes = [2, 32], strides = [1, 1]} : vector<2x128xf32> to vector<2x32xf32>
    %418 = arith.negf %417 : vector<2x32xf32>
    %419 = math.exp %418 : vector<2x32xf32>
    %cst_296 = arith.constant 1.000000e+00 : f32
    %420 = vector.broadcast %cst_296 : f32 to vector<2x32xf32>
    %421 = arith.addf %420, %419 : vector<2x32xf32>
    %422 = arith.divf %420, %421 : vector<2x32xf32>
    %423 = arith.mulf %414, %402 : vector<2x32xf32>
    %424 = arith.mulf %408, %416 : vector<2x32xf32>
    %425 = arith.addf %423, %424 : vector<2x32xf32>
    %426 = math.tanh %425 : vector<2x32xf32>
    %427 = arith.mulf %422, %426 : vector<2x32xf32>
    %c0_297 = arith.constant 0 : index
    %c0_298 = arith.constant 0 : index
    %428 = vector.load %arg20[%c0_297, %c0_298] : memref<2x32xf32, #tpu.memory_space<vmem>>, vector<2x32xf32>
    tpu.vector_store %arg20[%c0_297, %c0_298], %425 {strides = array<i32>} : memref<2x32xf32, #tpu.memory_space<vmem>>, vector<2x32xf32>,
    %c0_299 = arith.constant 0 : index
    %c64_300 = arith.constant 64 : index
    %429 = vector.load %arg19[%c0_299, %c64_300] : memref<2x97xf32, #tpu.memory_space<vmem>>, vector<2x32xf32>
    tpu.vector_store %arg19[%c0_299, %c64_300], %427 {strides = array<i32>} : memref<2x97xf32, #tpu.memory_space<vmem>>, vector<2x32xf32>,
    %c6_301 = arith.constant 6 : index
    %c0_302 = arith.constant 0 : index
    %430 = vector.load %arg16[%c6_301, %c0_302] : memref<16x64xf32, #tpu.memory_space<vmem>>, vector<2x32xf32>
    tpu.vector_store %arg16[%c6_301, %c0_302], %427 {strides = array<i32>} : memref<16x64xf32, #tpu.memory_space<vmem>>, vector<2x32xf32>,
    %c6_303 = arith.constant 6 : index
    %c32_304 = arith.constant 32 : index
    %431 = vector.load %arg16[%c6_303, %c32_304] : memref<16x64xf32, #tpu.memory_space<vmem>>, vector<2x32xf32>
    tpu.vector_store %arg16[%c6_303, %c32_304], %388 {strides = array<i32>} : memref<16x64xf32, #tpu.memory_space<vmem>>, vector<2x32xf32>,
    %c8_305 = arith.constant 8 : index
    %c0_306 = arith.constant 0 : index
    %432 = vector.load %arg15[%c8_305, %c0_306] : memref<16x32xf32, #tpu.memory_space<vmem>>, vector<2x32xf32>
    %c0_307 = arith.constant 0 : index
    %c0_308 = arith.constant 0 : index
    %433 = vector.load %arg17[%c0_307, %c0_308] : memref<2x97xf32, #tpu.memory_space<vmem>>, vector<2x32xf32>
    tpu.vector_store %arg17[%c0_307, %c0_308], %432 {strides = array<i32>} : memref<2x97xf32, #tpu.memory_space<vmem>>, vector<2x32xf32>,
    %c0_309 = arith.constant 0 : index
    %c0_310 = arith.constant 0 : index
    %434 = vector.load %arg17[%c0_309, %c0_310] : memref<2x97xf32, #tpu.memory_space<vmem>>, vector<2x97xf32>
    %c0_311 = arith.constant 0 : index
    %c0_312 = arith.constant 0 : index
    %435 = vector.load %arg7[%c0_311, %c0_312] : memref<97x128xf32, #tpu.memory_space<vmem>>, vector<97x128xf32>
    %cst_313 = arith.constant dense<0.000000e+00> : vector<2x128xf32>
    %436 = tpu.matmul %434, %435, %cst_313 {dimension_numbers = #tpu.dot_dimension_numbers<[1], [0], [0], [1], [0, 0, 1, 1], [], []>} : vector<2x97xf32>, vector<97x128xf32>, vector<2x128xf32> -> vector<2x128xf32>
    %c0_314 = arith.constant 0 : index
    %c0_315 = arith.constant 0 : index
    %437 = vector.load %arg18[%c0_314, %c0_315] : memref<2x32xf32, #tpu.memory_space<vmem>>, vector<2x32xf32>
    %438 = vector.extract_strided_slice %436 {offsets = [0, 0], sizes = [2, 32], strides = [1, 1]} : vector<2x128xf32> to vector<2x32xf32>
    %439 = arith.negf %438 : vector<2x32xf32>
    %440 = math.exp %439 : vector<2x32xf32>
    %cst_316 = arith.constant 1.000000e+00 : f32
    %441 = vector.broadcast %cst_316 : f32 to vector<2x32xf32>
    %442 = arith.addf %441, %440 : vector<2x32xf32>
    %443 = arith.divf %441, %442 : vector<2x32xf32>
    %444 = vector.extract_strided_slice %436 {offsets = [0, 32], sizes = [2, 32], strides = [1, 1]} : vector<2x128xf32> to vector<2x32xf32>
    %445 = arith.negf %444 : vector<2x32xf32>
    %446 = math.exp %445 : vector<2x32xf32>
    %cst_317 = arith.constant 1.000000e+00 : f32
    %447 = vector.broadcast %cst_317 : f32 to vector<2x32xf32>
    %448 = arith.addf %447, %446 : vector<2x32xf32>
    %449 = arith.divf %447, %448 : vector<2x32xf32>
    %450 = vector.extract_strided_slice %436 {offsets = [0, 64], sizes = [2, 32], strides = [1, 1]} : vector<2x128xf32> to vector<2x32xf32>
    %451 = math.tanh %450 : vector<2x32xf32>
    %452 = vector.extract_strided_slice %436 {offsets = [0, 96], sizes = [2, 32], strides = [1, 1]} : vector<2x128xf32> to vector<2x32xf32>
    %453 = arith.negf %452 : vector<2x32xf32>
    %454 = math.exp %453 : vector<2x32xf32>
    %cst_318 = arith.constant 1.000000e+00 : f32
    %455 = vector.broadcast %cst_318 : f32 to vector<2x32xf32>
    %456 = arith.addf %455, %454 : vector<2x32xf32>
    %457 = arith.divf %455, %456 : vector<2x32xf32>
    %458 = arith.mulf %449, %437 : vector<2x32xf32>
    %459 = arith.mulf %443, %451 : vector<2x32xf32>
    %460 = arith.addf %458, %459 : vector<2x32xf32>
    %461 = math.tanh %460 : vector<2x32xf32>
    %462 = arith.mulf %457, %461 : vector<2x32xf32>
    %c0_319 = arith.constant 0 : index
    %c0_320 = arith.constant 0 : index
    %463 = vector.load %arg18[%c0_319, %c0_320] : memref<2x32xf32, #tpu.memory_space<vmem>>, vector<2x32xf32>
    tpu.vector_store %arg18[%c0_319, %c0_320], %460 {strides = array<i32>} : memref<2x32xf32, #tpu.memory_space<vmem>>, vector<2x32xf32>,
    %c0_321 = arith.constant 0 : index
    %c64_322 = arith.constant 64 : index
    %464 = vector.load %arg17[%c0_321, %c64_322] : memref<2x97xf32, #tpu.memory_space<vmem>>, vector<2x32xf32>
    tpu.vector_store %arg17[%c0_321, %c64_322], %462 {strides = array<i32>} : memref<2x97xf32, #tpu.memory_space<vmem>>, vector<2x32xf32>,
    %c0_323 = arith.constant 0 : index
    %c16_324 = arith.constant 16 : index
    %465 = vector.load %arg21[%c0_323, %c16_324] : memref<2x48xf32, #tpu.memory_space<vmem>>, vector<2x32xf32>
    tpu.vector_store %arg21[%c0_323, %c16_324], %462 {strides = array<i32>} : memref<2x48xf32, #tpu.memory_space<vmem>>, vector<2x32xf32>,
    %c0_325 = arith.constant 0 : index
    %c0_326 = arith.constant 0 : index
    %466 = vector.load %arg21[%c0_325, %c0_326] : memref<2x48xf32, #tpu.memory_space<vmem>>, vector<2x48xf32>
    %c0_327 = arith.constant 0 : index
    %c0_328 = arith.constant 0 : index
    %467 = vector.load %arg9[%c0_327, %c0_328] : memref<48x128xf32, #tpu.memory_space<vmem>>, vector<48x128xf32>
    %cst_329 = arith.constant dense<0.000000e+00> : vector<2x128xf32>
    %468 = tpu.matmul %466, %467, %cst_329 {dimension_numbers = #tpu.dot_dimension_numbers<[1], [0], [0], [1], [0, 0, 1, 1], [], []>} : vector<2x48xf32>, vector<48x128xf32>, vector<2x128xf32> -> vector<2x128xf32>
    %c0_330 = arith.constant 0 : index
    %c0_331 = arith.constant 0 : index
    %469 = vector.load %arg3[%c0_330, %c0_331] : memref<2x128xf32, #tpu.memory_space<vmem>>, vector<2x128xf32>
    %470 = arith.addf %468, %469 : vector<2x128xf32>
    %471 = math.tanh %470 : vector<2x128xf32>
    %c0_332 = arith.constant 0 : index
    %c0_333 = arith.constant 0 : index
    %472 = vector.load %arg10[%c0_332, %c0_333] : memref<128x8xf32, #tpu.memory_space<vmem>>, vector<128x8xf32>
    %cst_334 = arith.constant dense<0.000000e+00> : vector<2x8xf32>
    %473 = tpu.matmul %471, %472, %cst_334 {dimension_numbers = #tpu.dot_dimension_numbers<[1], [0], [0], [1], [0, 0, 1, 1], [], []>} : vector<2x128xf32>, vector<128x8xf32>, vector<2x8xf32> -> vector<2x8xf32>
    %c0_335 = arith.constant 0 : index
    %c0_336 = arith.constant 0 : index
    %474 = vector.load %arg4[%c0_335, %c0_336] : memref<2x8xf32, #tpu.memory_space<vmem>>, vector<2x8xf32>
    %475 = arith.addf %473, %474 : vector<2x8xf32>
    %cst_337 = arith.constant dense<0xFF800000> : vector<2xf32>
    %476 = vector.multi_reduction <maximumf>, %475, %cst_337 [1] : vector<2x8xf32> to vector<2xf32>
    %477 = vector.shape_cast %476 : vector<2xf32> to vector<2x1xf32>
    %478 = vector.broadcast %477 : vector<2x1xf32> to vector<2x8xf32>
    %479 = arith.subf %475, %478 : vector<2x8xf32>
    %480 = math.exp %479 : vector<2x8xf32>
    %cst_338 = arith.constant dense<0.000000e+00> : vector<2xf32>
    %481 = vector.multi_reduction <add>, %480, %cst_338 [1] : vector<2x8xf32> to vector<2xf32>
    %482 = vector.shape_cast %481 : vector<2xf32> to vector<2x1xf32>
    %483 = tpu.reciprocal %482 : vector<2x1xf32> -> vector<2x1xf32>
    %484 = vector.broadcast %483 : vector<2x1xf32> to vector<2x8xf32>
    %485 = arith.mulf %480, %484 : vector<2x8xf32>
    %486 = vector.shape_cast %485 : vector<2x8xf32> to vector<2x8x1xf32>
    %c0_339 = arith.constant 0 : index
    %c0_340 = arith.constant 0 : index
    %c0_341 = arith.constant 0 : index
    %487 = vector.load %arg2[%c0_339, %c0_340, %c0_341] : memref<2x8x32xf32, #tpu.memory_space<vmem>>, vector<2x8x32xf32>
    %488 = vector.broadcast %486 : vector<2x8x1xf32> to vector<2x8x32xf32>
    %489 = arith.mulf %488, %487 : vector<2x8x32xf32>
    %cst_342 = arith.constant dense<0.000000e+00> : vector<2x32xf32>
    %490 = vector.multi_reduction <add>, %489, %cst_342 [1] : vector<2x8x32xf32> to vector<2x32xf32>
    %c0_343 = arith.constant 0 : index
    %c0_344 = arith.constant 0 : index
    %491 = vector.load %arg21[%c0_343, %c0_344] : memref<2x48xf32, #tpu.memory_space<vmem>>, vector<2x8xf32>
    tpu.vector_store %arg21[%c0_343, %c0_344], %485 {strides = array<i32>} : memref<2x48xf32, #tpu.memory_space<vmem>>, vector<2x8xf32>,
    %c0_345 = arith.constant 0 : index
    %c8_346 = arith.constant 8 : index
    %492 = vector.load %arg21[%c0_345, %c8_346] : memref<2x48xf32, #tpu.memory_space<vmem>>, vector<2x8xf32>
    %493 = arith.addf %492, %485 : vector<2x8xf32>
    %c0_347 = arith.constant 0 : index
    %c8_348 = arith.constant 8 : index
    %494 = vector.load %arg21[%c0_347, %c8_348] : memref<2x48xf32, #tpu.memory_space<vmem>>, vector<2x8xf32>
    tpu.vector_store %arg21[%c0_347, %c8_348], %493 {strides = array<i32>} : memref<2x48xf32, #tpu.memory_space<vmem>>, vector<2x8xf32>,
    %c0_349 = arith.constant 0 : index
    %c32_350 = arith.constant 32 : index
    %495 = vector.load %arg17[%c0_349, %c32_350] : memref<2x97xf32, #tpu.memory_space<vmem>>, vector<2x32xf32>
    tpu.vector_store %arg17[%c0_349, %c32_350], %490 {strides = array<i32>} : memref<2x97xf32, #tpu.memory_space<vmem>>, vector<2x32xf32>,
    %c4_351 = arith.constant 4 : index
    %c0_352 = arith.constant 0 : index
    %c0_353 = arith.constant 0 : index
    %496 = vector.load %arg14[%c4_351, %c0_352, %c0_353] : memref<8x2x8xf32, #tpu.memory_space<vmem>>, vector<1x2x8xf32>
    %497 = vector.shape_cast %496 : vector<1x2x8xf32> to vector<2x8xf32>
    %498 = vector.shape_cast %485 : vector<2x8xf32> to vector<1x2x8xf32>
    tpu.vector_store %arg14[%c4_351, %c0_352, %c0_353], %498 {strides = array<i32>} : memref<8x2x8xf32, #tpu.memory_space<vmem>>, vector<1x2x8xf32>,
    %c0_354 = arith.constant 0 : index
    %c0_355 = arith.constant 0 : index
    %499 = vector.load %arg19[%c0_354, %c0_355] : memref<2x97xf32, #tpu.memory_space<vmem>>, vector<2x32xf32>
    tpu.vector_store %arg19[%c0_354, %c0_355], %462 {strides = array<i32>} : memref<2x97xf32, #tpu.memory_space<vmem>>, vector<2x32xf32>,
    %c0_356 = arith.constant 0 : index
    %c32_357 = arith.constant 32 : index
    %500 = vector.load %arg19[%c0_356, %c32_357] : memref<2x97xf32, #tpu.memory_space<vmem>>, vector<2x32xf32>
    tpu.vector_store %arg19[%c0_356, %c32_357], %490 {strides = array<i32>} : memref<2x97xf32, #tpu.memory_space<vmem>>, vector<2x32xf32>,
    %c0_358 = arith.constant 0 : index
    %c0_359 = arith.constant 0 : index
    %501 = vector.load %arg19[%c0_358, %c0_359] : memref<2x97xf32, #tpu.memory_space<vmem>>, vector<2x97xf32>
    %c0_360 = arith.constant 0 : index
    %c0_361 = arith.constant 0 : index
    %502 = vector.load %arg8[%c0_360, %c0_361] : memref<97x128xf32, #tpu.memory_space<vmem>>, vector<97x128xf32>
    %cst_362 = arith.constant dense<0.000000e+00> : vector<2x128xf32>
    %503 = tpu.matmul %501, %502, %cst_362 {dimension_numbers = #tpu.dot_dimension_numbers<[1], [0], [0], [1], [0, 0, 1, 1], [], []>} : vector<2x97xf32>, vector<97x128xf32>, vector<2x128xf32> -> vector<2x128xf32>
    %c0_363 = arith.constant 0 : index
    %c0_364 = arith.constant 0 : index
    %504 = vector.load %arg20[%c0_363, %c0_364] : memref<2x32xf32, #tpu.memory_space<vmem>>, vector<2x32xf32>
    %505 = vector.extract_strided_slice %503 {offsets = [0, 0], sizes = [2, 32], strides = [1, 1]} : vector<2x128xf32> to vector<2x32xf32>
    %506 = arith.negf %505 : vector<2x32xf32>
    %507 = math.exp %506 : vector<2x32xf32>
    %cst_365 = arith.constant 1.000000e+00 : f32
    %508 = vector.broadcast %cst_365 : f32 to vector<2x32xf32>
    %509 = arith.addf %508, %507 : vector<2x32xf32>
    %510 = arith.divf %508, %509 : vector<2x32xf32>
    %511 = vector.extract_strided_slice %503 {offsets = [0, 32], sizes = [2, 32], strides = [1, 1]} : vector<2x128xf32> to vector<2x32xf32>
    %512 = arith.negf %511 : vector<2x32xf32>
    %513 = math.exp %512 : vector<2x32xf32>
    %cst_366 = arith.constant 1.000000e+00 : f32
    %514 = vector.broadcast %cst_366 : f32 to vector<2x32xf32>
    %515 = arith.addf %514, %513 : vector<2x32xf32>
    %516 = arith.divf %514, %515 : vector<2x32xf32>
    %517 = vector.extract_strided_slice %503 {offsets = [0, 64], sizes = [2, 32], strides = [1, 1]} : vector<2x128xf32> to vector<2x32xf32>
    %518 = math.tanh %517 : vector<2x32xf32>
    %519 = vector.extract_strided_slice %503 {offsets = [0, 96], sizes = [2, 32], strides = [1, 1]} : vector<2x128xf32> to vector<2x32xf32>
    %520 = arith.negf %519 : vector<2x32xf32>
    %521 = math.exp %520 : vector<2x32xf32>
    %cst_367 = arith.constant 1.000000e+00 : f32
    %522 = vector.broadcast %cst_367 : f32 to vector<2x32xf32>
    %523 = arith.addf %522, %521 : vector<2x32xf32>
    %524 = arith.divf %522, %523 : vector<2x32xf32>
    %525 = arith.mulf %516, %504 : vector<2x32xf32>
    %526 = arith.mulf %510, %518 : vector<2x32xf32>
    %527 = arith.addf %525, %526 : vector<2x32xf32>
    %528 = math.tanh %527 : vector<2x32xf32>
    %529 = arith.mulf %524, %528 : vector<2x32xf32>
    %c0_368 = arith.constant 0 : index
    %c0_369 = arith.constant 0 : index
    %530 = vector.load %arg20[%c0_368, %c0_369] : memref<2x32xf32, #tpu.memory_space<vmem>>, vector<2x32xf32>
    tpu.vector_store %arg20[%c0_368, %c0_369], %527 {strides = array<i32>} : memref<2x32xf32, #tpu.memory_space<vmem>>, vector<2x32xf32>,
    %c0_370 = arith.constant 0 : index
    %c64_371 = arith.constant 64 : index
    %531 = vector.load %arg19[%c0_370, %c64_371] : memref<2x97xf32, #tpu.memory_space<vmem>>, vector<2x32xf32>
    tpu.vector_store %arg19[%c0_370, %c64_371], %529 {strides = array<i32>} : memref<2x97xf32, #tpu.memory_space<vmem>>, vector<2x32xf32>,
    %c8_372 = arith.constant 8 : index
    %c0_373 = arith.constant 0 : index
    %532 = vector.load %arg16[%c8_372, %c0_373] : memref<16x64xf32, #tpu.memory_space<vmem>>, vector<2x32xf32>
    tpu.vector_store %arg16[%c8_372, %c0_373], %529 {strides = array<i32>} : memref<16x64xf32, #tpu.memory_space<vmem>>, vector<2x32xf32>,
    %c8_374 = arith.constant 8 : index
    %c32_375 = arith.constant 32 : index
    %533 = vector.load %arg16[%c8_374, %c32_375] : memref<16x64xf32, #tpu.memory_space<vmem>>, vector<2x32xf32>
    tpu.vector_store %arg16[%c8_374, %c32_375], %490 {strides = array<i32>} : memref<16x64xf32, #tpu.memory_space<vmem>>, vector<2x32xf32>,
    %c10 = arith.constant 10 : index
    %c0_376 = arith.constant 0 : index
    %534 = vector.load %arg15[%c10, %c0_376] : memref<16x32xf32, #tpu.memory_space<vmem>>, vector<2x32xf32>
    %c0_377 = arith.constant 0 : index
    %c0_378 = arith.constant 0 : index
    %535 = vector.load %arg17[%c0_377, %c0_378] : memref<2x97xf32, #tpu.memory_space<vmem>>, vector<2x32xf32>
    tpu.vector_store %arg17[%c0_377, %c0_378], %534 {strides = array<i32>} : memref<2x97xf32, #tpu.memory_space<vmem>>, vector<2x32xf32>,
    %c0_379 = arith.constant 0 : index
    %c0_380 = arith.constant 0 : index
    %536 = vector.load %arg17[%c0_379, %c0_380] : memref<2x97xf32, #tpu.memory_space<vmem>>, vector<2x97xf32>
    %c0_381 = arith.constant 0 : index
    %c0_382 = arith.constant 0 : index
    %537 = vector.load %arg7[%c0_381, %c0_382] : memref<97x128xf32, #tpu.memory_space<vmem>>, vector<97x128xf32>
    %cst_383 = arith.constant dense<0.000000e+00> : vector<2x128xf32>
    %538 = tpu.matmul %536, %537, %cst_383 {dimension_numbers = #tpu.dot_dimension_numbers<[1], [0], [0], [1], [0, 0, 1, 1], [], []>} : vector<2x97xf32>, vector<97x128xf32>, vector<2x128xf32> -> vector<2x128xf32>
    %c0_384 = arith.constant 0 : index
    %c0_385 = arith.constant 0 : index
    %539 = vector.load %arg18[%c0_384, %c0_385] : memref<2x32xf32, #tpu.memory_space<vmem>>, vector<2x32xf32>
    %540 = vector.extract_strided_slice %538 {offsets = [0, 0], sizes = [2, 32], strides = [1, 1]} : vector<2x128xf32> to vector<2x32xf32>
    %541 = arith.negf %540 : vector<2x32xf32>
    %542 = math.exp %541 : vector<2x32xf32>
    %cst_386 = arith.constant 1.000000e+00 : f32
    %543 = vector.broadcast %cst_386 : f32 to vector<2x32xf32>
    %544 = arith.addf %543, %542 : vector<2x32xf32>
    %545 = arith.divf %543, %544 : vector<2x32xf32>
    %546 = vector.extract_strided_slice %538 {offsets = [0, 32], sizes = [2, 32], strides = [1, 1]} : vector<2x128xf32> to vector<2x32xf32>
    %547 = arith.negf %546 : vector<2x32xf32>
    %548 = math.exp %547 : vector<2x32xf32>
    %cst_387 = arith.constant 1.000000e+00 : f32
    %549 = vector.broadcast %cst_387 : f32 to vector<2x32xf32>
    %550 = arith.addf %549, %548 : vector<2x32xf32>
    %551 = arith.divf %549, %550 : vector<2x32xf32>
    %552 = vector.extract_strided_slice %538 {offsets = [0, 64], sizes = [2, 32], strides = [1, 1]} : vector<2x128xf32> to vector<2x32xf32>
    %553 = math.tanh %552 : vector<2x32xf32>
    %554 = vector.extract_strided_slice %538 {offsets = [0, 96], sizes = [2, 32], strides = [1, 1]} : vector<2x128xf32> to vector<2x32xf32>
    %555 = arith.negf %554 : vector<2x32xf32>
    %556 = math.exp %555 : vector<2x32xf32>
    %cst_388 = arith.constant 1.000000e+00 : f32
    %557 = vector.broadcast %cst_388 : f32 to vector<2x32xf32>
    %558 = arith.addf %557, %556 : vector<2x32xf32>
    %559 = arith.divf %557, %558 : vector<2x32xf32>
    %560 = arith.mulf %551, %539 : vector<2x32xf32>
    %561 = arith.mulf %545, %553 : vector<2x32xf32>
    %562 = arith.addf %560, %561 : vector<2x32xf32>
    %563 = math.tanh %562 : vector<2x32xf32>
    %564 = arith.mulf %559, %563 : vector<2x32xf32>
    %c0_389 = arith.constant 0 : index
    %c0_390 = arith.constant 0 : index
    %565 = vector.load %arg18[%c0_389, %c0_390] : memref<2x32xf32, #tpu.memory_space<vmem>>, vector<2x32xf32>
    tpu.vector_store %arg18[%c0_389, %c0_390], %562 {strides = array<i32>} : memref<2x32xf32, #tpu.memory_space<vmem>>, vector<2x32xf32>,
    %c0_391 = arith.constant 0 : index
    %c64_392 = arith.constant 64 : index
    %566 = vector.load %arg17[%c0_391, %c64_392] : memref<2x97xf32, #tpu.memory_space<vmem>>, vector<2x32xf32>
    tpu.vector_store %arg17[%c0_391, %c64_392], %564 {strides = array<i32>} : memref<2x97xf32, #tpu.memory_space<vmem>>, vector<2x32xf32>,
    %c0_393 = arith.constant 0 : index
    %c16_394 = arith.constant 16 : index
    %567 = vector.load %arg21[%c0_393, %c16_394] : memref<2x48xf32, #tpu.memory_space<vmem>>, vector<2x32xf32>
    tpu.vector_store %arg21[%c0_393, %c16_394], %564 {strides = array<i32>} : memref<2x48xf32, #tpu.memory_space<vmem>>, vector<2x32xf32>,
    %c0_395 = arith.constant 0 : index
    %c0_396 = arith.constant 0 : index
    %568 = vector.load %arg21[%c0_395, %c0_396] : memref<2x48xf32, #tpu.memory_space<vmem>>, vector<2x48xf32>
    %c0_397 = arith.constant 0 : index
    %c0_398 = arith.constant 0 : index
    %569 = vector.load %arg9[%c0_397, %c0_398] : memref<48x128xf32, #tpu.memory_space<vmem>>, vector<48x128xf32>
    %cst_399 = arith.constant dense<0.000000e+00> : vector<2x128xf32>
    %570 = tpu.matmul %568, %569, %cst_399 {dimension_numbers = #tpu.dot_dimension_numbers<[1], [0], [0], [1], [0, 0, 1, 1], [], []>} : vector<2x48xf32>, vector<48x128xf32>, vector<2x128xf32> -> vector<2x128xf32>
    %c0_400 = arith.constant 0 : index
    %c0_401 = arith.constant 0 : index
    %571 = vector.load %arg3[%c0_400, %c0_401] : memref<2x128xf32, #tpu.memory_space<vmem>>, vector<2x128xf32>
    %572 = arith.addf %570, %571 : vector<2x128xf32>
    %573 = math.tanh %572 : vector<2x128xf32>
    %c0_402 = arith.constant 0 : index
    %c0_403 = arith.constant 0 : index
    %574 = vector.load %arg10[%c0_402, %c0_403] : memref<128x8xf32, #tpu.memory_space<vmem>>, vector<128x8xf32>
    %cst_404 = arith.constant dense<0.000000e+00> : vector<2x8xf32>
    %575 = tpu.matmul %573, %574, %cst_404 {dimension_numbers = #tpu.dot_dimension_numbers<[1], [0], [0], [1], [0, 0, 1, 1], [], []>} : vector<2x128xf32>, vector<128x8xf32>, vector<2x8xf32> -> vector<2x8xf32>
    %c0_405 = arith.constant 0 : index
    %c0_406 = arith.constant 0 : index
    %576 = vector.load %arg4[%c0_405, %c0_406] : memref<2x8xf32, #tpu.memory_space<vmem>>, vector<2x8xf32>
    %577 = arith.addf %575, %576 : vector<2x8xf32>
    %cst_407 = arith.constant dense<0xFF800000> : vector<2xf32>
    %578 = vector.multi_reduction <maximumf>, %577, %cst_407 [1] : vector<2x8xf32> to vector<2xf32>
    %579 = vector.shape_cast %578 : vector<2xf32> to vector<2x1xf32>
    %580 = vector.broadcast %579 : vector<2x1xf32> to vector<2x8xf32>
    %581 = arith.subf %577, %580 : vector<2x8xf32>
    %582 = math.exp %581 : vector<2x8xf32>
    %cst_408 = arith.constant dense<0.000000e+00> : vector<2xf32>
    %583 = vector.multi_reduction <add>, %582, %cst_408 [1] : vector<2x8xf32> to vector<2xf32>
    %584 = vector.shape_cast %583 : vector<2xf32> to vector<2x1xf32>
    %585 = tpu.reciprocal %584 : vector<2x1xf32> -> vector<2x1xf32>
    %586 = vector.broadcast %585 : vector<2x1xf32> to vector<2x8xf32>
    %587 = arith.mulf %582, %586 : vector<2x8xf32>
    %588 = vector.shape_cast %587 : vector<2x8xf32> to vector<2x8x1xf32>
    %c0_409 = arith.constant 0 : index
    %c0_410 = arith.constant 0 : index
    %c0_411 = arith.constant 0 : index
    %589 = vector.load %arg2[%c0_409, %c0_410, %c0_411] : memref<2x8x32xf32, #tpu.memory_space<vmem>>, vector<2x8x32xf32>
    %590 = vector.broadcast %588 : vector<2x8x1xf32> to vector<2x8x32xf32>
    %591 = arith.mulf %590, %589 : vector<2x8x32xf32>
    %cst_412 = arith.constant dense<0.000000e+00> : vector<2x32xf32>
    %592 = vector.multi_reduction <add>, %591, %cst_412 [1] : vector<2x8x32xf32> to vector<2x32xf32>
    %c0_413 = arith.constant 0 : index
    %c0_414 = arith.constant 0 : index
    %593 = vector.load %arg21[%c0_413, %c0_414] : memref<2x48xf32, #tpu.memory_space<vmem>>, vector<2x8xf32>
    tpu.vector_store %arg21[%c0_413, %c0_414], %587 {strides = array<i32>} : memref<2x48xf32, #tpu.memory_space<vmem>>, vector<2x8xf32>,
    %c0_415 = arith.constant 0 : index
    %c8_416 = arith.constant 8 : index
    %594 = vector.load %arg21[%c0_415, %c8_416] : memref<2x48xf32, #tpu.memory_space<vmem>>, vector<2x8xf32>
    %595 = arith.addf %594, %587 : vector<2x8xf32>
    %c0_417 = arith.constant 0 : index
    %c8_418 = arith.constant 8 : index
    %596 = vector.load %arg21[%c0_417, %c8_418] : memref<2x48xf32, #tpu.memory_space<vmem>>, vector<2x8xf32>
    tpu.vector_store %arg21[%c0_417, %c8_418], %595 {strides = array<i32>} : memref<2x48xf32, #tpu.memory_space<vmem>>, vector<2x8xf32>,
    %c0_419 = arith.constant 0 : index
    %c32_420 = arith.constant 32 : index
    %597 = vector.load %arg17[%c0_419, %c32_420] : memref<2x97xf32, #tpu.memory_space<vmem>>, vector<2x32xf32>
    tpu.vector_store %arg17[%c0_419, %c32_420], %592 {strides = array<i32>} : memref<2x97xf32, #tpu.memory_space<vmem>>, vector<2x32xf32>,
    %c5 = arith.constant 5 : index
    %c0_421 = arith.constant 0 : index
    %c0_422 = arith.constant 0 : index
    %598 = vector.load %arg14[%c5, %c0_421, %c0_422] : memref<8x2x8xf32, #tpu.memory_space<vmem>>, vector<1x2x8xf32>
    %599 = vector.shape_cast %598 : vector<1x2x8xf32> to vector<2x8xf32>
    %600 = vector.shape_cast %587 : vector<2x8xf32> to vector<1x2x8xf32>
    tpu.vector_store %arg14[%c5, %c0_421, %c0_422], %600 {strides = array<i32>} : memref<8x2x8xf32, #tpu.memory_space<vmem>>, vector<1x2x8xf32>,
    %c0_423 = arith.constant 0 : index
    %c0_424 = arith.constant 0 : index
    %601 = vector.load %arg19[%c0_423, %c0_424] : memref<2x97xf32, #tpu.memory_space<vmem>>, vector<2x32xf32>
    tpu.vector_store %arg19[%c0_423, %c0_424], %564 {strides = array<i32>} : memref<2x97xf32, #tpu.memory_space<vmem>>, vector<2x32xf32>,
    %c0_425 = arith.constant 0 : index
    %c32_426 = arith.constant 32 : index
    %602 = vector.load %arg19[%c0_425, %c32_426] : memref<2x97xf32, #tpu.memory_space<vmem>>, vector<2x32xf32>
    tpu.vector_store %arg19[%c0_425, %c32_426], %592 {strides = array<i32>} : memref<2x97xf32, #tpu.memory_space<vmem>>, vector<2x32xf32>,
    %c0_427 = arith.constant 0 : index
    %c0_428 = arith.constant 0 : index
    %603 = vector.load %arg19[%c0_427, %c0_428] : memref<2x97xf32, #tpu.memory_space<vmem>>, vector<2x97xf32>
    %c0_429 = arith.constant 0 : index
    %c0_430 = arith.constant 0 : index
    %604 = vector.load %arg8[%c0_429, %c0_430] : memref<97x128xf32, #tpu.memory_space<vmem>>, vector<97x128xf32>
    %cst_431 = arith.constant dense<0.000000e+00> : vector<2x128xf32>
    %605 = tpu.matmul %603, %604, %cst_431 {dimension_numbers = #tpu.dot_dimension_numbers<[1], [0], [0], [1], [0, 0, 1, 1], [], []>} : vector<2x97xf32>, vector<97x128xf32>, vector<2x128xf32> -> vector<2x128xf32>
    %c0_432 = arith.constant 0 : index
    %c0_433 = arith.constant 0 : index
    %606 = vector.load %arg20[%c0_432, %c0_433] : memref<2x32xf32, #tpu.memory_space<vmem>>, vector<2x32xf32>
    %607 = vector.extract_strided_slice %605 {offsets = [0, 0], sizes = [2, 32], strides = [1, 1]} : vector<2x128xf32> to vector<2x32xf32>
    %608 = arith.negf %607 : vector<2x32xf32>
    %609 = math.exp %608 : vector<2x32xf32>
    %cst_434 = arith.constant 1.000000e+00 : f32
    %610 = vector.broadcast %cst_434 : f32 to vector<2x32xf32>
    %611 = arith.addf %610, %609 : vector<2x32xf32>
    %612 = arith.divf %610, %611 : vector<2x32xf32>
    %613 = vector.extract_strided_slice %605 {offsets = [0, 32], sizes = [2, 32], strides = [1, 1]} : vector<2x128xf32> to vector<2x32xf32>
    %614 = arith.negf %613 : vector<2x32xf32>
    %615 = math.exp %614 : vector<2x32xf32>
    %cst_435 = arith.constant 1.000000e+00 : f32
    %616 = vector.broadcast %cst_435 : f32 to vector<2x32xf32>
    %617 = arith.addf %616, %615 : vector<2x32xf32>
    %618 = arith.divf %616, %617 : vector<2x32xf32>
    %619 = vector.extract_strided_slice %605 {offsets = [0, 64], sizes = [2, 32], strides = [1, 1]} : vector<2x128xf32> to vector<2x32xf32>
    %620 = math.tanh %619 : vector<2x32xf32>
    %621 = vector.extract_strided_slice %605 {offsets = [0, 96], sizes = [2, 32], strides = [1, 1]} : vector<2x128xf32> to vector<2x32xf32>
    %622 = arith.negf %621 : vector<2x32xf32>
    %623 = math.exp %622 : vector<2x32xf32>
    %cst_436 = arith.constant 1.000000e+00 : f32
    %624 = vector.broadcast %cst_436 : f32 to vector<2x32xf32>
    %625 = arith.addf %624, %623 : vector<2x32xf32>
    %626 = arith.divf %624, %625 : vector<2x32xf32>
    %627 = arith.mulf %618, %606 : vector<2x32xf32>
    %628 = arith.mulf %612, %620 : vector<2x32xf32>
    %629 = arith.addf %627, %628 : vector<2x32xf32>
    %630 = math.tanh %629 : vector<2x32xf32>
    %631 = arith.mulf %626, %630 : vector<2x32xf32>
    %c0_437 = arith.constant 0 : index
    %c0_438 = arith.constant 0 : index
    %632 = vector.load %arg20[%c0_437, %c0_438] : memref<2x32xf32, #tpu.memory_space<vmem>>, vector<2x32xf32>
    tpu.vector_store %arg20[%c0_437, %c0_438], %629 {strides = array<i32>} : memref<2x32xf32, #tpu.memory_space<vmem>>, vector<2x32xf32>,
    %c0_439 = arith.constant 0 : index
    %c64_440 = arith.constant 64 : index
    %633 = vector.load %arg19[%c0_439, %c64_440] : memref<2x97xf32, #tpu.memory_space<vmem>>, vector<2x32xf32>
    tpu.vector_store %arg19[%c0_439, %c64_440], %631 {strides = array<i32>} : memref<2x97xf32, #tpu.memory_space<vmem>>, vector<2x32xf32>,
    %c10_441 = arith.constant 10 : index
    %c0_442 = arith.constant 0 : index
    %634 = vector.load %arg16[%c10_441, %c0_442] : memref<16x64xf32, #tpu.memory_space<vmem>>, vector<2x32xf32>
    tpu.vector_store %arg16[%c10_441, %c0_442], %631 {strides = array<i32>} : memref<16x64xf32, #tpu.memory_space<vmem>>, vector<2x32xf32>,
    %c10_443 = arith.constant 10 : index
    %c32_444 = arith.constant 32 : index
    %635 = vector.load %arg16[%c10_443, %c32_444] : memref<16x64xf32, #tpu.memory_space<vmem>>, vector<2x32xf32>
    tpu.vector_store %arg16[%c10_443, %c32_444], %592 {strides = array<i32>} : memref<16x64xf32, #tpu.memory_space<vmem>>, vector<2x32xf32>,
    %c12 = arith.constant 12 : index
    %c0_445 = arith.constant 0 : index
    %636 = vector.load %arg15[%c12, %c0_445] : memref<16x32xf32, #tpu.memory_space<vmem>>, vector<2x32xf32>
    %c0_446 = arith.constant 0 : index
    %c0_447 = arith.constant 0 : index
    %637 = vector.load %arg17[%c0_446, %c0_447] : memref<2x97xf32, #tpu.memory_space<vmem>>, vector<2x32xf32>
    tpu.vector_store %arg17[%c0_446, %c0_447], %636 {strides = array<i32>} : memref<2x97xf32, #tpu.memory_space<vmem>>, vector<2x32xf32>,
    %c0_448 = arith.constant 0 : index
    %c0_449 = arith.constant 0 : index
    %638 = vector.load %arg17[%c0_448, %c0_449] : memref<2x97xf32, #tpu.memory_space<vmem>>, vector<2x97xf32>
    %c0_450 = arith.constant 0 : index
    %c0_451 = arith.constant 0 : index
    %639 = vector.load %arg7[%c0_450, %c0_451] : memref<97x128xf32, #tpu.memory_space<vmem>>, vector<97x128xf32>
    %cst_452 = arith.constant dense<0.000000e+00> : vector<2x128xf32>
    %640 = tpu.matmul %638, %639, %cst_452 {dimension_numbers = #tpu.dot_dimension_numbers<[1], [0], [0], [1], [0, 0, 1, 1], [], []>} : vector<2x97xf32>, vector<97x128xf32>, vector<2x128xf32> -> vector<2x128xf32>
    %c0_453 = arith.constant 0 : index
    %c0_454 = arith.constant 0 : index
    %641 = vector.load %arg18[%c0_453, %c0_454] : memref<2x32xf32, #tpu.memory_space<vmem>>, vector<2x32xf32>
    %642 = vector.extract_strided_slice %640 {offsets = [0, 0], sizes = [2, 32], strides = [1, 1]} : vector<2x128xf32> to vector<2x32xf32>
    %643 = arith.negf %642 : vector<2x32xf32>
    %644 = math.exp %643 : vector<2x32xf32>
    %cst_455 = arith.constant 1.000000e+00 : f32
    %645 = vector.broadcast %cst_455 : f32 to vector<2x32xf32>
    %646 = arith.addf %645, %644 : vector<2x32xf32>
    %647 = arith.divf %645, %646 : vector<2x32xf32>
    %648 = vector.extract_strided_slice %640 {offsets = [0, 32], sizes = [2, 32], strides = [1, 1]} : vector<2x128xf32> to vector<2x32xf32>
    %649 = arith.negf %648 : vector<2x32xf32>
    %650 = math.exp %649 : vector<2x32xf32>
    %cst_456 = arith.constant 1.000000e+00 : f32
    %651 = vector.broadcast %cst_456 : f32 to vector<2x32xf32>
    %652 = arith.addf %651, %650 : vector<2x32xf32>
    %653 = arith.divf %651, %652 : vector<2x32xf32>
    %654 = vector.extract_strided_slice %640 {offsets = [0, 64], sizes = [2, 32], strides = [1, 1]} : vector<2x128xf32> to vector<2x32xf32>
    %655 = math.tanh %654 : vector<2x32xf32>
    %656 = vector.extract_strided_slice %640 {offsets = [0, 96], sizes = [2, 32], strides = [1, 1]} : vector<2x128xf32> to vector<2x32xf32>
    %657 = arith.negf %656 : vector<2x32xf32>
    %658 = math.exp %657 : vector<2x32xf32>
    %cst_457 = arith.constant 1.000000e+00 : f32
    %659 = vector.broadcast %cst_457 : f32 to vector<2x32xf32>
    %660 = arith.addf %659, %658 : vector<2x32xf32>
    %661 = arith.divf %659, %660 : vector<2x32xf32>
    %662 = arith.mulf %653, %641 : vector<2x32xf32>
    %663 = arith.mulf %647, %655 : vector<2x32xf32>
    %664 = arith.addf %662, %663 : vector<2x32xf32>
    %665 = math.tanh %664 : vector<2x32xf32>
    %666 = arith.mulf %661, %665 : vector<2x32xf32>
    %c0_458 = arith.constant 0 : index
    %c0_459 = arith.constant 0 : index
    %667 = vector.load %arg18[%c0_458, %c0_459] : memref<2x32xf32, #tpu.memory_space<vmem>>, vector<2x32xf32>
    tpu.vector_store %arg18[%c0_458, %c0_459], %664 {strides = array<i32>} : memref<2x32xf32, #tpu.memory_space<vmem>>, vector<2x32xf32>,
    %c0_460 = arith.constant 0 : index
    %c64_461 = arith.constant 64 : index
    %668 = vector.load %arg17[%c0_460, %c64_461] : memref<2x97xf32, #tpu.memory_space<vmem>>, vector<2x32xf32>
    tpu.vector_store %arg17[%c0_460, %c64_461], %666 {strides = array<i32>} : memref<2x97xf32, #tpu.memory_space<vmem>>, vector<2x32xf32>,
    %c0_462 = arith.constant 0 : index
    %c16_463 = arith.constant 16 : index
    %669 = vector.load %arg21[%c0_462, %c16_463] : memref<2x48xf32, #tpu.memory_space<vmem>>, vector<2x32xf32>
    tpu.vector_store %arg21[%c0_462, %c16_463], %666 {strides = array<i32>} : memref<2x48xf32, #tpu.memory_space<vmem>>, vector<2x32xf32>,
    %c0_464 = arith.constant 0 : index
    %c0_465 = arith.constant 0 : index
    %670 = vector.load %arg21[%c0_464, %c0_465] : memref<2x48xf32, #tpu.memory_space<vmem>>, vector<2x48xf32>
    %c0_466 = arith.constant 0 : index
    %c0_467 = arith.constant 0 : index
    %671 = vector.load %arg9[%c0_466, %c0_467] : memref<48x128xf32, #tpu.memory_space<vmem>>, vector<48x128xf32>
    %cst_468 = arith.constant dense<0.000000e+00> : vector<2x128xf32>
    %672 = tpu.matmul %670, %671, %cst_468 {dimension_numbers = #tpu.dot_dimension_numbers<[1], [0], [0], [1], [0, 0, 1, 1], [], []>} : vector<2x48xf32>, vector<48x128xf32>, vector<2x128xf32> -> vector<2x128xf32>
    %c0_469 = arith.constant 0 : index
    %c0_470 = arith.constant 0 : index
    %673 = vector.load %arg3[%c0_469, %c0_470] : memref<2x128xf32, #tpu.memory_space<vmem>>, vector<2x128xf32>
    %674 = arith.addf %672, %673 : vector<2x128xf32>
    %675 = math.tanh %674 : vector<2x128xf32>
    %c0_471 = arith.constant 0 : index
    %c0_472 = arith.constant 0 : index
    %676 = vector.load %arg10[%c0_471, %c0_472] : memref<128x8xf32, #tpu.memory_space<vmem>>, vector<128x8xf32>
    %cst_473 = arith.constant dense<0.000000e+00> : vector<2x8xf32>
    %677 = tpu.matmul %675, %676, %cst_473 {dimension_numbers = #tpu.dot_dimension_numbers<[1], [0], [0], [1], [0, 0, 1, 1], [], []>} : vector<2x128xf32>, vector<128x8xf32>, vector<2x8xf32> -> vector<2x8xf32>
    %c0_474 = arith.constant 0 : index
    %c0_475 = arith.constant 0 : index
    %678 = vector.load %arg4[%c0_474, %c0_475] : memref<2x8xf32, #tpu.memory_space<vmem>>, vector<2x8xf32>
    %679 = arith.addf %677, %678 : vector<2x8xf32>
    %cst_476 = arith.constant dense<0xFF800000> : vector<2xf32>
    %680 = vector.multi_reduction <maximumf>, %679, %cst_476 [1] : vector<2x8xf32> to vector<2xf32>
    %681 = vector.shape_cast %680 : vector<2xf32> to vector<2x1xf32>
    %682 = vector.broadcast %681 : vector<2x1xf32> to vector<2x8xf32>
    %683 = arith.subf %679, %682 : vector<2x8xf32>
    %684 = math.exp %683 : vector<2x8xf32>
    %cst_477 = arith.constant dense<0.000000e+00> : vector<2xf32>
    %685 = vector.multi_reduction <add>, %684, %cst_477 [1] : vector<2x8xf32> to vector<2xf32>
    %686 = vector.shape_cast %685 : vector<2xf32> to vector<2x1xf32>
    %687 = tpu.reciprocal %686 : vector<2x1xf32> -> vector<2x1xf32>
    %688 = vector.broadcast %687 : vector<2x1xf32> to vector<2x8xf32>
    %689 = arith.mulf %684, %688 : vector<2x8xf32>
    %690 = vector.shape_cast %689 : vector<2x8xf32> to vector<2x8x1xf32>
    %c0_478 = arith.constant 0 : index
    %c0_479 = arith.constant 0 : index
    %c0_480 = arith.constant 0 : index
    %691 = vector.load %arg2[%c0_478, %c0_479, %c0_480] : memref<2x8x32xf32, #tpu.memory_space<vmem>>, vector<2x8x32xf32>
    %692 = vector.broadcast %690 : vector<2x8x1xf32> to vector<2x8x32xf32>
    %693 = arith.mulf %692, %691 : vector<2x8x32xf32>
    %cst_481 = arith.constant dense<0.000000e+00> : vector<2x32xf32>
    %694 = vector.multi_reduction <add>, %693, %cst_481 [1] : vector<2x8x32xf32> to vector<2x32xf32>
    %c0_482 = arith.constant 0 : index
    %c0_483 = arith.constant 0 : index
    %695 = vector.load %arg21[%c0_482, %c0_483] : memref<2x48xf32, #tpu.memory_space<vmem>>, vector<2x8xf32>
    tpu.vector_store %arg21[%c0_482, %c0_483], %689 {strides = array<i32>} : memref<2x48xf32, #tpu.memory_space<vmem>>, vector<2x8xf32>,
    %c0_484 = arith.constant 0 : index
    %c8_485 = arith.constant 8 : index
    %696 = vector.load %arg21[%c0_484, %c8_485] : memref<2x48xf32, #tpu.memory_space<vmem>>, vector<2x8xf32>
    %697 = arith.addf %696, %689 : vector<2x8xf32>
    %c0_486 = arith.constant 0 : index
    %c8_487 = arith.constant 8 : index
    %698 = vector.load %arg21[%c0_486, %c8_487] : memref<2x48xf32, #tpu.memory_space<vmem>>, vector<2x8xf32>
    tpu.vector_store %arg21[%c0_486, %c8_487], %697 {strides = array<i32>} : memref<2x48xf32, #tpu.memory_space<vmem>>, vector<2x8xf32>,
    %c0_488 = arith.constant 0 : index
    %c32_489 = arith.constant 32 : index
    %699 = vector.load %arg17[%c0_488, %c32_489] : memref<2x97xf32, #tpu.memory_space<vmem>>, vector<2x32xf32>
    tpu.vector_store %arg17[%c0_488, %c32_489], %694 {strides = array<i32>} : memref<2x97xf32, #tpu.memory_space<vmem>>, vector<2x32xf32>,
    %c6_490 = arith.constant 6 : index
    %c0_491 = arith.constant 0 : index
    %c0_492 = arith.constant 0 : index
    %700 = vector.load %arg14[%c6_490, %c0_491, %c0_492] : memref<8x2x8xf32, #tpu.memory_space<vmem>>, vector<1x2x8xf32>
    %701 = vector.shape_cast %700 : vector<1x2x8xf32> to vector<2x8xf32>
    %702 = vector.shape_cast %689 : vector<2x8xf32> to vector<1x2x8xf32>
    tpu.vector_store %arg14[%c6_490, %c0_491, %c0_492], %702 {strides = array<i32>} : memref<8x2x8xf32, #tpu.memory_space<vmem>>, vector<1x2x8xf32>,
    %c0_493 = arith.constant 0 : index
    %c0_494 = arith.constant 0 : index
    %703 = vector.load %arg19[%c0_493, %c0_494] : memref<2x97xf32, #tpu.memory_space<vmem>>, vector<2x32xf32>
    tpu.vector_store %arg19[%c0_493, %c0_494], %666 {strides = array<i32>} : memref<2x97xf32, #tpu.memory_space<vmem>>, vector<2x32xf32>,
    %c0_495 = arith.constant 0 : index
    %c32_496 = arith.constant 32 : index
    %704 = vector.load %arg19[%c0_495, %c32_496] : memref<2x97xf32, #tpu.memory_space<vmem>>, vector<2x32xf32>
    tpu.vector_store %arg19[%c0_495, %c32_496], %694 {strides = array<i32>} : memref<2x97xf32, #tpu.memory_space<vmem>>, vector<2x32xf32>,
    %c0_497 = arith.constant 0 : index
    %c0_498 = arith.constant 0 : index
    %705 = vector.load %arg19[%c0_497, %c0_498] : memref<2x97xf32, #tpu.memory_space<vmem>>, vector<2x97xf32>
    %c0_499 = arith.constant 0 : index
    %c0_500 = arith.constant 0 : index
    %706 = vector.load %arg8[%c0_499, %c0_500] : memref<97x128xf32, #tpu.memory_space<vmem>>, vector<97x128xf32>
    %cst_501 = arith.constant dense<0.000000e+00> : vector<2x128xf32>
    %707 = tpu.matmul %705, %706, %cst_501 {dimension_numbers = #tpu.dot_dimension_numbers<[1], [0], [0], [1], [0, 0, 1, 1], [], []>} : vector<2x97xf32>, vector<97x128xf32>, vector<2x128xf32> -> vector<2x128xf32>
    %c0_502 = arith.constant 0 : index
    %c0_503 = arith.constant 0 : index
    %708 = vector.load %arg20[%c0_502, %c0_503] : memref<2x32xf32, #tpu.memory_space<vmem>>, vector<2x32xf32>
    %709 = vector.extract_strided_slice %707 {offsets = [0, 0], sizes = [2, 32], strides = [1, 1]} : vector<2x128xf32> to vector<2x32xf32>
    %710 = arith.negf %709 : vector<2x32xf32>
    %711 = math.exp %710 : vector<2x32xf32>
    %cst_504 = arith.constant 1.000000e+00 : f32
    %712 = vector.broadcast %cst_504 : f32 to vector<2x32xf32>
    %713 = arith.addf %712, %711 : vector<2x32xf32>
    %714 = arith.divf %712, %713 : vector<2x32xf32>
    %715 = vector.extract_strided_slice %707 {offsets = [0, 32], sizes = [2, 32], strides = [1, 1]} : vector<2x128xf32> to vector<2x32xf32>
    %716 = arith.negf %715 : vector<2x32xf32>
    %717 = math.exp %716 : vector<2x32xf32>
    %cst_505 = arith.constant 1.000000e+00 : f32
    %718 = vector.broadcast %cst_505 : f32 to vector<2x32xf32>
    %719 = arith.addf %718, %717 : vector<2x32xf32>
    %720 = arith.divf %718, %719 : vector<2x32xf32>
    %721 = vector.extract_strided_slice %707 {offsets = [0, 64], sizes = [2, 32], strides = [1, 1]} : vector<2x128xf32> to vector<2x32xf32>
    %722 = math.tanh %721 : vector<2x32xf32>
    %723 = vector.extract_strided_slice %707 {offsets = [0, 96], sizes = [2, 32], strides = [1, 1]} : vector<2x128xf32> to vector<2x32xf32>
    %724 = arith.negf %723 : vector<2x32xf32>
    %725 = math.exp %724 : vector<2x32xf32>
    %cst_506 = arith.constant 1.000000e+00 : f32
    %726 = vector.broadcast %cst_506 : f32 to vector<2x32xf32>
    %727 = arith.addf %726, %725 : vector<2x32xf32>
    %728 = arith.divf %726, %727 : vector<2x32xf32>
    %729 = arith.mulf %720, %708 : vector<2x32xf32>
    %730 = arith.mulf %714, %722 : vector<2x32xf32>
    %731 = arith.addf %729, %730 : vector<2x32xf32>
    %732 = math.tanh %731 : vector<2x32xf32>
    %733 = arith.mulf %728, %732 : vector<2x32xf32>
    %c0_507 = arith.constant 0 : index
    %c0_508 = arith.constant 0 : index
    %734 = vector.load %arg20[%c0_507, %c0_508] : memref<2x32xf32, #tpu.memory_space<vmem>>, vector<2x32xf32>
    tpu.vector_store %arg20[%c0_507, %c0_508], %731 {strides = array<i32>} : memref<2x32xf32, #tpu.memory_space<vmem>>, vector<2x32xf32>,
    %c0_509 = arith.constant 0 : index
    %c64_510 = arith.constant 64 : index
    %735 = vector.load %arg19[%c0_509, %c64_510] : memref<2x97xf32, #tpu.memory_space<vmem>>, vector<2x32xf32>
    tpu.vector_store %arg19[%c0_509, %c64_510], %733 {strides = array<i32>} : memref<2x97xf32, #tpu.memory_space<vmem>>, vector<2x32xf32>,
    %c12_511 = arith.constant 12 : index
    %c0_512 = arith.constant 0 : index
    %736 = vector.load %arg16[%c12_511, %c0_512] : memref<16x64xf32, #tpu.memory_space<vmem>>, vector<2x32xf32>
    tpu.vector_store %arg16[%c12_511, %c0_512], %733 {strides = array<i32>} : memref<16x64xf32, #tpu.memory_space<vmem>>, vector<2x32xf32>,
    %c12_513 = arith.constant 12 : index
    %c32_514 = arith.constant 32 : index
    %737 = vector.load %arg16[%c12_513, %c32_514] : memref<16x64xf32, #tpu.memory_space<vmem>>, vector<2x32xf32>
    tpu.vector_store %arg16[%c12_513, %c32_514], %694 {strides = array<i32>} : memref<16x64xf32, #tpu.memory_space<vmem>>, vector<2x32xf32>,
    %c14 = arith.constant 14 : index
    %c0_515 = arith.constant 0 : index
    %738 = vector.load %arg15[%c14, %c0_515] : memref<16x32xf32, #tpu.memory_space<vmem>>, vector<2x32xf32>
    %c0_516 = arith.constant 0 : index
    %c0_517 = arith.constant 0 : index
    %739 = vector.load %arg17[%c0_516, %c0_517] : memref<2x97xf32, #tpu.memory_space<vmem>>, vector<2x32xf32>
    tpu.vector_store %arg17[%c0_516, %c0_517], %738 {strides = array<i32>} : memref<2x97xf32, #tpu.memory_space<vmem>>, vector<2x32xf32>,
    %c0_518 = arith.constant 0 : index
    %c0_519 = arith.constant 0 : index
    %740 = vector.load %arg17[%c0_518, %c0_519] : memref<2x97xf32, #tpu.memory_space<vmem>>, vector<2x97xf32>
    %c0_520 = arith.constant 0 : index
    %c0_521 = arith.constant 0 : index
    %741 = vector.load %arg7[%c0_520, %c0_521] : memref<97x128xf32, #tpu.memory_space<vmem>>, vector<97x128xf32>
    %cst_522 = arith.constant dense<0.000000e+00> : vector<2x128xf32>
    %742 = tpu.matmul %740, %741, %cst_522 {dimension_numbers = #tpu.dot_dimension_numbers<[1], [0], [0], [1], [0, 0, 1, 1], [], []>} : vector<2x97xf32>, vector<97x128xf32>, vector<2x128xf32> -> vector<2x128xf32>
    %c0_523 = arith.constant 0 : index
    %c0_524 = arith.constant 0 : index
    %743 = vector.load %arg18[%c0_523, %c0_524] : memref<2x32xf32, #tpu.memory_space<vmem>>, vector<2x32xf32>
    %744 = vector.extract_strided_slice %742 {offsets = [0, 0], sizes = [2, 32], strides = [1, 1]} : vector<2x128xf32> to vector<2x32xf32>
    %745 = arith.negf %744 : vector<2x32xf32>
    %746 = math.exp %745 : vector<2x32xf32>
    %cst_525 = arith.constant 1.000000e+00 : f32
    %747 = vector.broadcast %cst_525 : f32 to vector<2x32xf32>
    %748 = arith.addf %747, %746 : vector<2x32xf32>
    %749 = arith.divf %747, %748 : vector<2x32xf32>
    %750 = vector.extract_strided_slice %742 {offsets = [0, 32], sizes = [2, 32], strides = [1, 1]} : vector<2x128xf32> to vector<2x32xf32>
    %751 = arith.negf %750 : vector<2x32xf32>
    %752 = math.exp %751 : vector<2x32xf32>
    %cst_526 = arith.constant 1.000000e+00 : f32
    %753 = vector.broadcast %cst_526 : f32 to vector<2x32xf32>
    %754 = arith.addf %753, %752 : vector<2x32xf32>
    %755 = arith.divf %753, %754 : vector<2x32xf32>
    %756 = vector.extract_strided_slice %742 {offsets = [0, 64], sizes = [2, 32], strides = [1, 1]} : vector<2x128xf32> to vector<2x32xf32>
    %757 = math.tanh %756 : vector<2x32xf32>
    %758 = vector.extract_strided_slice %742 {offsets = [0, 96], sizes = [2, 32], strides = [1, 1]} : vector<2x128xf32> to vector<2x32xf32>
    %759 = arith.negf %758 : vector<2x32xf32>
    %760 = math.exp %759 : vector<2x32xf32>
    %cst_527 = arith.constant 1.000000e+00 : f32
    %761 = vector.broadcast %cst_527 : f32 to vector<2x32xf32>
    %762 = arith.addf %761, %760 : vector<2x32xf32>
    %763 = arith.divf %761, %762 : vector<2x32xf32>
    %764 = arith.mulf %755, %743 : vector<2x32xf32>
    %765 = arith.mulf %749, %757 : vector<2x32xf32>
    %766 = arith.addf %764, %765 : vector<2x32xf32>
    %767 = math.tanh %766 : vector<2x32xf32>
    %768 = arith.mulf %763, %767 : vector<2x32xf32>
    %c0_528 = arith.constant 0 : index
    %c0_529 = arith.constant 0 : index
    %769 = vector.load %arg18[%c0_528, %c0_529] : memref<2x32xf32, #tpu.memory_space<vmem>>, vector<2x32xf32>
    tpu.vector_store %arg18[%c0_528, %c0_529], %766 {strides = array<i32>} : memref<2x32xf32, #tpu.memory_space<vmem>>, vector<2x32xf32>,
    %c0_530 = arith.constant 0 : index
    %c64_531 = arith.constant 64 : index
    %770 = vector.load %arg17[%c0_530, %c64_531] : memref<2x97xf32, #tpu.memory_space<vmem>>, vector<2x32xf32>
    tpu.vector_store %arg17[%c0_530, %c64_531], %768 {strides = array<i32>} : memref<2x97xf32, #tpu.memory_space<vmem>>, vector<2x32xf32>,
    %c0_532 = arith.constant 0 : index
    %c16_533 = arith.constant 16 : index
    %771 = vector.load %arg21[%c0_532, %c16_533] : memref<2x48xf32, #tpu.memory_space<vmem>>, vector<2x32xf32>
    tpu.vector_store %arg21[%c0_532, %c16_533], %768 {strides = array<i32>} : memref<2x48xf32, #tpu.memory_space<vmem>>, vector<2x32xf32>,
    %c0_534 = arith.constant 0 : index
    %c0_535 = arith.constant 0 : index
    %772 = vector.load %arg21[%c0_534, %c0_535] : memref<2x48xf32, #tpu.memory_space<vmem>>, vector<2x48xf32>
    %c0_536 = arith.constant 0 : index
    %c0_537 = arith.constant 0 : index
    %773 = vector.load %arg9[%c0_536, %c0_537] : memref<48x128xf32, #tpu.memory_space<vmem>>, vector<48x128xf32>
    %cst_538 = arith.constant dense<0.000000e+00> : vector<2x128xf32>
    %774 = tpu.matmul %772, %773, %cst_538 {dimension_numbers = #tpu.dot_dimension_numbers<[1], [0], [0], [1], [0, 0, 1, 1], [], []>} : vector<2x48xf32>, vector<48x128xf32>, vector<2x128xf32> -> vector<2x128xf32>
    %c0_539 = arith.constant 0 : index
    %c0_540 = arith.constant 0 : index
    %775 = vector.load %arg3[%c0_539, %c0_540] : memref<2x128xf32, #tpu.memory_space<vmem>>, vector<2x128xf32>
    %776 = arith.addf %774, %775 : vector<2x128xf32>
    %777 = math.tanh %776 : vector<2x128xf32>
    %c0_541 = arith.constant 0 : index
    %c0_542 = arith.constant 0 : index
    %778 = vector.load %arg10[%c0_541, %c0_542] : memref<128x8xf32, #tpu.memory_space<vmem>>, vector<128x8xf32>
    %cst_543 = arith.constant dense<0.000000e+00> : vector<2x8xf32>
    %779 = tpu.matmul %777, %778, %cst_543 {dimension_numbers = #tpu.dot_dimension_numbers<[1], [0], [0], [1], [0, 0, 1, 1], [], []>} : vector<2x128xf32>, vector<128x8xf32>, vector<2x8xf32> -> vector<2x8xf32>
    %c0_544 = arith.constant 0 : index
    %c0_545 = arith.constant 0 : index
    %780 = vector.load %arg4[%c0_544, %c0_545] : memref<2x8xf32, #tpu.memory_space<vmem>>, vector<2x8xf32>
    %781 = arith.addf %779, %780 : vector<2x8xf32>
    %cst_546 = arith.constant dense<0xFF800000> : vector<2xf32>
    %782 = vector.multi_reduction <maximumf>, %781, %cst_546 [1] : vector<2x8xf32> to vector<2xf32>
    %783 = vector.shape_cast %782 : vector<2xf32> to vector<2x1xf32>
    %784 = vector.broadcast %783 : vector<2x1xf32> to vector<2x8xf32>
    %785 = arith.subf %781, %784 : vector<2x8xf32>
    %786 = math.exp %785 : vector<2x8xf32>
    %cst_547 = arith.constant dense<0.000000e+00> : vector<2xf32>
    %787 = vector.multi_reduction <add>, %786, %cst_547 [1] : vector<2x8xf32> to vector<2xf32>
    %788 = vector.shape_cast %787 : vector<2xf32> to vector<2x1xf32>
    %789 = tpu.reciprocal %788 : vector<2x1xf32> -> vector<2x1xf32>
    %790 = vector.broadcast %789 : vector<2x1xf32> to vector<2x8xf32>
    %791 = arith.mulf %786, %790 : vector<2x8xf32>
    %792 = vector.shape_cast %791 : vector<2x8xf32> to vector<2x8x1xf32>
    %c0_548 = arith.constant 0 : index
    %c0_549 = arith.constant 0 : index
    %c0_550 = arith.constant 0 : index
    %793 = vector.load %arg2[%c0_548, %c0_549, %c0_550] : memref<2x8x32xf32, #tpu.memory_space<vmem>>, vector<2x8x32xf32>
    %794 = vector.broadcast %792 : vector<2x8x1xf32> to vector<2x8x32xf32>
    %795 = arith.mulf %794, %793 : vector<2x8x32xf32>
    %cst_551 = arith.constant dense<0.000000e+00> : vector<2x32xf32>
    %796 = vector.multi_reduction <add>, %795, %cst_551 [1] : vector<2x8x32xf32> to vector<2x32xf32>
    %c0_552 = arith.constant 0 : index
    %c0_553 = arith.constant 0 : index
    %797 = vector.load %arg21[%c0_552, %c0_553] : memref<2x48xf32, #tpu.memory_space<vmem>>, vector<2x8xf32>
    tpu.vector_store %arg21[%c0_552, %c0_553], %791 {strides = array<i32>} : memref<2x48xf32, #tpu.memory_space<vmem>>, vector<2x8xf32>,
    %c0_554 = arith.constant 0 : index
    %c8_555 = arith.constant 8 : index
    %798 = vector.load %arg21[%c0_554, %c8_555] : memref<2x48xf32, #tpu.memory_space<vmem>>, vector<2x8xf32>
    %799 = arith.addf %798, %791 : vector<2x8xf32>
    %c0_556 = arith.constant 0 : index
    %c8_557 = arith.constant 8 : index
    %800 = vector.load %arg21[%c0_556, %c8_557] : memref<2x48xf32, #tpu.memory_space<vmem>>, vector<2x8xf32>
    tpu.vector_store %arg21[%c0_556, %c8_557], %799 {strides = array<i32>} : memref<2x48xf32, #tpu.memory_space<vmem>>, vector<2x8xf32>,
    %c0_558 = arith.constant 0 : index
    %c32_559 = arith.constant 32 : index
    %801 = vector.load %arg17[%c0_558, %c32_559] : memref<2x97xf32, #tpu.memory_space<vmem>>, vector<2x32xf32>
    tpu.vector_store %arg17[%c0_558, %c32_559], %796 {strides = array<i32>} : memref<2x97xf32, #tpu.memory_space<vmem>>, vector<2x32xf32>,
    %c7 = arith.constant 7 : index
    %c0_560 = arith.constant 0 : index
    %c0_561 = arith.constant 0 : index
    %802 = vector.load %arg14[%c7, %c0_560, %c0_561] : memref<8x2x8xf32, #tpu.memory_space<vmem>>, vector<1x2x8xf32>
    %803 = vector.shape_cast %802 : vector<1x2x8xf32> to vector<2x8xf32>
    %804 = vector.shape_cast %791 : vector<2x8xf32> to vector<1x2x8xf32>
    tpu.vector_store %arg14[%c7, %c0_560, %c0_561], %804 {strides = array<i32>} : memref<8x2x8xf32, #tpu.memory_space<vmem>>, vector<1x2x8xf32>,
    %c0_562 = arith.constant 0 : index
    %c0_563 = arith.constant 0 : index
    %805 = vector.load %arg19[%c0_562, %c0_563] : memref<2x97xf32, #tpu.memory_space<vmem>>, vector<2x32xf32>
    tpu.vector_store %arg19[%c0_562, %c0_563], %768 {strides = array<i32>} : memref<2x97xf32, #tpu.memory_space<vmem>>, vector<2x32xf32>,
    %c0_564 = arith.constant 0 : index
    %c32_565 = arith.constant 32 : index
    %806 = vector.load %arg19[%c0_564, %c32_565] : memref<2x97xf32, #tpu.memory_space<vmem>>, vector<2x32xf32>
    tpu.vector_store %arg19[%c0_564, %c32_565], %796 {strides = array<i32>} : memref<2x97xf32, #tpu.memory_space<vmem>>, vector<2x32xf32>,
    %c0_566 = arith.constant 0 : index
    %c0_567 = arith.constant 0 : index
    %807 = vector.load %arg19[%c0_566, %c0_567] : memref<2x97xf32, #tpu.memory_space<vmem>>, vector<2x97xf32>
    %c0_568 = arith.constant 0 : index
    %c0_569 = arith.constant 0 : index
    %808 = vector.load %arg8[%c0_568, %c0_569] : memref<97x128xf32, #tpu.memory_space<vmem>>, vector<97x128xf32>
    %cst_570 = arith.constant dense<0.000000e+00> : vector<2x128xf32>
    %809 = tpu.matmul %807, %808, %cst_570 {dimension_numbers = #tpu.dot_dimension_numbers<[1], [0], [0], [1], [0, 0, 1, 1], [], []>} : vector<2x97xf32>, vector<97x128xf32>, vector<2x128xf32> -> vector<2x128xf32>
    %c0_571 = arith.constant 0 : index
    %c0_572 = arith.constant 0 : index
    %810 = vector.load %arg20[%c0_571, %c0_572] : memref<2x32xf32, #tpu.memory_space<vmem>>, vector<2x32xf32>
    %811 = vector.extract_strided_slice %809 {offsets = [0, 0], sizes = [2, 32], strides = [1, 1]} : vector<2x128xf32> to vector<2x32xf32>
    %812 = arith.negf %811 : vector<2x32xf32>
    %813 = math.exp %812 : vector<2x32xf32>
    %cst_573 = arith.constant 1.000000e+00 : f32
    %814 = vector.broadcast %cst_573 : f32 to vector<2x32xf32>
    %815 = arith.addf %814, %813 : vector<2x32xf32>
    %816 = arith.divf %814, %815 : vector<2x32xf32>
    %817 = vector.extract_strided_slice %809 {offsets = [0, 32], sizes = [2, 32], strides = [1, 1]} : vector<2x128xf32> to vector<2x32xf32>
    %818 = arith.negf %817 : vector<2x32xf32>
    %819 = math.exp %818 : vector<2x32xf32>
    %cst_574 = arith.constant 1.000000e+00 : f32
    %820 = vector.broadcast %cst_574 : f32 to vector<2x32xf32>
    %821 = arith.addf %820, %819 : vector<2x32xf32>
    %822 = arith.divf %820, %821 : vector<2x32xf32>
    %823 = vector.extract_strided_slice %809 {offsets = [0, 64], sizes = [2, 32], strides = [1, 1]} : vector<2x128xf32> to vector<2x32xf32>
    %824 = math.tanh %823 : vector<2x32xf32>
    %825 = vector.extract_strided_slice %809 {offsets = [0, 96], sizes = [2, 32], strides = [1, 1]} : vector<2x128xf32> to vector<2x32xf32>
    %826 = arith.negf %825 : vector<2x32xf32>
    %827 = math.exp %826 : vector<2x32xf32>
    %cst_575 = arith.constant 1.000000e+00 : f32
    %828 = vector.broadcast %cst_575 : f32 to vector<2x32xf32>
    %829 = arith.addf %828, %827 : vector<2x32xf32>
    %830 = arith.divf %828, %829 : vector<2x32xf32>
    %831 = arith.mulf %822, %810 : vector<2x32xf32>
    %832 = arith.mulf %816, %824 : vector<2x32xf32>
    %833 = arith.addf %831, %832 : vector<2x32xf32>
    %834 = math.tanh %833 : vector<2x32xf32>
    %835 = arith.mulf %830, %834 : vector<2x32xf32>
    %c0_576 = arith.constant 0 : index
    %c0_577 = arith.constant 0 : index
    %836 = vector.load %arg20[%c0_576, %c0_577] : memref<2x32xf32, #tpu.memory_space<vmem>>, vector<2x32xf32>
    tpu.vector_store %arg20[%c0_576, %c0_577], %833 {strides = array<i32>} : memref<2x32xf32, #tpu.memory_space<vmem>>, vector<2x32xf32>,
    %c0_578 = arith.constant 0 : index
    %c64_579 = arith.constant 64 : index
    %837 = vector.load %arg19[%c0_578, %c64_579] : memref<2x97xf32, #tpu.memory_space<vmem>>, vector<2x32xf32>
    tpu.vector_store %arg19[%c0_578, %c64_579], %835 {strides = array<i32>} : memref<2x97xf32, #tpu.memory_space<vmem>>, vector<2x32xf32>,
    %c14_580 = arith.constant 14 : index
    %c0_581 = arith.constant 0 : index
    %838 = vector.load %arg16[%c14_580, %c0_581] : memref<16x64xf32, #tpu.memory_space<vmem>>, vector<2x32xf32>
    tpu.vector_store %arg16[%c14_580, %c0_581], %835 {strides = array<i32>} : memref<16x64xf32, #tpu.memory_space<vmem>>, vector<2x32xf32>,
    %c14_582 = arith.constant 14 : index
    %c32_583 = arith.constant 32 : index
    %839 = vector.load %arg16[%c14_582, %c32_583] : memref<16x64xf32, #tpu.memory_space<vmem>>, vector<2x32xf32>
    tpu.vector_store %arg16[%c14_582, %c32_583], %796 {strides = array<i32>} : memref<16x64xf32, #tpu.memory_space<vmem>>, vector<2x32xf32>,
    %c0_584 = arith.constant 0 : index
    %c0_585 = arith.constant 0 : index
    %840 = vector.load %arg16[%c0_584, %c0_585] : memref<16x64xf32, #tpu.memory_space<vmem>>, vector<16x64xf32>
    %c0_586 = arith.constant 0 : index
    %c0_587 = arith.constant 0 : index
    %841 = vector.load %arg11[%c0_586, %c0_587] : memref<64x128xf32, #tpu.memory_space<vmem>>, vector<64x128xf32>
    %cst_588 = arith.constant dense<0.000000e+00> : vector<16x128xf32>
    %842 = tpu.matmul %840, %841, %cst_588 {dimension_numbers = #tpu.dot_dimension_numbers<[1], [0], [0], [1], [0, 0, 1, 1], [], []>} : vector<16x64xf32>, vector<64x128xf32>, vector<16x128xf32> -> vector<16x128xf32>
    %c0_589 = arith.constant 0 : index
    %c0_590 = arith.constant 0 : index
    %843 = vector.load %arg12[%c0_589, %c0_590] : memref<1x128xf32, #tpu.memory_space<vmem>>, vector<1x128xf32>
    %844 = vector.broadcast %843 : vector<1x128xf32> to vector<16x128xf32>
    %845 = arith.addf %842, %844 : vector<16x128xf32>
    %c0_591 = arith.constant 0 : index
    %c0_592 = arith.constant 0 : index
    %846 = vector.load %arg13[%c0_591, %c0_592] : memref<16x128xf32, #tpu.memory_space<vmem>>, vector<16x128xf32>
    tpu.vector_store %arg13[%c0_591, %c0_592], %845 {strides = array<i32>} : memref<16x128xf32, #tpu.memory_space<vmem>>, vector<16x128xf32>,
    return
  }
  func.func @transform_0(%arg0: i32) -> (i32, i32) {
    %c0_i32 = arith.constant 0 : i32
    %c0_i32_0 = arith.constant 0 : i32
    %c0_i32_1 = arith.constant 0 : i32
    return %c0_i32, %c0_i32_0 : i32, i32
  }
  func.func @transform_1(%arg0: i32) -> (i32, i32, i32) {
    %c0_i32 = arith.constant 0 : i32
    %c0_i32_0 = arith.constant 0 : i32
    %c0_i32_1 = arith.constant 0 : i32
    %c0_i32_2 = arith.constant 0 : i32
    return %c0_i32, %c0_i32_0, %c0_i32_1 : i32, i32, i32
  }
  func.func @transform_2(%arg0: i32) -> (i32, i32) {
    %c0_i32 = arith.constant 0 : i32
    %c0_i32_0 = arith.constant 0 : i32
    %c0_i32_1 = arith.constant 0 : i32
    return %c0_i32, %c0_i32_0 : i32, i32
  }
  func.func @transform_3(%arg0: i32) -> (i32, i32) {
    %c0_i32 = arith.constant 0 : i32
    %c0_i32_0 = arith.constant 0 : i32
    %c0_i32_1 = arith.constant 0 : i32
    return %c0_i32, %c0_i32_0 : i32, i32
  }
  func.func @transform_4(%arg0: i32) -> (i32, i32) {
    %c0_i32 = arith.constant 0 : i32
    %c0_i32_0 = arith.constant 0 : i32
    %c0_i32_1 = arith.constant 0 : i32
    return %c0_i32, %c0_i32_0 : i32, i32
  }
  func.func @transform_5(%arg0: i32) -> (i32, i32) {
    %c0_i32 = arith.constant 0 : i32
    %c0_i32_0 = arith.constant 0 : i32
    %c0_i32_1 = arith.constant 0 : i32
    return %c0_i32, %c0_i32_0 : i32, i32
  }
  func.func @transform_6(%arg0: i32) -> (i32, i32) {
    %c0_i32 = arith.constant 0 : i32
    %c0_i32_0 = arith.constant 0 : i32
    %c0_i32_1 = arith.constant 0 : i32
    return %c0_i32, %c0_i32_0 : i32, i32
  }
  func.func @transform_7(%arg0: i32) -> (i32, i32) {
    %c0_i32 = arith.constant 0 : i32
    %c0_i32_0 = arith.constant 0 : i32
    %c0_i32_1 = arith.constant 0 : i32
    return %c0_i32, %c0_i32_0 : i32, i32
  }
  func.func @transform_8(%arg0: i32) -> (i32, i32) {
    %c0_i32 = arith.constant 0 : i32
    %c0_i32_0 = arith.constant 0 : i32
    %c0_i32_1 = arith.constant 0 : i32
    return %c0_i32, %c0_i32_0 : i32, i32
  }
  func.func @transform_9(%arg0: i32) -> (i32, i32) {
    %c0_i32 = arith.constant 0 : i32
    %c0_i32_0 = arith.constant 0 : i32
    %c0_i32_1 = arith.constant 0 : i32
    return %c0_i32, %c0_i32_0 : i32, i32
  }
  func.func @transform_10(%arg0: i32) -> (i32, i32) {
    %c0_i32 = arith.constant 0 : i32
    %c0_i32_0 = arith.constant 0 : i32
    %c0_i32_1 = arith.constant 0 : i32
    return %c0_i32, %c0_i32_0 : i32, i32
  }
  func.func @transform_11(%arg0: i32) -> (i32, i32) {
    %c0_i32 = arith.constant 0 : i32
    %c0_i32_0 = arith.constant 0 : i32
    %c0_i32_1 = arith.constant 0 : i32
    return %c0_i32, %c0_i32_0 : i32, i32
  }
  func.func @transform_12(%arg0: i32) -> (i32, i32) {
    %c0_i32 = arith.constant 0 : i32
    %c0_i32_0 = arith.constant 0 : i32
    %c0_i32_1 = arith.constant 0 : i32
    return %c0_i32, %c0_i32_0 : i32, i32
  }
  func.func @transform_13(%arg0: i32) -> (i32, i32, i32) {
    %c0_i32 = arith.constant 0 : i32
    %c0_i32_0 = arith.constant 0 : i32
    %c0_i32_1 = arith.constant 0 : i32
    %c0_i32_2 = arith.constant 0 : i32
    return %c0_i32, %c0_i32_0, %c0_i32_1 : i32, i32, i32
  }
}

</mosaic_0001>

<bundles_post_ra>
// kernel: tpu_custom_call.1
= control target key start
LH: loop header
LB: loop body
LE: loop exit
PB: predicated region body
PF: predicated region fallthrough
CT: control target
= control target key end

     0   :  { %19 = vsyncpa [#allocation10], 0  ;;  %s8623_s0 = inlined_call_operand.hbm [shape: f32[16,16], index: 0, kind: input, shape index: {}]   ;;  %s8624_s1 = inlined_call_operand.hbm [shape: f32[2,8,32], index: 1, kind: input, shape index: {}]   ;;  %s8625_s2 = inlined_call_operand.vmem [shape: f32[2,128], index: 2, kind: input, shape index: {}]   ;;  %s8626_s3 = inlined_call_operand.vmem [shape: f32[2,8], index: 3, kind: input, shape index: {}]   ;;  %s8627_s4 = inlined_call_operand.hbm [shape: f32[16,32], index: 4, kind: input, shape index: {}]   ;;  %s8628_s5 = inlined_call_operand.vmem [shape: f32[32,32], index: 5, kind: input, shape index: {}]   ;;  %s8629_s6 = inlined_call_operand.vmem [shape: f32[97,128], index: 6, kind: input, shape index: {}]   ;;  %s8630_s7 = inlined_call_operand.hbm [shape: f32[97,128], index: 7, kind: input, shape index: {}]   ;;  %s8631_s8 = inlined_call_operand.hbm [shape: f32[48,128], index: 8, kind: input, shape index: {}]   ;;  %s8632_s9 = inlined_call_operand.vmem [shape: f32[128,8], index: 9, kind: input, shape index: {}]   ;;  %s8633_s10 = inlined_call_operand.hbm [shape: f32[64,128], index: 10, kind: input, shape index: {}]   ;;  %s8634_s11 = inlined_call_operand.vmem [shape: f32[1,128], index: 11, kind: input, shape index: {}]   ;;  %s8635_s12 = inlined_call_operand.hbm [shape: f32[16,128], index: 12, kind: output, shape index: {0}]   ;;  %s8636_s13 = inlined_call_operand.hbm [shape: f32[8,2,8], index: 13, kind: output, shape index: {1}]  }
   0x1   :  { %20 = vsyncpa [#allocation13], 0 }
   0x2   :  { %21 = vsyncpa [#allocation16], 0 }
   0x3   :  { %22 = vsyncpa [#allocation19], 0 }
   0x4   :  { %23 = vsyncpa [#allocation11], 0 }
   0x5   :  { %24 = vsyncpa [#allocation22], 0  ;;  %s6251_s25 = smov [#allocation12]   ;;  %s6252_s27 = smov [#allocation15]  }
   0x6   :  { %s42_s26 = sshll.u32 %s6251_s25, 4  ;;  %s74_s28 = sshll.u32 %s6252_s27, 4  ;;  %s43_s26 = int_to_ptr.vmem [resolvable:$true] %s42_s26  ;;  %s75_s28 = int_to_ptr.vmem [resolvable:$true] %s74_s28 }
   0x7   :  { %s6087_s29 = scalar_lea.vmem %s43_s26, 256  ;;  %p6092_p1 = scmp.lt.s32.totalorder %s43_s26, %s43_s26 }
   0x8   :  { %p6088_p0 = scmp.ne.s32.totalorder %s43_s26, %s6087_s29  ;;  %p6093_p2 = scmp.lt.s32.totalorder %s6087_s29, %s6087_s29 }
   0xa   :  { %p6094_p3 = por %p6093_p2, %p6092_p1 }
   0xc   :  { %p6095_p4 = pnand %p6094_p3, %p6088_p0 }
   0xe   :  { %6098 = shalt.err (!%p6095_p4)
}
   0xf   :  { %s6253_s30 = smov 128   ;;  %s6254_s14 = smov 8  }
  0x10   :  { %48 = dma.hbm_to_vmem [thread:$0]  %s8624_s1, 256, %s43_s26, [#allocation13], %s6253_s30, %s6253_s30, %s6254_s14  }
  0x11   :  { %s6107_s17 = scalar_lea.vmem %s75_s28, 1664  ;;  %p6112_p6 = scmp.lt.s32.totalorder %s75_s28, %s75_s28 }
  0x12   :  { %p6108_p5 = scmp.ne.s32.totalorder %s75_s28, %s6107_s17  ;;  %p6113_p7 = scmp.lt.s32.totalorder %s6107_s17, %s6107_s17 }
  0x14   :  { %p6114_p8 = por %p6113_p7, %p6112_p6 }
  0x16   :  { %p6115_p9 = pnand %p6114_p8, %p6108_p5 }
  0x18   :  { %6118 = shalt.err (!%p6115_p9)
}
  0x19   :  { %80 = dma.hbm_to_vmem [thread:$0]  %s8630_s7, 1664, %s75_s28, [#allocation16], %s6253_s30, %s6253_s30, %s6254_s14  }
  0x1a   :  { %s6255_s20 = smov [#allocation9]   ;;  %s6256_s22 = smov [#allocation14]  }
  0x1b   :  { %s30_s21 = sshll.u32 %s6255_s20, 4  ;;  %s58_s23 = sshll.u32 %s6256_s22, 4  ;;  %s31_s21 = int_to_ptr.vmem [resolvable:$true] %s30_s21  ;;  %s59_s23 = int_to_ptr.vmem [resolvable:$true] %s58_s23 }
  0x1c   :  { %s6127_s1 = scalar_lea.vmem %s31_s21, 256  ;;  %p6132_p11 = scmp.lt.s32.totalorder %s31_s21, %s31_s21 }
  0x1d   :  { %p6128_p10 = scmp.ne.s32.totalorder %s31_s21, %s6127_s1  ;;  %p6133_p12 = scmp.lt.s32.totalorder %s6127_s1, %s6127_s1 }
  0x1f   :  { %p6134_p13 = por %p6133_p12, %p6132_p11 }
  0x21   :  { %p6135_p0 = pnand %p6134_p13, %p6128_p10 }
  0x23   :  { %6138 = shalt.err (!%p6135_p0)
}
  0x24   :  { %36 = dma.hbm_to_vmem [thread:$0]  %s8623_s0, 256, %s31_s21, [#allocation10], %s6253_s30, %s6253_s30, %s6254_s14  }
  0x25   :  { %s6147_s7 = scalar_lea.vmem %s59_s23, 256  ;;  %p6152_p2 = scmp.lt.s32.totalorder %s59_s23, %s59_s23 }
  0x26   :  { %p6148_p1 = scmp.ne.s32.totalorder %s59_s23, %s6147_s7  ;;  %p6153_p3 = scmp.lt.s32.totalorder %s6147_s7, %s6147_s7 }
  0x28   :  { %p6154_p4 = por %p6153_p3, %p6152_p2 }
  0x2a   :  { %p6155_p5 = pnand %p6154_p4, %p6148_p1 }
  0x2c   :  { %6158 = shalt.err (!%p6155_p5)
}
  0x2d   :  { %64 = dma.hbm_to_vmem [thread:$0]  %s8627_s4, 256, %s59_s23, [#allocation13], %s6253_s30, %s6253_s30, %s6254_s14  }
  0x2e   :  { %s6257_s28 = smov [#allocation17]   ;;  %s6258_s15 = smov [#allocation18]  }
  0x2f   :  { %s86_s29 = sshll.u32 %s6257_s28, 4  ;;  %s100_s16 = sshll.u32 %s6258_s15, 4  ;;  %s87_s29 = int_to_ptr.vmem [resolvable:$true] %s86_s29  ;;  %s101_s16 = int_to_ptr.vmem [resolvable:$true] %s100_s16 }
  0x30   :  { %s6167_s0 = scalar_lea.vmem %s87_s29, 768  ;;  %p6172_p7 = scmp.lt.s32.totalorder %s87_s29, %s87_s29 }
  0x31   :  { %p6168_p6 = scmp.ne.s32.totalorder %s87_s29, %s6167_s0  ;;  %p6173_p8 = scmp.lt.s32.totalorder %s6167_s0, %s6167_s0 }
  0x33   :  { %p6174_p9 = por %p6173_p8, %p6172_p7 }
  0x35   :  { %p6175_p10 = pnand %p6174_p9, %p6168_p6 }
  0x37   :  { %6178 = shalt.err (!%p6175_p10)
}
  0x38   :  { %92 = dma.hbm_to_vmem [thread:$0]  %s8631_s8, 768, %s87_s29, [#allocation16], %s6253_s30, %s6253_s30, %s6254_s14  }
  0x39   :  { %s6187_s4 = scalar_lea.vmem %s101_s16, 1024  ;;  %p6192_p12 = scmp.lt.s32.totalorder %s101_s16, %s101_s16 }
  0x3a   :  { %p6188_p11 = scmp.ne.s32.totalorder %s101_s16, %s6187_s4  ;;  %p6193_p13 = scmp.lt.s32.totalorder %s6187_s4, %s6187_s4 }
  0x3c   :  { %p6194_p0 = por %p6193_p13, %p6192_p12 }
  0x3e   :  { %p6195_p1 = pnand %p6194_p0, %p6188_p11 }
  0x40   :  { %6198 = shalt.err (!%p6195_p1)
}
  0x41   :  { %106 = dma.hbm_to_vmem [thread:$0]  %s8633_s10, 1024, %s101_s16, [#allocation19], %s6253_s30, %s6253_s30, %s6254_s14  }
  0x42   :  { %6239 = dma.done.wait [#allocation10], 256  }
  0x43   :  { %6240 = vsyncadd [#allocation10], 4294967040 }
  0x44   :  { %6241 = dma.done.wait [#allocation13], 512  }
  0x45   :  { %6242 = vsyncadd [#allocation13], 4294966784 }
  0x46   :  { %6243 = dma.done.wait [#allocation16], 2432  }
  0x47   :  { %6244 = vsyncadd [#allocation16], 4294964864 }
  0x48   :  { %6245 = dma.done.wait [#allocation19], 1024  }
  0x49   :  { %6246 = vsyncadd [#allocation19], 4294966272  ;;  %vm142_vm0 = vcmask 130048   ;;  %v141_v0 = vld [vmem:[#allocation14 + $0x8] sm:$0xff]  ;;  %v140_v1 = vld [vmem:[#allocation14] sm:$0xff]  ;;  %vm336_vm1 = vcmask 1040384  }
  0x4a   :  { %v138_v2 = vld [vmem:[#allocation9] sm:$0xff]  ;;  %4984 = vmatprep.subr.mxu1 %v141_v0  ;;  %v139_v3 = vld [vmem:[#allocation9 + $0x8] sm:$0xff]  ;;  %v226_v7 = vld [vmem:[%s8628_s5] sm:$0xff]  ;;  %v8638_v9 = vmov 0.0   ;;  %vm230_vm2 = vcmask 261120   ;;  %vm127_vm3 = vcmask 787456  }
  0x4b   :  { %4988 = vmatprep.mubr.msk.f32.mxu1 %vm142_vm0, %v138_v2  ;;  %4985 = vmatpush3.msra.mxu1 %v141_v0  ;;  %v229_v4 = vld [vmem:[%s8628_s5 + $0x18] sm:$0xff]  ;;  %v228_v5 = vld [vmem:[%s8628_s5 + $0x10] sm:$0xff]  ;;  %v227_v6 = vld [vmem:[%s8628_s5 + $0x8] sm:$0xff]  ;;  %vm129_vm4 = vcmask 788224   ;;  %vm131_vm5 = vcmask 254976   ;;  %v6260_v22 = vmov 1.0  }
  0x4c   :  { %4986 = vmatprep.subr.mxu1 %v140_v1  ;;  %v331_v8 = vld [vmem:[%s8629_s6 + $0x60] sm:$0x1]  ;;  %5002 = vmatprep.subr.mxu0 %v8638_v9  ;;  %v6394_v10 = vld [vmem:[%s8629_s6 + $0x58] sm:$0xff]  ;;  %v6406_v15 = vld [vmem:[%s8629_s6 + $0x50] sm:$0xff]  ;;  %128 = vst.msk [vmem:[#allocation4] sm:$0x3] %vm127_vm3, %v8638_v9 }
  0x4d   :  { %4987 = vmatpush3.msra.mxu1 %v140_v1  ;;  %5003 = vmatpush3.msk.msra.mxu0 %vm336_vm1, %v331_v8  ;;  %v6413_v16 = vld [vmem:[%s8629_s6 + $0x48] sm:$0xff]  ;;  %v6420_v17 = vld [vmem:[%s8629_s6 + $0x40] sm:$0xff]  ;;  %v6427_v18 = vld [vmem:[%s8629_s6 + $0x38] sm:$0xff]  ;;  %132 = vst.msk [vmem:[#allocation5] sm:$0x3] %vm131_vm5, %v8638_v9  ;;  %vm6261_vm6 = vmmov 0  }
  0x4e   :  { %4989 = vmatmul.mubr.msk.f32.vlgmr.msra.gmra.mxu1 %vm142_vm0, %v139_v3  ;;  %4991 = vmatprep.subr.mxu1 %v229_v4  ;;  %v6434_v19 = vld [vmem:[%s8629_s6 + $0x30] sm:$0xff]  ;;  %v6441_v20 = vld [vmem:[%s8629_s6 + $0x28] sm:$0xff]  ;;  %133 = vst.msk [vmem:[#allocation6] sm:$0x3] %vm127_vm3, %v8638_v9  ;;  %v6454_v21 = vld [vmem:[%s8629_s6 + $0x20] sm:$0xff]  ;;  %vm332_vm7 = vcmask 793600  }
  0x4f   :  { %4992 = vmatpush3.msra.mxu1 %v229_v4  ;;  %5004 = vmatprep.subr.mxu0 %v8638_v9  ;;  %135 = vst.msk [vmem:[#allocation7] sm:$0x3] %vm131_vm5, %v8638_v9  ;;  %v6461_v23 = vld [vmem:[%s8629_s6 + $0x18] sm:$0xff]  ;;  %v6468_v24 = vld [vmem:[%s8629_s6 + $0x10] sm:$0xff]  ;;  %v6475_v25 = vld [vmem:[%s8629_s6 + $0x8] sm:$0xff]  ;;  %s6262_s5 = smov 64  }
  0x50   :  { %4993 = vmatprep.subr.mxu1 %v228_v5  ;;  %5005 = vmatpush3.msra.mxu0 %v6394_v10  ;;  %130 = vst.msk [vmem:[#allocation4] sm:$0x3] %vm129_vm4, %v6260_v22  ;;  %134 = vst.msk [vmem:[#allocation6] sm:$0x3] %vm129_vm4, %v6260_v22  ;;  %v6482_v26 = vld [vmem:[%s8629_s6] sm:$0xff]  ;;  %s6263_s29 = smov 32  }
  0x51   :  { %4994 = vmatpush3.msra.mxu1 %v228_v5  ;;  %5006 = vmatprep.subr.mxu0 %v8638_v9  ;;  %v6502_v47 = vld [vmem:[#allocation17 + $0x28] sm:$0xff]  ;;  %v6504_v48 = vld [vmem:[#allocation17 + $0x20] sm:$0xff]  ;;  %vm136_vm8 = vcmask 386048   ;;  %v6512_v50 = vld [vmem:[#allocation17 + $0x18] sm:$0xff]  ;;  %s6264_s15 = smov 48   ;;  %vm453_vm9 = vcmask 386176  }
  0x52   :  { %4995 = vmatprep.subr.mxu1 %v227_v6  ;;  %5007 = vmatpush3.msra.mxu0 %v6406_v15  ;;  %137 = vst.msk [vmem:[#allocation8] sm:$0x3] %vm136_vm8, %v8638_v9  ;;  %v6516_v51 = vld [vmem:[#allocation17 + $0x10] sm:$0xff]  ;;  %v6520_v52 = vld [vmem:[#allocation17 + $0x8] sm:$0xff]  ;;  %v6524_v53 = vld [vmem:[#allocation17] sm:$0xff]  ;;  %vm463_vm10 = vcmask 392192  }
  0x53   :  { %4996 = vmatpush3.msra.mxu1 %v227_v6  ;;  %5008 = vmatprep.subr.mxu0 %v8638_v9  ;;  %v6536_v57 = vld [vmem:[%s8632_s9 + $0x78] sm:$0xff]  ;;  %v6542_v59 = vld [vmem:[%s8632_s9 + $0x70] sm:$0xff]  ;;  %v6551_v60 = vld [vmem:[%s8632_s9 + $0x68] sm:$0xff]  ;;  %vm625_vm11 = vcmask 58368   ;;  %s6265_s16 = smov 96   ;;  %vm448_vm12 = vcmask 779776  }
  0x54   :  { %4997 = vmatprep.subr.mxu1 %v226_v7  ;;  %5009 = vmatpush3.msra.mxu0 %v6413_v16  ;;  %v410_v36 = vld [vmem:[#allocation5] sm:$0x3]  ;;  %v6565_v62 = vld [vmem:[%s8632_s9 + $0x58] sm:$0xff]  ;;  %v6572_v63 = vld [vmem:[%s8632_s9 + $0x50] sm:$0xff]  ;;  %vm680_vm13 = vcmask 1041409   ;;  %vm685_vm14 = vcmask 517376  }
  0x55   :  { %4998 = vmatpush3.msra.mxu1 %v226_v7  ;;  %5010 = vmatprep.subr.mxu0 %v8638_v9  ;;  %v6558_v61 = vld [vmem:[%s8632_s9 + $0x60] sm:$0xff]  ;;  %v6579_v0 = vld [vmem:[%s8632_s9 + $0x48] sm:$0xff]  ;;  %v6595_v2 = vld [vmem:[%s8632_s9 + $0x38] sm:$0xff]  ;;  %vm676_vm15 = vcmask 123968   ;;  %vm4365_vm0 = vcmask 523264  }
  0x56   :  { %5031 = vmatprep.subr.mxu1 %v8638_v9  ;;  %5011 = vmatpush3.msra.mxu0 %v6420_v17  ;;  %v6588_v1 = vld [vmem:[%s8632_s9 + $0x40] sm:$0xff]  ;;  %v6601_v3 = vld [vmem:[%s8632_s9 + $0x30] sm:$0xff]  ;;  %v6607_v4 = vld [vmem:[%s8632_s9 + $0x28] sm:$0xff] }
  0x57   :  { %5012 = vmatprep.subr.mxu0 %v8638_v9  ;;  %5028 = vmatprep.mubr.msk.f32.mxu0 %vm6261_vm6, %v8638_v9  ;;  %v6614_v5 = vld [vmem:[%s8632_s9 + $0x20] sm:$0xff]  ;;  %v6621_v6 = vld [vmem:[%s8632_s9 + $0x18] sm:$0xff]  ;;  %v6628_v7 = vld [vmem:[%s8632_s9 + $0x10] sm:$0xff] }
  0x58   :  { %5013 = vmatpush3.msra.mxu0 %v6427_v18  ;;  %v6635_v8 = vld [vmem:[%s8632_s9 + $0x8] sm:$0xff] }
  0x59   :  { %5014 = vmatprep.subr.mxu0 %v8638_v9 }
  0x5a   :  { %5015 = vmatpush3.msra.mxu0 %v6434_v19 }
  0x5b   :  { %5016 = vmatprep.subr.mxu0 %v8638_v9 }
  0x5c   :  { %5017 = vmatpush3.msra.mxu0 %v6441_v20 }
  0x5d   :  { %5018 = vmatprep.subr.mxu0 %v8638_v9 }
  0x5e   :  { %5019 = vmatpush3.msra.mxu0 %v6454_v21 }
  0x5f   :  { %5020 = vmatprep.subr.mxu0 %v8638_v9 }
  0x60   :  { %5021 = vmatpush3.msra.mxu0 %v6461_v23 }
  0x61   :  { %5022 = vmatprep.subr.mxu0 %v8638_v9 }
  0x62   :  { %5023 = vmatpush3.msra.mxu0 %v6468_v24 }
  0x63   :  { %5024 = vmatprep.subr.mxu0 %v8638_v9 }
  0x64   :  { %5025 = vmatpush3.msra.mxu0 %v6475_v25 }
  0x65   :  { %5026 = vmatprep.subr.mxu0 %v8638_v9 }
  0x66   :  { %5027 = vmatpush3.msra.mxu0 %v6482_v26 }
  0x67   :  { %5081 = vmatprep.subr.mxu0 %v8638_v9 }
 0x10e   :  { %v4990_v11 = vpop.f32.mrf.mxu1 }
 0x10f   :  { %v225_v14 = vmax.f32 %v4990_v11, 0.0  ;;  %v6642_v11 = vld [vmem:[%s8632_s9] sm:$0xff] }
 0x110   :  { %v215_v12 = vpop.f32.mrf.mxu1 }
 0x111   :  { %v224_v13 = vmax.f32 %v215_v12, 0.0  ;;  %v462_v12 = vld [vmem:[%s8625_s2] sm:$0x3] }
 0x113   :  { %4999 = vmatprep.mubr.msk.f32.mxu1 %vm230_vm2, %v224_v13 }
 0x114   :  { %5000 = vmatmul.mubr.msk.f32.vlgmr.msra.gmra.mxu1 %vm230_vm2, %v225_v14 }
 0x115   :  { %5043 = vmatprep.mubr.msk.f32.mxu1 %vm6261_vm6, %v8638_v9  ;;  %5032 = vmatpush3.msra.mxu1 %v6502_v47 }
 0x116   :  { %5033 = vmatprep.subr.mxu1 %v8638_v9 }
 0x117   :  { %5034 = vmatpush3.msra.mxu1 %v6504_v48 }
 0x118   :  { %5035 = vmatprep.subr.mxu1 %v8638_v9 }
 0x119   :  { %5036 = vmatpush3.msra.mxu1 %v6512_v50 }
 0x11a   :  { %5037 = vmatprep.subr.mxu1 %v8638_v9 }
 0x11b   :  { %5038 = vmatpush3.msra.mxu1 %v6516_v51 }
 0x11c   :  { %5039 = vmatprep.subr.mxu1 %v8638_v9 }
 0x11d   :  { %5040 = vmatpush3.msra.mxu1 %v6520_v52 }
 0x11e   :  { %5041 = vmatprep.subr.mxu1 %v8638_v9 }
 0x11f   :  { %5042 = vmatpush3.msra.mxu1 %v6524_v53 }
 0x120   :  { %5046 = vmatprep.subr.mxu1 %v8638_v9 }
 0x1d4   :  { %v5001_v27 = vpop.f32.mrf.mxu1 }
 0x1d5   :  { %v313_v28 = vmax.f32 %v5001_v27, 0.0 }
 0x1d6   :  { %v303_v29 = vpop.f32.mrf.mxu1 }
 0x1d7   :  { %315 = vst.msk [vmem:[#allocation2 + $0x8] sm:$0xff] %vm230_vm2, %v313_v28  ;;  %v312_v30 = vmax.f32 %v303_v29, 0.0  ;;  %v554_v28 = vld [vmem:[%s8626_s3] sm:$0x3] }
 0x1d9   :  { %314 = vst.msk [vmem:[#allocation2] sm:$0xff] %vm230_vm2, %v312_v30 }
 0x1e0   :  { %v316_v31 = vld [vmem:[#allocation2] sm:$0x3] }
 0x1e1   :  { %317 = vst.msk [vmem:[#allocation4] sm:$0x3] %vm131_vm5, %v316_v31 }
 0x1e8   :  { %v318_v32 = vld [vmem:[#allocation4] sm:$0x3] }
 0x1e9   :  { %5029 = vmatmul.mubr.msk.f32.vlgmr.msra.gmra.mxu0 %vm332_vm7, %v318_v32 }
 0x1ea   :  { %5107 = vmatprep.mubr.msk.f32.mxu0 %vm6261_vm6, %v8638_v9 }
 0x2a9   :  { %v406_v33 = vpop.f32.mrf.mxu0 }
 0x2aa   :  { %5903 = vtanh.f32 %v406_v33  ;;  %v4491_v37 = vmul.f32 -1.442695, %v406_v33 }
 0x2ab   :  { %v5030_v34 = vpop.f32.mrf.mxu0 }
 0x2ac   :  { %5905 = vpow2.f32 %v4491_v37 }
 0x2b7   :  { %v5904_v35 = vpop.eup %5903 }
 0x2b8   :  { %424 = vrot.lane.b32.xlu0 %v5904_v35, %s6262_s5 }
 0x2b9   :  { %v5906_v38 = vpop.eup %5905 }
 0x2ba   :  { %v414_v39 = vadd.f32 1.0, %v5906_v38 }
 0x2bc   :  { %419 = vrot.lane.b32.xlu0 %v410_v36, %s6263_s29  ;;  %5907 = vrcp.f32 %v414_v39  ;;  %v637_v39 = vlaneseq }
 0x2c9   :  { %v5908_v40 = vpop.eup %5907 }
 0x32a   :  { %v425_v41 = vpop.permute.xlu0 %424 }
 0x32b   :  { %v427_v42 = vmul.f32 %v5908_v40, %v425_v41 }
 0x32d   :  { %429 = vrot.lane.b32.xlu1 %v427_v42, %s6263_s29 }
 0x32e   :  { %v420_v43 = vpop.permute.xlu0 %419 }
 0x32f   :  { %v422_v44 = vmul.f32 %v5908_v40, %v420_v43 }
 0x39f   :  { %v430_v45 = vpop.permute.xlu1 %429 }
 0x3a0   :  { %v6499_v46 = vadd.f32 %v430_v45, %v422_v44 }
 0x3a2   :  { %5909 = vtanh.f32 %v6499_v46 }
 0x3af   :  { %v5910_v49 = vpop.eup %5909 }
 0x3b0   :  { %435 = vrot.lane.b32.xlu1 %v5910_v49, %s6262_s5 }
 0x422   :  { %v436_v54 = vpop.permute.xlu1 %435 }
 0x423   :  { %v6528_v55 = vmul.f32 %v5908_v40, %v436_v54  ;;  %v638_v40 = vshrl.u32 %v637_v39, 7  ;;  %v842_v54 = vld [vmem:[%s8629_s6 + $0x60] sm:$0x1] }
 0x425   :  { %450 = vrot.lane.b32.xlu0 %v6528_v55, %s6264_s15  ;;  %v6658_v41 = vsub.s32 1, %v638_v40  ;;  %v6660_v42 = vsub.s32 0, %v638_v40 }
 0x497   :  { %v451_v56 = vpop.permute.xlu0 %450 }
 0x498   :  { %454 = vst.msk [vmem:[#allocation8] sm:$0x3] %vm453_vm9, %v451_v56  ;;  %v6707_v56 = vld [vmem:[#allocation12] sm:$0xff] }
 0x49f   :  { %v455_v58 = vld [vmem:[#allocation8] sm:$0x3] }
 0x4a0   :  { %5044 = vmatmul.mubr.msk.f32.vlgmr.msra.gmra.mxu1 %vm463_vm10, %v455_v58 }
 0x4a1   :  { %5047 = vmatpush3.msra.mxu1 %v6536_v57  ;;  %5078 = vmatprep.mubr.msk.f32.mxu1 %vm6261_vm6, %v8638_v9 }
 0x4a2   :  { %5048 = vmatprep.subr.mxu1 %v8638_v9 }
 0x4a3   :  { %5049 = vmatpush3.msra.mxu1 %v6542_v59 }
 0x4a4   :  { %5050 = vmatprep.subr.mxu1 %v8638_v9 }
 0x4a5   :  { %5051 = vmatpush3.msra.mxu1 %v6551_v60 }
 0x4a6   :  { %5052 = vmatprep.subr.mxu1 %v8638_v9 }
 0x4a7   :  { %5053 = vmatpush3.msra.mxu1 %v6558_v61 }
 0x4a8   :  { %5054 = vmatprep.subr.mxu1 %v8638_v9 }
 0x4a9   :  { %5055 = vmatpush3.msra.mxu1 %v6565_v62 }
 0x4aa   :  { %5056 = vmatprep.subr.mxu1 %v8638_v9 }
 0x4ab   :  { %5057 = vmatpush3.msra.mxu1 %v6572_v63 }
 0x4ac   :  { %5058 = vmatprep.subr.mxu1 %v8638_v9 }
 0x4ad   :  { %5059 = vmatpush3.msra.mxu1 %v6579_v0 }
 0x4ae   :  { %5060 = vmatprep.subr.mxu1 %v8638_v9 }
 0x4af   :  { %5061 = vmatpush3.msra.mxu1 %v6588_v1 }
 0x4b0   :  { %5062 = vmatprep.subr.mxu1 %v8638_v9 }
 0x4b1   :  { %5063 = vmatpush3.msra.mxu1 %v6595_v2 }
 0x4b2   :  { %5064 = vmatprep.subr.mxu1 %v8638_v9 }
 0x4b3   :  { %5065 = vmatpush3.msra.mxu1 %v6601_v3 }
 0x4b4   :  { %5066 = vmatprep.subr.mxu1 %v8638_v9 }
 0x4b5   :  { %5067 = vmatpush3.msra.mxu1 %v6607_v4 }
 0x4b6   :  { %5068 = vmatprep.subr.mxu1 %v8638_v9 }
 0x4b7   :  { %5069 = vmatpush3.msra.mxu1 %v6614_v5 }
 0x4b8   :  { %5070 = vmatprep.subr.mxu1 %v8638_v9 }
 0x4b9   :  { %5071 = vmatpush3.msra.mxu1 %v6621_v6 }
 0x4ba   :  { %5072 = vmatprep.subr.mxu1 %v8638_v9 }
 0x4bb   :  { %5073 = vmatpush3.msra.mxu1 %v6628_v7 }
 0x4bc   :  { %5074 = vmatprep.subr.mxu1 %v8638_v9 }
 0x4bd   :  { %5075 = vmatpush3.msra.mxu1 %v6635_v8 }
 0x4be   :  { %5076 = vmatprep.subr.mxu1 %v8638_v9 }
 0x4bf   :  { %5077 = vmatpush3.msra.mxu1 %v6642_v11 }
 0x4c0   :  { %5110 = vmatprep.subr.mxu1 %v8638_v9 }
 0x560   :  { %v533_v13 = vpop.f32.mrf.mxu1 }
 0x561   :  { %v534_v14 = vadd.f32 %v533_v13, %v462_v12 }
 0x562   :  { %v5045_v22 = vpop.f32.mrf.mxu1 }
 0x563   :  { %5911 = vtanh.f32 %v534_v14 }
 0x570   :  { %v5912_v27 = vpop.eup %5911 }
 0x571   :  { %5079 = vmatmul.mubr.f32.vlgmr.msra.gmra.mxu1 %v5912_v27 }
 0x572   :  { %5136 = vmatprep.mubr.msk.f32.mxu1 %vm6261_vm6, %v8638_v9  ;;  %5111 = vmatpush3.msk.msra.mxu1 %vm336_vm1, %v842_v54 }
 0x573   :  { %5112 = vmatprep.subr.mxu1 %v8638_v9 }
 0x574   :  { %5113 = vmatpush3.msra.mxu1 %v6394_v10 }
 0x575   :  { %5114 = vmatprep.subr.mxu1 %v8638_v9 }
 0x576   :  { %5115 = vmatpush3.msra.mxu1 %v6406_v15 }
 0x577   :  { %5116 = vmatprep.subr.mxu1 %v8638_v9 }
 0x578   :  { %5117 = vmatpush3.msra.mxu1 %v6413_v16 }
 0x579   :  { %5118 = vmatprep.subr.mxu1 %v8638_v9 }
 0x57a   :  { %5119 = vmatpush3.msra.mxu1 %v6420_v17 }
 0x57b   :  { %5120 = vmatprep.subr.mxu1 %v8638_v9 }
 0x57c   :  { %5121 = vmatpush3.msra.mxu1 %v6427_v18 }
 0x57d   :  { %5122 = vmatprep.subr.mxu1 %v8638_v9 }
 0x57e   :  { %5123 = vmatpush3.msra.mxu1 %v6434_v19 }
 0x57f   :  { %5124 = vmatprep.subr.mxu1 %v8638_v9 }
 0x580   :  { %5125 = vmatpush3.msra.mxu1 %v6441_v20 }
 0x581   :  { %5126 = vmatprep.subr.mxu1 %v8638_v9 }
 0x582   :  { %5127 = vmatpush3.msra.mxu1 %v6454_v21 }
 0x583   :  { %5128 = vmatprep.subr.mxu1 %v8638_v9 }
 0x584   :  { %5129 = vmatpush3.msra.mxu1 %v6461_v23 }
 0x585   :  { %5130 = vmatprep.subr.mxu1 %v8638_v9 }
 0x586   :  { %5131 = vmatpush3.msra.mxu1 %v6468_v24 }
 0x587   :  { %5132 = vmatprep.subr.mxu1 %v8638_v9 }
 0x588   :  { %5133 = vmatpush3.msra.mxu1 %v6475_v25 }
 0x589   :  { %5134 = vmatprep.subr.mxu1 %v8638_v9 }
 0x58a   :  { %5135 = vmatpush3.msra.mxu1 %v6482_v26 }
 0x58b   :  { %5189 = vmatprep.subr.mxu1 %v8638_v9 }
 0x631   :  { %v621_v29 = vpop.f32.mrf.mxu1 }
 0x632   :  { %v622_v30 = vadd.f32 %v621_v29, %v554_v28 }
 0x633   :  { %v5080_v31 = vpop.f32.mrf.mxu1 }
 0x634   :  { %v626_v32 = vsel %vm625_vm11, %v622_v30, -inf }
 0x635   :  { %627 = vmax.xlane.f32.xlu1 %v626_v32 }
 0x6be   :  { %v628_v33 = vpop.xlane.xlu1 %627 }
 0x6bf   :  { %v629_v34 = vsub.f32 %v622_v30, %v628_v33 }
 0x6c1   :  { %v630_v35 = vmul.f32 1.442695, %v629_v34 }
 0x6c3   :  { %5913 = vpow2.f32 %v630_v35 }
 0x6d0   :  { %v5914_v36 = vpop.eup %5913 }
 0x6d1   :  { %v632_v37 = vsel %vm625_vm11, %v5914_v36, 0.0 }
 0x6d2   :  { %633 = vadd.xlane.f32.xlu0 %v632_v37 }
 0x75b   :  { %v634_v38 = vpop.xlane.xlu0 %633 }
 0x75c   :  { %5915 = vrcp.f32 %v634_v38 }
 0x769   :  { %v5916_v43 = vpop.eup %5915 }
 0x76a   :  { %v6662_v44 = vmul.f32 %v5916_v43, %v5914_v36 }
 0x76c   :  { %v647_v45 = vrot.slane %v6662_v44, %v6658_v41  ;;  %669 = vst.msk [vmem:[#allocation8] sm:$0x3] %vm625_vm11, %v6662_v44  ;;  %687 = vst.msk [vmem:[#allocation21] sm:$0x3] %vm625_vm11, %v6662_v44  ;;  %v640_v49 = vrot.slane %v6662_v44, %v6660_v42 }
 0x76e   :  { %649 = vbcast.lane.b32.xlu1 %v647_v45, 256  ;;  %642 = vbcast.lane.b32.xlu0 %v640_v49, 256 }
 0x772   :  { %445 = vrot.lane.b32.xlu1 %v6528_v55, %s6265_s16 }
 0x776   :  { %440 = vrot.lane.b32.xlu1 %v6499_v46, %s6265_s16  ;;  %v6705_v46 = vld [vmem:[#allocation12 + $0x8] sm:$0xff] }
 0x7e0   :  { %v650_v58 = vpop.permute.xlu1 %649  ;;  %v643_v12 = vpop.permute.xlu0 %642 }
 0x7e1   :  { %v654_v13 = vmul.f32 %v6705_v46, %v650_v58  ;;  %v653_v14 = vmul.f32 %v6707_v56, %v643_v12  ;;  %v827_v58 = vld [vmem:[#allocation2 + $0x2] sm:$0x3] }
 0x7e3   :  { %v662_v22 = vsel %vm230_vm2, %v654_v13, 0.0  ;;  %v655_v27 = vsel %vm230_vm2, %v653_v14, 0.0 }
 0x7e4   :  { %v663_v28 = vrot.slane %v662_v22, 4  ;;  %v656_v29 = vrot.slane %v655_v27, 4  ;;  %v446_v30 = vpop.permute.xlu1 %445 }
 0x7e5   :  { %449 = vst.msk [vmem:[#allocation4] sm:$0x3] %vm448_vm12, %v446_v30 }
 0x7e6   :  { %v664_v31 = vadd.f32 %v663_v28, %v662_v22  ;;  %v657_v32 = vadd.f32 %v656_v29, %v655_v27  ;;  %v706_v22 = vld [vmem:[#allocation15 + $0x60] sm:$0x1]  ;;  %v6726_v27 = vld [vmem:[#allocation15 + $0x58] sm:$0xff]  ;;  %v6730_v28 = vld [vmem:[#allocation15 + $0x50] sm:$0xff] }
 0x7e7   :  { %5082 = vmatpush3.msk.msra.mxu0 %vm336_vm1, %v706_v22  ;;  %v6734_v29 = vld [vmem:[#allocation15 + $0x48] sm:$0xff] }
 0x7e8   :  { %v665_v33 = vrot.slane %v664_v31, 2  ;;  %v658_v34 = vrot.slane %v657_v32, 2  ;;  %v441_v35 = vpop.permute.xlu1 %440  ;;  %5083 = vmatprep.subr.mxu0 %v8638_v9 }
 0x7e9   :  { %443 = vst.msk [vmem:[#allocation5] sm:$0x3] %vm131_vm5, %v441_v35  ;;  %5084 = vmatpush3.msra.mxu0 %v6726_v27 }
 0x7ea   :  { %v666_v36 = vadd.f32 %v665_v33, %v664_v31  ;;  %v659_v37 = vadd.f32 %v658_v34, %v657_v32  ;;  %5085 = vmatprep.subr.mxu0 %v8638_v9  ;;  %v6738_v31 = vld [vmem:[#allocation15 + $0x40] sm:$0xff]  ;;  %v6743_v32 = vld [vmem:[#allocation15 + $0x38] sm:$0xff] }
 0x7eb   :  { %5086 = vmatpush3.msra.mxu0 %v6730_v28 }
 0x7ec   :  { %v660_v38 = vrot.slane %v659_v37, 1  ;;  %v667_v39 = vrot.slane %v666_v36, 1  ;;  %5087 = vmatprep.subr.mxu0 %v8638_v9 }
 0x7ed   :  { %5088 = vmatpush3.msra.mxu0 %v6734_v29 }
 0x7ee   :  { %v661_v40 = vadd.f32 %v660_v38, %v659_v37  ;;  %v668_v43 = vadd.f32 %v667_v39, %v666_v36  ;;  %5089 = vmatprep.subr.mxu0 %v8638_v9  ;;  %v6749_v36 = vld [vmem:[#allocation15 + $0x30] sm:$0xff]  ;;  %v6753_v37 = vld [vmem:[#allocation15 + $0x28] sm:$0xff]  ;;  %v6757_v38 = vld [vmem:[#allocation15 + $0x20] sm:$0xff] }
 0x7ef   :  { %5090 = vmatpush3.msra.mxu0 %v6738_v31  ;;  %v6761_v39 = vld [vmem:[#allocation15 + $0x18] sm:$0xff] }
 0x7f0   :  { %v919_v45 = vld [vmem:[#allocation5] sm:$0x3]  ;;  %v681_v49 = vsel %vm680_vm13, %v668_v43, %v661_v40  ;;  %5091 = vmatprep.subr.mxu0 %v8638_v9  ;;  %v6765_v40 = vld [vmem:[#allocation15 + $0x10] sm:$0xff] }
 0x7f1   :  { %928 = vrot.lane.b32.xlu1 %v919_v45, %s6263_s29  ;;  %682 = vrot.lane.b32.xlu0 %v681_v49, %s6263_s29  ;;  %v6769_v49 = vld [vmem:[#allocation15 + $0x8] sm:$0xff] }
 0x7f2   :  { %5092 = vmatpush3.msra.mxu0 %v6743_v32 }
 0x7f3   :  { %5093 = vmatprep.subr.mxu0 %v8638_v9 }
 0x7f4   :  { %5094 = vmatpush3.msra.mxu0 %v6749_v36 }
 0x7f5   :  { %5095 = vmatprep.subr.mxu0 %v8638_v9 }
 0x7f6   :  { %5096 = vmatpush3.msra.mxu0 %v6753_v37 }
 0x7f7   :  { %5097 = vmatprep.subr.mxu0 %v8638_v9 }
 0x7f8   :  { %5098 = vmatpush3.msra.mxu0 %v6757_v38 }
 0x7f9   :  { %5099 = vmatprep.subr.mxu0 %v8638_v9 }
 0x7fa   :  { %5100 = vmatpush3.msra.mxu0 %v6761_v39 }
 0x7fb   :  { %5101 = vmatprep.subr.mxu0 %v8638_v9 }
 0x7fc   :  { %5102 = vmatpush3.msra.mxu0 %v6765_v40 }
 0x7fd   :  { %5103 = vmatprep.subr.mxu0 %v8638_v9 }
 0x7fe   :  { %5104 = vmatpush3.msra.mxu0 %v6769_v49 }
 0x7ff   :  { %5105 = vmatprep.subr.mxu0 %v8638_v9 }
 0x863   :  { %v6718_v54 = vpop.permute.xlu0 %682 }
 0x864   :  { %8646 = vst [vmem:[#allocation29_spill] sm:$0xff] %v6718_v54  ;;  %686 = vst.msk [vmem:[#allocation4] sm:$0x3] %vm685_vm14, %v6718_v54 }
 0x865   :  { %828 = vst.msk [vmem:[#allocation4] sm:$0x3] %vm131_vm5, %v827_v58 }
 0x86c   :  { %v829_v12 = vld [vmem:[#allocation4] sm:$0x3] }
 0x86d   :  { %5137 = vmatmul.mubr.msk.f32.vlgmr.msra.gmra.mxu1 %vm332_vm7, %v829_v12  ;;  %v6773_v12 = vld [vmem:[#allocation15] sm:$0xff] }
 0x86e   :  { %5215 = vmatprep.mubr.msk.f32.mxu1 %vm6261_vm6, %v8638_v9  ;;  %5106 = vmatpush3.msra.mxu0 %v6773_v12 }
 0x86f   :  { %5139 = vmatprep.subr.mxu0 %v8638_v9 }
 0x92d   :  { %v915_v13 = vpop.f32.mrf.mxu1 }
 0x92e   :  { %5917 = vtanh.f32 %v915_v13  ;;  %v4498_v33 = vmul.f32 -1.442695, %v915_v13  ;;  %v929_v13 = vpop.permute.xlu1 %928 }
 0x92f   :  { %v5138_v14 = vpop.f32.mrf.mxu1 }
 0x930   :  { %5919 = vpow2.f32 %v4498_v33 }
 0x93b   :  { %v5918_v30 = vpop.eup %5917 }
 0x93c   :  { %933 = vrot.lane.b32.xlu0 %v5918_v30, %s6262_s5 }
 0x93d   :  { %v5920_v34 = vpop.eup %5919 }
 0x93e   :  { %v923_v35 = vadd.f32 1.0, %v5920_v34 }
 0x940   :  { %5921 = vrcp.f32 %v923_v35 }
 0x94d   :  { %v5922_v43 = vpop.eup %5921 }
 0x94e   :  { %v931_v14 = vmul.f32 %v5922_v43, %v929_v13 }
 0x9ae   :  { %v934_v45 = vpop.permute.xlu0 %933 }
 0x9af   :  { %v936_v58 = vmul.f32 %v5922_v43, %v934_v45 }
 0x9b1   :  { %938 = vrot.lane.b32.xlu0 %v936_v58, %s6263_s29 }
 0x9b5   :  { %688 = vrot.lane.b32.xlu0 %v6528_v55, %s6263_s29 }
 0xa23   :  { %v939_v22 = vpop.permute.xlu0 %938 }
 0xa24   :  { %v6780_v30 = vadd.f32 %v939_v22, %v931_v14 }
 0xa26   :  { %5923 = vtanh.f32 %v6780_v30 }
 0xa27   :  { %v689_v33 = vpop.permute.xlu0 %688 }
 0xa28   :  { %691 = vst.msk [vmem:[#allocation6] sm:$0x3] %vm131_vm5, %v689_v33  ;;  %v1345_v33 = vld [vmem:[%s8629_s6 + $0x60] sm:$0x1] }
 0xa29   :  { %692 = vst.msk [vmem:[#allocation6] sm:$0x3] %vm685_vm14, %v6718_v54 }
 0xa30   :  { %v693_v34 = vld [vmem:[#allocation6] sm:$0x3] }
 0xa31   :  { %5108 = vmatmul.mubr.msk.f32.vlgmr.msra.gmra.mxu0 %vm332_vm7, %v693_v34 }
 0xa32   :  { %5140 = vmatpush3.msra.mxu0 %v6502_v47  ;;  %5151 = vmatprep.mubr.msk.f32.mxu0 %vm6261_vm6, %v8638_v9 }
 0xa33   :  { %v5924_v55 = vpop.eup %5923  ;;  %5141 = vmatprep.subr.mxu0 %v8638_v9 }
 0xa34   :  { %944 = vrot.lane.b32.xlu1 %v5924_v55, %s6262_s5  ;;  %5142 = vmatpush3.msra.mxu0 %v6504_v48 }
 0xa35   :  { %5143 = vmatprep.subr.mxu0 %v8638_v9 }
 0xa36   :  { %5144 = vmatpush3.msra.mxu0 %v6512_v50  ;;  %v670_v50 = vld [vmem:[#allocation8] sm:$0x3] }
 0xa37   :  { %5145 = vmatprep.subr.mxu0 %v8638_v9 }
 0xa38   :  { %672 = vrot.lane.b32.xlu1 %v6662_v44, %s6254_s14  ;;  %5146 = vmatpush3.msra.mxu0 %v6516_v51 }
 0xa39   :  { %5147 = vmatprep.subr.mxu0 %v8638_v9 }
 0xa3a   :  { %5148 = vmatpush3.msra.mxu0 %v6520_v52 }
 0xa3b   :  { %5149 = vmatprep.subr.mxu0 %v8638_v9 }
 0xa3c   :  { %5150 = vmatpush3.msra.mxu0 %v6524_v53 }
 0xa3d   :  { %5154 = vmatprep.subr.mxu0 %v8638_v9 }
 0xaa6   :  { %v945_v47 = vpop.permute.xlu1 %944 }
 0xaa7   :  { %v6804_v48 = vmul.f32 %v5922_v43, %v945_v47 }
 0xaa9   :  { %958 = vrot.lane.b32.xlu0 %v6804_v48, %s6264_s15 }
 0xaaa   :  { %v673_v44 = vpop.permute.xlu1 %672 }
 0xaab   :  { %v675_v51 = vadd.f32 %v673_v44, %v670_v50 }
 0xaad   :  { %677 = vst.msk [vmem:[#allocation8] sm:$0x3] %vm676_vm15, %v675_v51 }
 0xaf1   :  { %v6809_v35 = vpop.f32.mrf.mxu0 }
 0xaf3   :  { %v5109_v52 = vpop.f32.mrf.mxu0 }
 0xaf4   :  { %v783_v52 = vld [vmem:[#allocation7] sm:$0x3] }
 0xb1b   :  { %v959_v45 = vpop.permute.xlu0 %958 }
 0xb1c   :  { %961 = vst.msk [vmem:[#allocation8] sm:$0x3] %vm453_vm9, %v959_v45 }
 0xb23   :  { %v962_v53 = vld [vmem:[#allocation8] sm:$0x3] }
 0xb24   :  { %5152 = vmatmul.mubr.msk.f32.vlgmr.msra.gmra.mxu0 %vm463_vm10, %v962_v53  ;;  %v1330_v53 = vld [vmem:[#allocation2 + $0x4] sm:$0x3] }
 0xb25   :  { %5155 = vmatpush3.msra.mxu0 %v6536_v57  ;;  %5186 = vmatprep.mubr.msk.f32.mxu0 %vm6261_vm6, %v8638_v9  ;;  %v969_v57 = vld [vmem:[%s8625_s2] sm:$0x3] }
 0xb26   :  { %5156 = vmatprep.subr.mxu0 %v8638_v9 }
 0xb27   :  { %5157 = vmatpush3.msra.mxu0 %v6542_v59 }
 0xb28   :  { %5158 = vmatprep.subr.mxu0 %v8638_v9 }
 0xb29   :  { %5159 = vmatpush3.msra.mxu0 %v6551_v60 }
 0xb2a   :  { %5160 = vmatprep.subr.mxu0 %v8638_v9 }
 0xb2b   :  { %5161 = vmatpush3.msra.mxu0 %v6558_v61 }
 0xb2c   :  { %5162 = vmatprep.subr.mxu0 %v8638_v9 }
 0xb2d   :  { %5163 = vmatpush3.msra.mxu0 %v6565_v62 }
 0xb2e   :  { %5164 = vmatprep.subr.mxu0 %v8638_v9 }
 0xb2f   :  { %5165 = vmatpush3.msra.mxu0 %v6572_v63  ;;  %v1060_v63 = vld [vmem:[%s8626_s3] sm:$0x3] }
 0xb30   :  { %5166 = vmatprep.subr.mxu0 %v8638_v9 }
 0xb31   :  { %5167 = vmatpush3.msra.mxu0 %v6579_v0 }
 0xb32   :  { %5168 = vmatprep.subr.mxu0 %v8638_v9 }
 0xb33   :  { %5169 = vmatpush3.msra.mxu0 %v6588_v1 }
 0xb34   :  { %5170 = vmatprep.subr.mxu0 %v8638_v9 }
 0xb35   :  { %5171 = vmatpush3.msra.mxu0 %v6595_v2 }
 0xb36   :  { %5172 = vmatprep.subr.mxu0 %v8638_v9 }
 0xb37   :  { %5173 = vmatpush3.msra.mxu0 %v6601_v3 }
 0xb38   :  { %5174 = vmatprep.subr.mxu0 %v8638_v9 }
 0xb39   :  { %5175 = vmatpush3.msra.mxu0 %v6607_v4 }
 0xb3a   :  { %5176 = vmatprep.subr.mxu0 %v8638_v9 }
 0xb3b   :  { %5177 = vmatpush3.msra.mxu0 %v6614_v5 }
 0xb3c   :  { %5178 = vmatprep.subr.mxu0 %v8638_v9 }
 0xb3d   :  { %5179 = vmatpush3.msra.mxu0 %v6621_v6 }
 0xb3e   :  { %5180 = vmatprep.subr.mxu0 %v8638_v9 }
 0xb3f   :  { %5181 = vmatpush3.msra.mxu0 %v6628_v7 }
 0xb40   :  { %5182 = vmatprep.subr.mxu0 %v8638_v9 }
 0xb41   :  { %5183 = vmatpush3.msra.mxu0 %v6635_v8 }
 0xb42   :  { %5184 = vmatprep.subr.mxu0 %v8638_v9 }
 0xb43   :  { %5185 = vmatpush3.msra.mxu0 %v6642_v11 }
 0xb44   :  { %5218 = vmatprep.subr.mxu0 %v8638_v9 }
 0xbe4   :  { %v1039_v59 = vpop.f32.mrf.mxu0 }
 0xbe5   :  { %v1040_v60 = vadd.f32 %v1039_v59, %v969_v57 }
 0xbe6   :  { %v5153_v61 = vpop.f32.mrf.mxu0 }
 0xbe7   :  { %5925 = vtanh.f32 %v1040_v60  ;;  %v4495_v60 = vmul.f32 -1.442695, %v6809_v35 }
 0xbf4   :  { %v5926_v62 = vpop.eup %5925 }
 0xbf5   :  { %5187 = vmatmul.mubr.f32.vlgmr.msra.gmra.mxu0 %v5926_v62 }
 0xbf6   :  { %5244 = vmatprep.mubr.msk.f32.mxu0 %vm6261_vm6, %v8638_v9  ;;  %5219 = vmatpush3.msk.msra.mxu0 %vm336_vm1, %v1345_v33  ;;  %v1209_v33 = vld [vmem:[#allocation15 + $0x60] sm:$0x1] }
 0xbf7   :  { %5220 = vmatprep.subr.mxu0 %v8638_v9  ;;  %5190 = vmatpush3.msk.msra.mxu1 %vm336_vm1, %v1209_v33 }
 0xbf8   :  { %5221 = vmatpush3.msra.mxu0 %v6394_v10  ;;  %5191 = vmatprep.subr.mxu1 %v8638_v9 }
 0xbf9   :  { %5222 = vmatprep.subr.mxu0 %v8638_v9  ;;  %5192 = vmatpush3.msra.mxu1 %v6726_v27 }
 0xbfa   :  { %5223 = vmatpush3.msra.mxu0 %v6406_v15  ;;  %5193 = vmatprep.subr.mxu1 %v8638_v9 }
 0xbfb   :  { %5224 = vmatprep.subr.mxu0 %v8638_v9  ;;  %5194 = vmatpush3.msra.mxu1 %v6730_v28 }
 0xbfc   :  { %5225 = vmatpush3.msra.mxu0 %v6413_v16  ;;  %5195 = vmatprep.subr.mxu1 %v8638_v9 }
 0xbfd   :  { %5226 = vmatprep.subr.mxu0 %v8638_v9  ;;  %5196 = vmatpush3.msra.mxu1 %v6734_v29 }
 0xbfe   :  { %5227 = vmatpush3.msra.mxu0 %v6420_v17  ;;  %5197 = vmatprep.subr.mxu1 %v8638_v9 }
 0xbff   :  { %5228 = vmatprep.subr.mxu0 %v8638_v9  ;;  %5198 = vmatpush3.msra.mxu1 %v6738_v31 }
 0xc00   :  { %5229 = vmatpush3.msra.mxu0 %v6427_v18  ;;  %5199 = vmatprep.subr.mxu1 %v8638_v9 }
 0xc01   :  { %5230 = vmatprep.subr.mxu0 %v8638_v9  ;;  %5200 = vmatpush3.msra.mxu1 %v6743_v32 }
 0xc02   :  { %5231 = vmatpush3.msra.mxu0 %v6434_v19  ;;  %5201 = vmatprep.subr.mxu1 %v8638_v9 }
 0xc03   :  { %5232 = vmatprep.subr.mxu0 %v8638_v9  ;;  %5202 = vmatpush3.msra.mxu1 %v6749_v36 }
 0xc04   :  { %5233 = vmatpush3.msra.mxu0 %v6441_v20  ;;  %5203 = vmatprep.subr.mxu1 %v8638_v9 }
 0xc05   :  { %5234 = vmatprep.subr.mxu0 %v8638_v9  ;;  %5204 = vmatpush3.msra.mxu1 %v6753_v37 }
 0xc06   :  { %5235 = vmatpush3.msra.mxu0 %v6454_v21  ;;  %5205 = vmatprep.subr.mxu1 %v8638_v9 }
 0xc07   :  { %5236 = vmatprep.subr.mxu0 %v8638_v9  ;;  %5206 = vmatpush3.msra.mxu1 %v6757_v38 }
 0xc08   :  { %5237 = vmatpush3.msra.mxu0 %v6461_v23  ;;  %5207 = vmatprep.subr.mxu1 %v8638_v9 }
 0xc09   :  { %5238 = vmatprep.subr.mxu0 %v8638_v9  ;;  %5208 = vmatpush3.msra.mxu1 %v6761_v39 }
 0xc0a   :  { %5239 = vmatpush3.msra.mxu0 %v6468_v24  ;;  %5209 = vmatprep.subr.mxu1 %v8638_v9 }
 0xc0b   :  { %5240 = vmatprep.subr.mxu0 %v8638_v9  ;;  %5210 = vmatpush3.msra.mxu1 %v6765_v40 }
 0xc0c   :  { %5241 = vmatpush3.msra.mxu0 %v6475_v25  ;;  %5211 = vmatprep.subr.mxu1 %v8638_v9 }
 0xc0d   :  { %5242 = vmatprep.subr.mxu0 %v8638_v9  ;;  %5212 = vmatpush3.msra.mxu1 %v6769_v49 }
 0xc0e   :  { %5243 = vmatpush3.msra.mxu0 %v6482_v26  ;;  %5213 = vmatprep.subr.mxu1 %v8638_v9 }
 0xc0f   :  { %5297 = vmatprep.subr.mxu0 %v8638_v9  ;;  %5214 = vmatpush3.msra.mxu1 %v6773_v12 }
 0xc10   :  { %5247 = vmatprep.subr.mxu1 %v8638_v9 }
 0xcb5   :  { %v1127_v0 = vpop.f32.mrf.mxu0 }
 0xcb6   :  { %v1128_v1 = vadd.f32 %v1127_v0, %v1060_v63 }
 0xcb7   :  { %v5188_v2 = vpop.f32.mrf.mxu0 }
 0xcb8   :  { %v1131_v3 = vsel %vm625_vm11, %v1128_v1, -inf }
 0xcb9   :  { %1132 = vmax.xlane.f32.xlu1 %v1131_v3 }
 0xd42   :  { %v1133_v4 = vpop.xlane.xlu1 %1132 }
 0xd43   :  { %v1134_v5 = vsub.f32 %v1128_v1, %v1133_v4 }
 0xd45   :  { %v1135_v6 = vmul.f32 1.442695, %v1134_v5 }
 0xd47   :  { %5927 = vpow2.f32 %v1135_v6 }
 0xd54   :  { %v5928_v7 = vpop.eup %5927 }
 0xd55   :  { %v1137_v8 = vsel %vm625_vm11, %v5928_v7, 0.0 }
 0xd56   :  { %1138 = vadd.xlane.f32.xlu0 %v1137_v8 }
 0xddf   :  { %v1139_v11 = vpop.xlane.xlu0 %1138 }
 0xde0   :  { %5929 = vrcp.f32 %v1139_v11 }
 0xde1   :  { %5931 = vtanh.f32 %v6809_v35 }
 0xde2   :  { %5933 = vpow2.f32 %v4495_v60  ;;  %v7112_v60 = vld [vmem:[%s8632_s9] sm:$0xff] }
 0xded   :  { %v5930_v43 = vpop.eup %5929 }
 0xdee   :  { %v6858_v58 = vmul.f32 %v5930_v43, %v5928_v7  ;;  %v5932_v22 = vpop.eup %5931 }
 0xdef   :  { %v5934_v61 = vpop.eup %5933 }
 0xdf0   :  { %v1152_v13 = vrot.slane %v6858_v58, %v6658_v41  ;;  %1174 = vst.msk [vmem:[#allocation8] sm:$0x3] %vm625_vm11, %v6858_v58  ;;  %1190 = vst.msk [vmem:[#allocation21 + $0x2] sm:$0x3] %vm625_vm11, %v6858_v58  ;;  %v1145_v14 = vrot.slane %v6858_v58, %v6660_v42  ;;  %v787_v62 = vadd.f32 1.0, %v5934_v61 }
 0xdf2   :  { %1154 = vbcast.lane.b32.xlu1 %v1152_v13, 256  ;;  %1147 = vbcast.lane.b32.xlu0 %v1145_v14, 256 }
 0xdf6   :  { %954 = vrot.lane.b32.xlu1 %v6804_v48, %s6265_s16 }
 0xdf7   :  { %v1175_v12 = vld [vmem:[#allocation8] sm:$0x3] }
 0xdfa   :  { %797 = vrot.lane.b32.xlu1 %v5932_v22, %s6262_s5 }
 0xe64   :  { %v1155_v10 = vpop.permute.xlu1 %1154  ;;  %v1148_v15 = vpop.permute.xlu0 %1147 }
 0xe65   :  { %v1159_v16 = vmul.f32 %v1155_v10, %v6705_v46  ;;  %v1158_v17 = vmul.f32 %v1148_v15, %v6707_v56 }
 0xe67   :  { %v1167_v18 = vsel %vm230_vm2, %v1159_v16, 0.0  ;;  %v1160_v19 = vsel %vm230_vm2, %v1158_v17, 0.0  ;;  %v6978_v17 = vld [vmem:[#allocation17 + $0x20] sm:$0xff] }
 0xe68   :  { %v1168_v20 = vrot.slane %v1167_v18, 4  ;;  %v1161_v21 = vrot.slane %v1160_v19, 4  ;;  %v955_v23 = vpop.permute.xlu1 %954 }
 0xe69   :  { %957 = vst.msk [vmem:[#allocation4] sm:$0x3] %vm448_vm12, %v955_v23 }
 0xe6a   :  { %v1169_v24 = vadd.f32 %v1168_v20, %v1167_v18  ;;  %v1162_v25 = vadd.f32 %v1161_v21, %v1160_v19  ;;  %v6984_v18 = vld [vmem:[#allocation17 + $0x18] sm:$0xff]  ;;  %v6988_v19 = vld [vmem:[#allocation17 + $0x10] sm:$0xff]  ;;  %v6992_v20 = vld [vmem:[#allocation17 + $0x8] sm:$0xff] }
 0xe6b   :  { %v6996_v21 = vld [vmem:[#allocation17] sm:$0xff] }
 0xe6c   :  { %v1170_v26 = vrot.slane %v1169_v24, 2  ;;  %v1163_v34 = vrot.slane %v1162_v25, 2  ;;  %v798_v2 = vpop.permute.xlu1 %797 }
 0xe6e   :  { %v1171_v55 = vadd.f32 %v1170_v26, %v1169_v24  ;;  %v1164_v47 = vadd.f32 %v1163_v34, %v1162_v25  ;;  %v7006_v24 = vld [vmem:[%s8632_s9 + $0x78] sm:$0xff]  ;;  %v7012_v26 = vld [vmem:[%s8632_s9 + $0x70] sm:$0xff]  ;;  %v7021_v34 = vld [vmem:[%s8632_s9 + $0x68] sm:$0xff] }
 0xe70   :  { %v1165_v50 = vrot.slane %v1164_v47, 1  ;;  %v1172_v44 = vrot.slane %v1171_v55, 1 }
 0xe72   :  { %v1166_v46 = vadd.f32 %v1165_v50, %v1164_v47  ;;  %v1173_v51 = vadd.f32 %v1172_v44, %v1171_v55  ;;  %v7028_v55 = vld [vmem:[%s8632_s9 + $0x60] sm:$0xff]  ;;  %v7035_v47 = vld [vmem:[%s8632_s9 + $0x58] sm:$0xff]  ;;  %v7042_v50 = vld [vmem:[%s8632_s9 + $0x50] sm:$0xff] }
 0xe73   :  { %v7049_v44 = vld [vmem:[%s8632_s9 + $0x48] sm:$0xff] }
 0xe74   :  { %v1184_v56 = vsel %vm680_vm13, %v1173_v51, %v1166_v46  ;;  %v7058_v46 = vld [vmem:[%s8632_s9 + $0x40] sm:$0xff]  ;;  %v7065_v51 = vld [vmem:[%s8632_s9 + $0x38] sm:$0xff] }
 0xe75   :  { %1185 = vrot.lane.b32.xlu0 %v1184_v56, %s6263_s29  ;;  %v7071_v56 = vld [vmem:[%s8632_s9 + $0x30] sm:$0xff] }
 0xe79   :  { %949 = vrot.lane.b32.xlu0 %v6780_v30, %s6265_s16 }
 0xe7d   :  { %792 = vrot.lane.b32.xlu0 %v783_v52, %s6263_s29  ;;  %v7077_v52 = vld [vmem:[%s8632_s9 + $0x28] sm:$0xff] }
 0xee7   :  { %v6910_v45 = vpop.permute.xlu0 %1185 }
 0xee8   :  { %8647 = vst [vmem:[#allocation30_spill] sm:$0xff] %v6910_v45  ;;  %1188 = vst.msk [vmem:[#allocation4] sm:$0x3] %vm685_vm14, %v6910_v45 }
 0xee9   :  { %1331 = vst.msk [vmem:[#allocation4] sm:$0x3] %vm131_vm5, %v1330_v53  ;;  %v7084_v53 = vld [vmem:[%s8632_s9 + $0x20] sm:$0xff] }
 0xeeb   :  { %v950_v57 = vpop.permute.xlu0 %949 }
 0xeec   :  { %952 = vst.msk [vmem:[#allocation5] sm:$0x3] %vm131_vm5, %v950_v57  ;;  %v7091_v57 = vld [vmem:[%s8632_s9 + $0x18] sm:$0xff] }
 0xeef   :  { %v793_v8 = vpop.permute.xlu0 %792 }
 0xef0   :  { %v1332_v59 = vld [vmem:[#allocation4] sm:$0x3] }
 0xef1   :  { %5245 = vmatmul.mubr.msk.f32.vlgmr.msra.gmra.mxu0 %vm332_vm7, %v1332_v59  ;;  %v7098_v59 = vld [vmem:[%s8632_s9 + $0x10] sm:$0xff] }
 0xef2   :  { %5323 = vmatprep.mubr.msk.f32.mxu0 %vm6261_vm6, %v8638_v9 }
 0xef3   :  { %v1422_v30 = vld [vmem:[#allocation5] sm:$0x3] }
 0xef4   :  { %1431 = vrot.lane.b32.xlu0 %v1422_v30, %s6263_s29  ;;  %v7105_v30 = vld [vmem:[%s8632_s9 + $0x8] sm:$0xff] }
 0xf66   :  { %v1432_v27 = vpop.permute.xlu0 %1431 }
 0xfb1   :  { %v1418_v63 = vpop.f32.mrf.mxu0 }
 0xfb2   :  { %5935 = vtanh.f32 %v1418_v63  ;;  %v4505_v5 = vmul.f32 -1.442695, %v1418_v63  ;;  %v1472_v63 = vld [vmem:[%s8625_s2] sm:$0x3] }
 0xfb3   :  { %v5246_v0 = vpop.f32.mrf.mxu0  ;;  %5937 = vrcp.f32 %v787_v62 }
 0xfb4   :  { %5939 = vpow2.f32 %v4505_v5 }
 0xfbf   :  { %v5936_v1 = vpop.eup %5935 }
 0xfc0   :  { %1436 = vrot.lane.b32.xlu1 %v5936_v1, %s6262_s5  ;;  %v5938_v3 = vpop.eup %5937 }
 0xfc1   :  { %v800_v4 = vmul.f32 %v5938_v3, %v798_v2  ;;  %v5940_v6 = vpop.eup %5939  ;;  %v795_v13 = vmul.f32 %v5938_v3, %v793_v8 }
 0xfc2   :  { %v1426_v7 = vadd.f32 1.0, %v5940_v6 }
 0xfc4   :  { %802 = vrot.lane.b32.xlu1 %v800_v4, %s6263_s29  ;;  %5941 = vrcp.f32 %v1426_v7  ;;  %v1563_v4 = vld [vmem:[%s8626_s3] sm:$0x3] }
 0xfd1   :  { %v5942_v35 = vpop.eup %5941 }
 0xfd2   :  { %v1434_v28 = vmul.f32 %v5942_v35, %v1432_v27 }
0x1032   :  { %v1437_v11 = vpop.permute.xlu1 %1436 }
0x1033   :  { %v1439_v43 = vmul.f32 %v5942_v35, %v1437_v11 }
0x1035   :  { %1441 = vrot.lane.b32.xlu1 %v1439_v43, %s6263_s29 }
0x1036   :  { %v803_v14 = vpop.permute.xlu1 %802 }
0x1037   :  { %v6924_v22 = vadd.f32 %v803_v14, %v795_v13 }
0x1039   :  { %5943 = vtanh.f32 %v6924_v22 }
0x1046   :  { %v5944_v10 = vpop.eup %5943 }
0x1047   :  { %808 = vrot.lane.b32.xlu0 %v5944_v10, %s6262_s5 }
0x10a7   :  { %v1442_v29 = vpop.permute.xlu1 %1441 }
0x10a8   :  { %v6954_v31 = vadd.f32 %v1442_v29, %v1434_v28 }
0x10aa   :  { %5945 = vtanh.f32 %v6954_v31 }
0x10b7   :  { %v5946_v32 = vpop.eup %5945 }
0x10b8   :  { %1447 = vrot.lane.b32.xlu1 %v5946_v32, %s6262_s5  ;;  %v1848_v32 = vld [vmem:[%s8629_s6 + $0x60] sm:$0x1] }
0x10b9   :  { %v809_v36 = vpop.permute.xlu0 %808 }
0x10ba   :  { %v6958_v37 = vmul.f32 %v5938_v3, %v809_v36  ;;  %v7148_v36 = vld [vmem:[%s8629_s6 + $0x58] sm:$0xff] }
0x10bc   :  { %818 = vrot.lane.b32.xlu0 %v6958_v37, %s6265_s16  ;;  %1191 = vrot.lane.b32.xlu1 %v6804_v48, %s6263_s29 }
0x10c0   :  { %1177 = vrot.lane.b32.xlu0 %v6858_v58, %s6254_s14  ;;  %v6975_v58 = vld [vmem:[#allocation17 + $0x28] sm:$0xff] }
0x112a   :  { %v1448_v38 = vpop.permute.xlu1 %1447 }
0x112b   :  { %v6966_v39 = vmul.f32 %v5942_v35, %v1448_v38  ;;  %v7157_v38 = vld [vmem:[%s8629_s6 + $0x50] sm:$0xff] }
0x112d   :  { %1461 = vrot.lane.b32.xlu1 %v6966_v39, %s6264_s15 }
0x112e   :  { %v819_v40 = vpop.permute.xlu0 %818  ;;  %v1192_v49 = vpop.permute.xlu1 %1191 }
0x112f   :  { %821 = vst.msk [vmem:[#allocation6] sm:$0x3] %vm448_vm12, %v819_v40  ;;  %v7164_v40 = vld [vmem:[%s8629_s6 + $0x48] sm:$0xff] }
0x1130   :  { %1194 = vst.msk [vmem:[#allocation6] sm:$0x3] %vm131_vm5, %v1192_v49  ;;  %v7180_v49 = vld [vmem:[%s8629_s6 + $0x38] sm:$0xff] }
0x1131   :  { %1195 = vst.msk [vmem:[#allocation6] sm:$0x3] %vm685_vm14, %v6910_v45 }
0x1132   :  { %v1178_v48 = vpop.permute.xlu0 %1177 }
0x1133   :  { %v1180_v15 = vadd.f32 %v1178_v48, %v1175_v12  ;;  %v7194_v12 = vld [vmem:[%s8629_s6 + $0x28] sm:$0xff] }
0x1134   :  { %v7200_v48 = vld [vmem:[#allocation12 + $0x8] sm:$0xff] }
0x1135   :  { %1181 = vst.msk [vmem:[#allocation8] sm:$0x3] %vm676_vm15, %v1180_v15  ;;  %v7202_v15 = vld [vmem:[#allocation12] sm:$0xff] }
0x1138   :  { %v1196_v16 = vld [vmem:[#allocation6] sm:$0x3] }
0x1139   :  { %5216 = vmatmul.mubr.msk.f32.vlgmr.msra.gmra.mxu1 %vm332_vm7, %v1196_v16 }
0x113a   :  { %5248 = vmatpush3.msra.mxu1 %v6975_v58  ;;  %5259 = vmatprep.mubr.msk.f32.mxu1 %vm6261_vm6, %v8638_v9 }
0x113b   :  { %5249 = vmatprep.subr.mxu1 %v8638_v9 }
0x113c   :  { %5250 = vmatpush3.msra.mxu1 %v6978_v17 }
0x113d   :  { %5251 = vmatprep.subr.mxu1 %v8638_v9 }
0x113e   :  { %5252 = vmatpush3.msra.mxu1 %v6984_v18 }
0x113f   :  { %5253 = vmatprep.subr.mxu1 %v8638_v9 }
0x1140   :  { %5254 = vmatpush3.msra.mxu1 %v6988_v19 }
0x1141   :  { %5255 = vmatprep.subr.mxu1 %v8638_v9 }
0x1142   :  { %5256 = vmatpush3.msra.mxu1 %v6992_v20 }
0x1143   :  { %5257 = vmatprep.subr.mxu1 %v8638_v9 }
0x1144   :  { %5258 = vmatpush3.msra.mxu1 %v6996_v21 }
0x1145   :  { %5262 = vmatprep.subr.mxu1 %v8638_v9 }
0x119f   :  { %v1462_v23 = vpop.permute.xlu1 %1461 }
0x11a0   :  { %1464 = vst.msk [vmem:[#allocation8] sm:$0x3] %vm453_vm9, %v1462_v23 }
0x11a7   :  { %v1465_v25 = vld [vmem:[#allocation8] sm:$0x3] }
0x11a8   :  { %5260 = vmatmul.mubr.msk.f32.vlgmr.msra.gmra.mxu1 %vm463_vm10, %v1465_v25 }
0x11a9   :  { %5263 = vmatpush3.msra.mxu1 %v7006_v24  ;;  %5294 = vmatprep.mubr.msk.f32.mxu1 %vm6261_vm6, %v8638_v9 }
0x11aa   :  { %5264 = vmatprep.subr.mxu1 %v8638_v9 }
0x11ab   :  { %5265 = vmatpush3.msra.mxu1 %v7012_v26 }
0x11ac   :  { %5266 = vmatprep.subr.mxu1 %v8638_v9 }
0x11ad   :  { %5267 = vmatpush3.msra.mxu1 %v7021_v34 }
0x11ae   :  { %5268 = vmatprep.subr.mxu1 %v8638_v9 }
0x11af   :  { %5269 = vmatpush3.msra.mxu1 %v7028_v55 }
0x11b0   :  { %5270 = vmatprep.subr.mxu1 %v8638_v9 }
0x11b1   :  { %5271 = vmatpush3.msra.mxu1 %v7035_v47 }
0x11b2   :  { %5272 = vmatprep.subr.mxu1 %v8638_v9 }
0x11b3   :  { %5273 = vmatpush3.msra.mxu1 %v7042_v50 }
0x11b4   :  { %5274 = vmatprep.subr.mxu1 %v8638_v9 }
0x11b5   :  { %5275 = vmatpush3.msra.mxu1 %v7049_v44 }
0x11b6   :  { %5276 = vmatprep.subr.mxu1 %v8638_v9 }
0x11b7   :  { %5277 = vmatpush3.msra.mxu1 %v7058_v46 }
0x11b8   :  { %5278 = vmatprep.subr.mxu1 %v8638_v9 }
0x11b9   :  { %5279 = vmatpush3.msra.mxu1 %v7065_v51 }
0x11ba   :  { %5280 = vmatprep.subr.mxu1 %v8638_v9 }
0x11bb   :  { %5281 = vmatpush3.msra.mxu1 %v7071_v56 }
0x11bc   :  { %5282 = vmatprep.subr.mxu1 %v8638_v9 }
0x11bd   :  { %5283 = vmatpush3.msra.mxu1 %v7077_v52 }
0x11be   :  { %5284 = vmatprep.subr.mxu1 %v8638_v9 }
0x11bf   :  { %5285 = vmatpush3.msra.mxu1 %v7084_v53 }
0x11c0   :  { %5286 = vmatprep.subr.mxu1 %v8638_v9 }
0x11c1   :  { %5287 = vmatpush3.msra.mxu1 %v7091_v57 }
0x11c2   :  { %5288 = vmatprep.subr.mxu1 %v8638_v9 }
0x11c3   :  { %5289 = vmatpush3.msra.mxu1 %v7098_v59 }
0x11c4   :  { %5290 = vmatprep.subr.mxu1 %v8638_v9 }
0x11c5   :  { %5291 = vmatpush3.msra.mxu1 %v7105_v30 }
0x11c6   :  { %5292 = vmatprep.subr.mxu1 %v8638_v9 }
0x11c7   :  { %5293 = vmatpush3.msra.mxu1 %v7112_v60 }
0x11c8   :  { %5326 = vmatprep.subr.mxu1 %v8638_v9 }
0x11f9   :  { %v7116_v61 = vpop.f32.mrf.mxu1 }
0x11fb   :  { %v5217_v62 = vpop.f32.mrf.mxu1 }
0x1268   :  { %v1542_v0 = vpop.f32.mrf.mxu1 }
0x1269   :  { %v1543_v1 = vadd.f32 %v1542_v0, %v1472_v63 }
0x126a   :  { %v5261_v2 = vpop.f32.mrf.mxu1 }
0x126b   :  { %5947 = vtanh.f32 %v1543_v1 }
0x1278   :  { %v5948_v3 = vpop.eup %5947 }
0x1279   :  { %5295 = vmatmul.mubr.f32.vlgmr.msra.gmra.mxu1 %v5948_v3 }
0x127a   :  { %5352 = vmatprep.mubr.msk.f32.mxu1 %vm6261_vm6, %v8638_v9  ;;  %5327 = vmatpush3.msk.msra.mxu1 %vm336_vm1, %v1848_v32 }
0x127b   :  { %5328 = vmatprep.subr.mxu1 %v8638_v9 }
0x127c   :  { %5329 = vmatpush3.msra.mxu1 %v7148_v36 }
0x127d   :  { %5330 = vmatprep.subr.mxu1 %v8638_v9 }
0x127e   :  { %5331 = vmatpush3.msra.mxu1 %v7157_v38 }
0x127f   :  { %5332 = vmatprep.subr.mxu1 %v8638_v9 }
0x1280   :  { %5333 = vmatpush3.msra.mxu1 %v7164_v40 }
0x1281   :  { %5334 = vmatprep.subr.mxu1 %v8638_v9 }
0x1339   :  { %v1630_v5 = vpop.f32.mrf.mxu1 }
0x133a   :  { %v1631_v6 = vadd.f32 %v1630_v5, %v1563_v4  ;;  %v7211_v4 = vld [vmem:[%s8629_s6 + $0x20] sm:$0xff]  ;;  %v7218_v5 = vld [vmem:[%s8629_s6 + $0x18] sm:$0xff] }
0x133b   :  { %v5296_v7 = vpop.f32.mrf.mxu1 }
0x133c   :  { %v1634_v35 = vsel %vm625_vm11, %v1631_v6, -inf }
0x133d   :  { %1635 = vmax.xlane.f32.xlu0 %v1634_v35 }
0x13c6   :  { %v1636_v8 = vpop.xlane.xlu0 %1635 }
0x13c7   :  { %v1637_v11 = vsub.f32 %v1631_v6, %v1636_v8 }
0x13c9   :  { %v1638_v43 = vmul.f32 1.442695, %v1637_v11 }
0x13cb   :  { %5949 = vpow2.f32 %v1638_v43  ;;  %v7227_v43 = vld [vmem:[%s8629_s6 + $0x10] sm:$0xff] }
0x13d8   :  { %v5950_v13 = vpop.eup %5949 }
0x13d9   :  { %v1640_v14 = vsel %vm625_vm11, %v5950_v13, 0.0 }
0x13da   :  { %1641 = vadd.xlane.f32.xlu1 %v1640_v14 }
0x1463   :  { %v1642_v33 = vpop.xlane.xlu1 %1641 }
0x1464   :  { %5951 = vrcp.f32 %v1642_v33 }
0x1465   :  { %5953 = vtanh.f32 %v7116_v61 }
0x1471   :  { %v5952_v10 = vpop.eup %5951 }
0x1472   :  { %v7130_v27 = vmul.f32 %v5952_v10, %v5950_v13  ;;  %v7232_v13 = vld [vmem:[%s8629_s6 + $0x8] sm:$0xff]  ;;  %v7240_v10 = vld [vmem:[%s8629_s6] sm:$0xff] }
0x1474   :  { %v1655_v28 = vrot.slane %v7130_v27, %v6658_v41  ;;  %1677 = vst.msk [vmem:[#allocation8] sm:$0x3] %vm625_vm11, %v7130_v27  ;;  %1693 = vst.msk [vmem:[#allocation21 + $0x4] sm:$0x3] %vm625_vm11, %v7130_v27  ;;  %v1648_v29 = vrot.slane %v7130_v27, %v6660_v42 }
0x1476   :  { %1657 = vbcast.lane.b32.xlu1 %v1655_v28, 256  ;;  %1650 = vbcast.lane.b32.xlu0 %v1648_v29, 256 }
0x147a   :  { %1457 = vrot.lane.b32.xlu0 %v6966_v39, %s6265_s16 }
0x147e   :  { %813 = vrot.lane.b32.xlu0 %v6924_v22, %s6265_s16  ;;  %v7173_v22 = vld [vmem:[%s8629_s6 + $0x40] sm:$0xff] }
0x147f   :  { %5335 = vmatpush3.msra.mxu1 %v7173_v22 }
0x1480   :  { %5336 = vmatprep.subr.mxu1 %v8638_v9 }
0x1481   :  { %5337 = vmatpush3.msra.mxu1 %v7180_v49 }
0x1482   :  { %1452 = vrot.lane.b32.xlu0 %v6954_v31, %s6265_s16  ;;  %v7187_v31 = vld [vmem:[%s8629_s6 + $0x30] sm:$0xff]  ;;  %5338 = vmatprep.subr.mxu1 %v8638_v9 }
0x1483   :  { %5339 = vmatpush3.msra.mxu1 %v7187_v31 }
0x1484   :  { %5340 = vmatprep.subr.mxu1 %v8638_v9 }
0x1485   :  { %5341 = vmatpush3.msra.mxu1 %v7194_v12 }
0x1486   :  { %5342 = vmatprep.subr.mxu1 %v8638_v9 }
0x1487   :  { %5343 = vmatpush3.msra.mxu1 %v7211_v4 }
0x1488   :  { %5344 = vmatprep.subr.mxu1 %v8638_v9 }
0x1489   :  { %5345 = vmatpush3.msra.mxu1 %v7218_v5 }
0x148a   :  { %5346 = vmatprep.subr.mxu1 %v8638_v9 }
0x148b   :  { %5347 = vmatpush3.msra.mxu1 %v7227_v43 }
0x148c   :  { %5348 = vmatprep.subr.mxu1 %v8638_v9 }
0x148d   :  { %5349 = vmatpush3.msra.mxu1 %v7232_v13 }
0x148e   :  { %5350 = vmatprep.subr.mxu1 %v8638_v9 }
0x148f   :  { %5351 = vmatpush3.msra.mxu1 %v7240_v10 }
0x1490   :  { %5405 = vmatprep.subr.mxu1 %v8638_v9 }
0x14e8   :  { %v1658_v16 = vpop.permute.xlu1 %1657  ;;  %v1651_v23 = vpop.permute.xlu0 %1650 }
0x14e9   :  { %v1662_v25 = vmul.f32 %v7200_v48, %v1658_v16  ;;  %v1661_v62 = vmul.f32 %v7202_v15, %v1651_v23 }
0x14eb   :  { %v1670_v63 = vsel %vm230_vm2, %v1662_v25, 0.0  ;;  %v1663_v0 = vsel %vm230_vm2, %v1661_v62, 0.0 }
0x14ec   :  { %v1671_v1 = vrot.slane %v1670_v63, 4  ;;  %v1664_v2 = vrot.slane %v1663_v0, 4  ;;  %v1458_v3 = vpop.permute.xlu0 %1457 }
0x14ed   :  { %1460 = vst.msk [vmem:[#allocation4] sm:$0x3] %vm448_vm12, %v1458_v3 }
0x14ee   :  { %v1672_v6 = vadd.f32 %v1671_v1, %v1670_v63  ;;  %v1665_v7 = vadd.f32 %v1664_v2, %v1663_v0  ;;  %v5954_v63 = vpop.eup %5953  ;;  %v1833_v2 = vld [vmem:[#allocation2 + $0x6] sm:$0x3] }
0x14f0   :  { %v1673_v35 = vrot.slane %v1672_v6, 2  ;;  %v1666_v8 = vrot.slane %v1665_v7, 2  ;;  %v814_v11 = vpop.permute.xlu0 %813 }
0x14f1   :  { %816 = vst.msk [vmem:[#allocation7] sm:$0x3] %vm131_vm5, %v814_v11 }
0x14f2   :  { %v1674_v14 = vadd.f32 %v1673_v35, %v1672_v6  ;;  %v1667_v33 = vadd.f32 %v1666_v8, %v1665_v7  ;;  %v4502_v6 = vmul.f32 -1.442695, %v7116_v61 }
0x14f4   :  { %v1453_v28 = vpop.permute.xlu0 %1452  ;;  %v1668_v29 = vrot.slane %v1667_v33, 1  ;;  %v1675_v32 = vrot.slane %v1674_v14, 1  ;;  %5955 = vpow2.f32 %v4502_v6  ;;  %v1712_v6 = vld [vmem:[#allocation15 + $0x60] sm:$0x1] }
0x14f5   :  { %1455 = vst.msk [vmem:[#allocation5] sm:$0x3] %vm131_vm5, %v1453_v28  ;;  %5298 = vmatpush3.msk.msra.mxu0 %vm336_vm1, %v1712_v6  ;;  %v7321_v6 = vld [vmem:[#allocation15 + $0x8] sm:$0xff] }
0x14f6   :  { %v1669_v16 = vadd.f32 %v1668_v29, %v1667_v33  ;;  %v1676_v23 = vadd.f32 %v1675_v32, %v1674_v14  ;;  %5299 = vmatprep.subr.mxu0 %v8638_v9 }
0x14f8   :  { %v1687_v25 = vsel %vm680_vm13, %v1676_v23, %v1669_v16  ;;  %v1286_v62 = vld [vmem:[#allocation7] sm:$0x3] }
0x14f9   :  { %1688 = vrot.lane.b32.xlu1 %v1687_v25, %s6263_s29  ;;  %1295 = vrot.lane.b32.xlu0 %v1286_v62, %s6263_s29 }
0x14fc   :  { %v1925_v0 = vld [vmem:[#allocation5] sm:$0x3] }
0x14fd   :  { %1300 = vrot.lane.b32.xlu1 %v5954_v63, %s6262_s5  ;;  %1934 = vrot.lane.b32.xlu0 %v1925_v0, %s6263_s29 }
0x1501   :  { %v5956_v7 = vpop.eup %5955 }
0x1502   :  { %v1290_v35 = vadd.f32 1.0, %v5956_v7  ;;  %v7274_v7 = vld [vmem:[#allocation15 + $0x58] sm:$0xff] }
0x1503   :  { %5300 = vmatpush3.msra.mxu0 %v7274_v7 }
0x1504   :  { %5301 = vmatprep.subr.mxu0 %v8638_v9 }
0x156b   :  { %v7252_v1 = vpop.permute.xlu1 %1688  ;;  %v1296_v25 = vpop.permute.xlu0 %1295 }
0x156c   :  { %8648 = vst [vmem:[#allocation31_spill] sm:$0xff] %v7252_v1  ;;  %1691 = vst.msk [vmem:[#allocation4] sm:$0x3] %vm685_vm14, %v7252_v1 }
0x156d   :  { %1834 = vst.msk [vmem:[#allocation4] sm:$0x3] %vm131_vm5, %v1833_v2 }
0x156f   :  { %v1301_v33 = vpop.permute.xlu1 %1300 }
0x1574   :  { %v1835_v3 = vld [vmem:[#allocation4] sm:$0x3] }
0x1575   :  { %5353 = vmatmul.mubr.msk.f32.vlgmr.msra.gmra.mxu1 %vm332_vm7, %v1835_v3 }
0x1576   :  { %5431 = vmatprep.mubr.msk.f32.mxu1 %vm6261_vm6, %v8638_v9 }
0x1635   :  { %v1921_v8 = vpop.f32.mrf.mxu1 }
0x1636   :  { %5957 = vtanh.f32 %v1921_v8  ;;  %v4512_v32 = vmul.f32 -1.442695, %v1921_v8  ;;  %v7282_v8 = vld [vmem:[#allocation15 + $0x48] sm:$0xff] }
0x1637   :  { %v5354_v11 = vpop.f32.mrf.mxu1  ;;  %5959 = vrcp.f32 %v1290_v35  ;;  %v7278_v35 = vld [vmem:[#allocation15 + $0x50] sm:$0xff] }
0x1638   :  { %5961 = vpow2.f32 %v4512_v32  ;;  %5302 = vmatpush3.msra.mxu0 %v7278_v35 }
0x1639   :  { %5303 = vmatprep.subr.mxu0 %v8638_v9 }
0x163a   :  { %5304 = vmatpush3.msra.mxu0 %v7282_v8 }
0x163b   :  { %5305 = vmatprep.subr.mxu0 %v8638_v9 }
0x1643   :  { %v5958_v14 = vpop.eup %5957 }
0x1644   :  { %1939 = vrot.lane.b32.xlu1 %v5958_v14, %s6262_s5  ;;  %v7262_v28 = vpop.eup %5959  ;;  %v7286_v14 = vld [vmem:[#allocation15 + $0x40] sm:$0xff] }
0x1645   :  { %v1303_v29 = vmul.f32 %v7262_v28, %v1301_v33  ;;  %v5962_v61 = vpop.eup %5961  ;;  %v1298_v0 = vmul.f32 %v7262_v28, %v1296_v25  ;;  %v7291_v33 = vld [vmem:[#allocation15 + $0x38] sm:$0xff]  ;;  %5306 = vmatpush3.msra.mxu0 %v7286_v14  ;;  %v7301_v25 = vld [vmem:[#allocation15 + $0x30] sm:$0xff] }
0x1646   :  { %v1929_v16 = vadd.f32 1.0, %v5962_v61  ;;  %5307 = vmatprep.subr.mxu0 %v8638_v9 }
0x1647   :  { %5308 = vmatpush3.msra.mxu0 %v7291_v33 }
0x1648   :  { %1305 = vrot.lane.b32.xlu1 %v1303_v29, %s6263_s29  ;;  %5963 = vrcp.f32 %v1929_v16  ;;  %5309 = vmatprep.subr.mxu0 %v8638_v9  ;;  %v1935_v29 = vpop.permute.xlu0 %1934 }
0x1649   :  { %5310 = vmatpush3.msra.mxu0 %v7301_v25 }
0x164a   :  { %5311 = vmatprep.subr.mxu0 %v8638_v9 }
0x1655   :  { %v7266_v23 = vpop.eup %5963 }
0x1656   :  { %v1937_v32 = vmul.f32 %v7266_v23, %v1935_v29  ;;  %v7326_v29 = vld [vmem:[#allocation15] sm:$0xff] }
0x16b6   :  { %v1940_v62 = vpop.permute.xlu1 %1939 }
0x16b7   :  { %v1942_v63 = vmul.f32 %v7266_v23, %v1940_v62  ;;  %v7305_v62 = vld [vmem:[#allocation15 + $0x28] sm:$0xff] }
0x16b8   :  { %5312 = vmatpush3.msra.mxu0 %v7305_v62 }
0x16b9   :  { %1944 = vrot.lane.b32.xlu1 %v1942_v63, %s6263_s29  ;;  %5313 = vmatprep.subr.mxu0 %v8638_v9  ;;  %v7309_v63 = vld [vmem:[#allocation15 + $0x20] sm:$0xff] }
0x16ba   :  { %v1306_v2 = vpop.permute.xlu1 %1305  ;;  %5314 = vmatpush3.msra.mxu0 %v7309_v63 }
0x16bb   :  { %v7271_v3 = vadd.f32 %v1306_v2, %v1298_v0  ;;  %5315 = vmatprep.subr.mxu0 %v8638_v9  ;;  %v7313_v0 = vld [vmem:[#allocation15 + $0x18] sm:$0xff]  ;;  %v7317_v2 = vld [vmem:[#allocation15 + $0x10] sm:$0xff] }
0x16bc   :  { %5316 = vmatpush3.msra.mxu0 %v7313_v0 }
0x16bd   :  { %5965 = vtanh.f32 %v7271_v3  ;;  %5317 = vmatprep.subr.mxu0 %v8638_v9 }
0x16be   :  { %5318 = vmatpush3.msra.mxu0 %v7317_v2 }
0x16bf   :  { %5319 = vmatprep.subr.mxu0 %v8638_v9 }
0x16c0   :  { %5320 = vmatpush3.msra.mxu0 %v7321_v6 }
0x16c1   :  { %5321 = vmatprep.subr.mxu0 %v8638_v9 }
0x16c2   :  { %5322 = vmatpush3.msra.mxu0 %v7326_v29 }
0x16c3   :  { %5355 = vmatprep.subr.mxu0 %v8638_v9 }
0x16ca   :  { %v5966_v11 = vpop.eup %5965 }
0x16cb   :  { %1311 = vrot.lane.b32.xlu0 %v5966_v11, %s6262_s5 }
0x172b   :  { %v1945_v61 = vpop.permute.xlu1 %1944 }
0x172c   :  { %v7298_v16 = vadd.f32 %v1945_v61, %v1937_v32 }
0x172e   :  { %5967 = vtanh.f32 %v7298_v16 }
0x173b   :  { %v5968_v11 = vpop.eup %5967 }
0x173c   :  { %1950 = vrot.lane.b32.xlu1 %v5968_v11, %s6262_s5 }
0x173d   :  { %v1312_v32 = vpop.permute.xlu0 %1311 }
0x173e   :  { %v7330_v61 = vmul.f32 %v7262_v28, %v1312_v32 }
0x1740   :  { %8649 = vst [vmem:[#allocation32_spill] sm:$0xff] %v7330_v61  ;;  %1321 = vrot.lane.b32.xlu0 %v7330_v61, %s6265_s16  ;;  %1694 = vrot.lane.b32.xlu1 %v6966_v39, %s6263_s29  ;;  %v1678_v39 = vld [vmem:[#allocation8] sm:$0x3] }
0x1744   :  { %1680 = vrot.lane.b32.xlu0 %v7130_v27, %s6254_s14 }
0x17ae   :  { %v1951_v11 = vpop.permute.xlu1 %1950 }
0x17af   :  { %v7340_v45 = vmul.f32 %v7266_v23, %v1951_v11  ;;  %v8650_v23 = vmov 0.0   ;;  %v2351_v11 = vld [vmem:[%s8629_s6 + $0x60] sm:$0x1] }
0x17b1   :  { %1964 = vrot.lane.b32.xlu1 %v7340_v45, %s6264_s15 }
0x17b2   :  { %v1322_v28 = vpop.permute.xlu0 %1321  ;;  %v1695_v32 = vpop.permute.xlu1 %1694 }
0x17b3   :  { %1324 = vst.msk [vmem:[#allocation6] sm:$0x3] %vm448_vm12, %v1322_v28 }
0x17b4   :  { %1697 = vst.msk [vmem:[#allocation6] sm:$0x3] %vm131_vm5, %v1695_v32 }
0x17b5   :  { %1698 = vst.msk [vmem:[#allocation6] sm:$0x3] %vm685_vm14, %v7252_v1 }
0x17b6   :  { %v1681_v9 = vpop.permute.xlu0 %1680 }
0x17b7   :  { %v1683_v61 = vadd.f32 %v1681_v9, %v1678_v39 }
0x17b9   :  { %1684 = vst.msk [vmem:[#allocation8] sm:$0x3] %vm676_vm15, %v1683_v61 }
0x17bc   :  { %v1699_v27 = vld [vmem:[#allocation6] sm:$0x3] }
0x17bd   :  { %5324 = vmatmul.mubr.msk.f32.vlgmr.msra.gmra.mxu0 %vm332_vm7, %v1699_v27 }
0x17be   :  { %5356 = vmatpush3.msra.mxu0 %v6975_v58  ;;  %5367 = vmatprep.mubr.msk.f32.mxu0 %vm6261_vm6, %v8650_v23 }
0x17bf   :  { %5357 = vmatprep.subr.mxu0 %v8650_v23 }
0x17c0   :  { %5358 = vmatpush3.msra.mxu0 %v6978_v17 }
0x17c1   :  { %5359 = vmatprep.subr.mxu0 %v8650_v23 }
0x17c2   :  { %5360 = vmatpush3.msra.mxu0 %v6984_v18 }
0x17c3   :  { %5361 = vmatprep.subr.mxu0 %v8650_v23 }
0x17c4   :  { %5362 = vmatpush3.msra.mxu0 %v6988_v19  ;;  %v1975_v19 = vld [vmem:[%s8625_s2] sm:$0x3] }
0x17c5   :  { %5363 = vmatprep.subr.mxu0 %v8650_v23 }
0x17c6   :  { %5364 = vmatpush3.msra.mxu0 %v6992_v20 }
0x17c7   :  { %5365 = vmatprep.subr.mxu0 %v8650_v23 }
0x17c8   :  { %5366 = vmatpush3.msra.mxu0 %v6996_v21 }
0x17c9   :  { %5370 = vmatprep.subr.mxu0 %v8650_v23 }
0x1823   :  { %v1965_v9 = vpop.permute.xlu1 %1964 }
0x1824   :  { %1967 = vst.msk [vmem:[#allocation8] sm:$0x3] %vm453_vm9, %v1965_v9 }
0x182b   :  { %v1968_v58 = vld [vmem:[#allocation8] sm:$0x3] }
0x182c   :  { %5368 = vmatmul.mubr.msk.f32.vlgmr.msra.gmra.mxu0 %vm463_vm10, %v1968_v58 }
0x182d   :  { %5371 = vmatpush3.msra.mxu0 %v7006_v24  ;;  %5402 = vmatprep.mubr.msk.f32.mxu0 %vm6261_vm6, %v8650_v23 }
0x182e   :  { %5372 = vmatprep.subr.mxu0 %v8650_v23 }
0x182f   :  { %5373 = vmatpush3.msra.mxu0 %v7012_v26 }
0x1830   :  { %5374 = vmatprep.subr.mxu0 %v8650_v23 }
0x1831   :  { %5375 = vmatpush3.msra.mxu0 %v7021_v34  ;;  %v2066_v34 = vld [vmem:[%s8626_s3] sm:$0x3] }
0x1832   :  { %5376 = vmatprep.subr.mxu0 %v8650_v23 }
0x1833   :  { %5377 = vmatpush3.msra.mxu0 %v7028_v55 }
0x1834   :  { %5378 = vmatprep.subr.mxu0 %v8650_v23 }
0x1835   :  { %5379 = vmatpush3.msra.mxu0 %v7035_v47 }
0x1836   :  { %5380 = vmatprep.subr.mxu0 %v8650_v23 }
0x1837   :  { %5381 = vmatpush3.msra.mxu0 %v7042_v50 }
0x1838   :  { %5382 = vmatprep.subr.mxu0 %v8650_v23 }
0x1839   :  { %5383 = vmatpush3.msra.mxu0 %v7049_v44 }
0x183a   :  { %5384 = vmatprep.subr.mxu0 %v8650_v23 }
0x183b   :  { %5385 = vmatpush3.msra.mxu0 %v7058_v46 }
0x183c   :  { %5386 = vmatprep.subr.mxu0 %v8650_v23 }
0x183d   :  { %5387 = vmatpush3.msra.mxu0 %v7065_v51 }
0x183e   :  { %5388 = vmatprep.subr.mxu0 %v8650_v23 }
0x183f   :  { %5389 = vmatpush3.msra.mxu0 %v7071_v56 }
0x1840   :  { %5390 = vmatprep.subr.mxu0 %v8650_v23 }
0x1841   :  { %5391 = vmatpush3.msra.mxu0 %v7077_v52 }
0x1842   :  { %5392 = vmatprep.subr.mxu0 %v8650_v23 }
0x1843   :  { %5393 = vmatpush3.msra.mxu0 %v7084_v53 }
0x1844   :  { %5394 = vmatprep.subr.mxu0 %v8650_v23 }
0x1845   :  { %5395 = vmatpush3.msra.mxu0 %v7091_v57 }
0x1846   :  { %5396 = vmatprep.subr.mxu0 %v8650_v23 }
0x1847   :  { %5397 = vmatpush3.msra.mxu0 %v7098_v59 }
0x1848   :  { %5398 = vmatprep.subr.mxu0 %v8650_v23 }
0x1849   :  { %5399 = vmatpush3.msra.mxu0 %v7105_v30 }
0x184a   :  { %5400 = vmatprep.subr.mxu0 %v8650_v23 }
0x184b   :  { %5401 = vmatpush3.msra.mxu0 %v7112_v60 }
0x184c   :  { %5434 = vmatprep.subr.mxu0 %v8650_v23 }
0x187d   :  { %v7400_v17 = vpop.f32.mrf.mxu0 }
0x187f   :  { %v5325_v18 = vpop.f32.mrf.mxu0 }
0x18ec   :  { %v2045_v20 = vpop.f32.mrf.mxu0 }
0x18ed   :  { %v2046_v21 = vadd.f32 %v2045_v20, %v1975_v19 }
0x18ee   :  { %v5369_v24 = vpop.f32.mrf.mxu0 }
0x18ef   :  { %5969 = vtanh.f32 %v2046_v21  ;;  %v2336_v24 = vld [vmem:[#allocation2 + $0x8] sm:$0x3] }
0x18fc   :  { %v5970_v26 = vpop.eup %5969 }
0x18fd   :  { %5403 = vmatmul.mubr.f32.vlgmr.msra.gmra.mxu0 %v5970_v26 }
0x18fe   :  { %5460 = vmatprep.mubr.msk.f32.mxu0 %vm6261_vm6, %v8650_v23  ;;  %5435 = vmatpush3.msk.msra.mxu0 %vm336_vm1, %v2351_v11 }
0x18ff   :  { %5436 = vmatprep.subr.mxu0 %v8650_v23 }
0x1900   :  { %5437 = vmatpush3.msra.mxu0 %v7148_v36 }
0x1901   :  { %5438 = vmatprep.subr.mxu0 %v8650_v23 }
0x1902   :  { %5439 = vmatpush3.msra.mxu0 %v7157_v38 }
0x1903   :  { %5440 = vmatprep.subr.mxu0 %v8650_v23 }
0x1904   :  { %5441 = vmatpush3.msra.mxu0 %v7164_v40 }
0x1905   :  { %5442 = vmatprep.subr.mxu0 %v8650_v23 }
0x1906   :  { %5443 = vmatpush3.msra.mxu0 %v7173_v22 }
0x1907   :  { %5444 = vmatprep.subr.mxu0 %v8650_v23 }
0x1908   :  { %5445 = vmatpush3.msra.mxu0 %v7180_v49 }
0x1909   :  { %5446 = vmatprep.subr.mxu0 %v8650_v23 }
0x190a   :  { %5447 = vmatpush3.msra.mxu0 %v7187_v31 }
0x190b   :  { %5448 = vmatprep.subr.mxu0 %v8650_v23 }
0x190c   :  { %5449 = vmatpush3.msra.mxu0 %v7194_v12 }
0x190d   :  { %5450 = vmatprep.subr.mxu0 %v8650_v23 }
0x190e   :  { %5451 = vmatpush3.msra.mxu0 %v7211_v4 }
0x190f   :  { %5452 = vmatprep.subr.mxu0 %v8650_v23 }
0x1910   :  { %5453 = vmatpush3.msra.mxu0 %v7218_v5 }
0x1911   :  { %5454 = vmatprep.subr.mxu0 %v8650_v23 }
0x1912   :  { %5455 = vmatpush3.msra.mxu0 %v7227_v43 }
0x1913   :  { %5456 = vmatprep.subr.mxu0 %v8650_v23 }
0x1914   :  { %5457 = vmatpush3.msra.mxu0 %v7232_v13 }
0x1915   :  { %5458 = vmatprep.subr.mxu0 %v8650_v23 }
0x1916   :  { %5459 = vmatpush3.msra.mxu0 %v7240_v10 }
0x1917   :  { %5513 = vmatprep.subr.mxu0 %v8650_v23 }
0x19bd   :  { %v2133_v55 = vpop.f32.mrf.mxu0 }
0x19be   :  { %v2134_v47 = vadd.f32 %v2133_v55, %v2066_v34  ;;  %v4509_v34 = vmul.f32 -1.442695, %v7400_v17 }
0x19bf   :  { %v5404_v50 = vpop.f32.mrf.mxu0 }
0x19c0   :  { %v2137_v44 = vsel %vm625_vm11, %v2134_v47, -inf }
0x19c1   :  { %2138 = vmax.xlane.f32.xlu0 %v2137_v44 }
0x1a4a   :  { %v2139_v46 = vpop.xlane.xlu0 %2138 }
0x1a4b   :  { %v2140_v51 = vsub.f32 %v2134_v47, %v2139_v46 }
0x1a4d   :  { %v2141_v56 = vmul.f32 1.442695, %v2140_v51 }
0x1a4f   :  { %5971 = vpow2.f32 %v2141_v56 }
0x1a5c   :  { %v5972_v52 = vpop.eup %5971 }
0x1a5d   :  { %v2143_v53 = vsel %vm625_vm11, %v5972_v52, 0.0 }
0x1a5e   :  { %2144 = vadd.xlane.f32.xlu1 %v2143_v53 }
0x1ae7   :  { %v2145_v57 = vpop.xlane.xlu1 %2144 }
0x1ae8   :  { %5973 = vrcp.f32 %v2145_v57 }
0x1ae9   :  { %5975 = vtanh.f32 %v7400_v17 }
0x1aea   :  { %5977 = vpow2.f32 %v4509_v34  ;;  %v7656_v34 = vld [vmem:[%s8632_s9 + $0x10] sm:$0xff] }
0x1af5   :  { %v5974_v59 = vpop.eup %5973 }
0x1af6   :  { %v7412_v30 = vmul.f32 %v5974_v59, %v5972_v52  ;;  %v5976_v19 = vpop.eup %5975 }
0x1af7   :  { %v5978_v55 = vpop.eup %5977 }
0x1af8   :  { %v2158_v60 = vrot.slane %v7412_v30, %v6658_v41  ;;  %2180 = vst.msk [vmem:[#allocation8] sm:$0x3] %vm625_vm11, %v7412_v30  ;;  %2196 = vst.msk [vmem:[#allocation21 + $0x6] sm:$0x3] %vm625_vm11, %v7412_v30  ;;  %v2151_v61 = vrot.slane %v7412_v30, %v6660_v42  ;;  %v1793_v47 = vadd.f32 1.0, %v5978_v55  ;;  %v7663_v55 = vld [vmem:[%s8632_s9 + $0x8] sm:$0xff] }
0x1afa   :  { %2160 = vbcast.lane.b32.xlu1 %v2158_v60, 256  ;;  %2153 = vbcast.lane.b32.xlu0 %v2151_v61, 256 }
0x1afe   :  { %1960 = vrot.lane.b32.xlu0 %v7340_v45, %s6265_s16 }
0x1b02   :  { %1316 = vrot.lane.b32.xlu0 %v7271_v3, %s6265_s16 }
0x1b06   :  { %1955 = vrot.lane.b32.xlu0 %v7298_v16, %s6265_s16 }
0x1b6c   :  { %v2161_v36 = vpop.permute.xlu1 %2160  ;;  %v2154_v38 = vpop.permute.xlu0 %2153 }
0x1b6d   :  { %v2165_v40 = vmul.f32 %v2161_v36, %v7200_v48  ;;  %v2164_v22 = vmul.f32 %v2154_v38, %v7202_v15 }
0x1b6f   :  { %v2173_v49 = vsel %vm230_vm2, %v2165_v40, 0.0  ;;  %v2166_v31 = vsel %vm230_vm2, %v2164_v22, 0.0  ;;  %v2215_v22 = vld [vmem:[#allocation15 + $0x60] sm:$0x1] }
0x1b70   :  { %v2174_v12 = vrot.slane %v2173_v49, 4  ;;  %v2167_v4 = vrot.slane %v2166_v31, 4  ;;  %v1961_v5 = vpop.permute.xlu0 %1960  ;;  %5406 = vmatpush3.msk.msra.mxu1 %vm336_vm1, %v2215_v22 }
0x1b71   :  { %1963 = vst.msk [vmem:[#allocation4] sm:$0x3] %vm448_vm12, %v1961_v5  ;;  %5407 = vmatprep.subr.mxu1 %v8650_v23  ;;  %v7542_v5 = vld [vmem:[#allocation17 + $0x18] sm:$0xff] }
0x1b72   :  { %v2175_v43 = vadd.f32 %v2174_v12, %v2173_v49  ;;  %v2168_v13 = vadd.f32 %v2167_v4, %v2166_v31  ;;  %5408 = vmatpush3.msra.mxu1 %v7274_v7  ;;  %v7536_v4 = vld [vmem:[#allocation17 + $0x20] sm:$0xff] }
0x1b73   :  { %5409 = vmatprep.subr.mxu1 %v8650_v23 }
0x1b74   :  { %v2176_v10 = vrot.slane %v2175_v43, 2  ;;  %v2169_v3 = vrot.slane %v2168_v13, 2  ;;  %v1317_v16 = vpop.permute.xlu0 %1316  ;;  %5410 = vmatpush3.msra.mxu1 %v7278_v35 }
0x1b75   :  { %1319 = vst.msk [vmem:[#allocation7] sm:$0x3] %vm131_vm5, %v1317_v16  ;;  %5411 = vmatprep.subr.mxu1 %v8650_v23  ;;  %v7564_v16 = vld [vmem:[%s8632_s9 + $0x78] sm:$0xff] }
0x1b76   :  { %v2177_v48 = vadd.f32 %v2176_v10, %v2175_v43  ;;  %v2170_v15 = vadd.f32 %v2169_v3, %v2168_v13  ;;  %5412 = vmatpush3.msra.mxu1 %v7282_v8  ;;  %v7546_v43 = vld [vmem:[#allocation17 + $0x10] sm:$0xff]  ;;  %v7550_v13 = vld [vmem:[#allocation17 + $0x8] sm:$0xff]  ;;  %v7554_v10 = vld [vmem:[#allocation17] sm:$0xff] }
0x1b77   :  { %5413 = vmatprep.subr.mxu1 %v8650_v23 }
0x1b78   :  { %v1956_v28 = vpop.permute.xlu0 %1955  ;;  %v2171_v32 = vrot.slane %v2170_v15, 1  ;;  %v2178_v39 = vrot.slane %v2177_v48, 1  ;;  %5414 = vmatpush3.msra.mxu1 %v7286_v14 }
0x1b79   :  { %1958 = vst.msk [vmem:[#allocation5] sm:$0x3] %vm131_vm5, %v1956_v28  ;;  %5415 = vmatprep.subr.mxu1 %v8650_v23  ;;  %v7579_v28 = vld [vmem:[%s8632_s9 + $0x68] sm:$0xff] }
0x1b7a   :  { %v2172_v27 = vadd.f32 %v2171_v32, %v2170_v15  ;;  %v2179_v9 = vadd.f32 %v2178_v39, %v2177_v48  ;;  %5416 = vmatpush3.msra.mxu1 %v7291_v33  ;;  %v7570_v15 = vld [vmem:[%s8632_s9 + $0x70] sm:$0xff]  ;;  %v7586_v32 = vld [vmem:[%s8632_s9 + $0x60] sm:$0xff]  ;;  %v7593_v39 = vld [vmem:[%s8632_s9 + $0x58] sm:$0xff] }
0x1b7b   :  { %5417 = vmatprep.subr.mxu1 %v8650_v23 }
0x1b7c   :  { %v2190_v58 = vsel %vm680_vm13, %v2179_v9, %v2172_v27  ;;  %v1789_v18 = vld [vmem:[#allocation7] sm:$0x3]  ;;  %5418 = vmatpush3.msra.mxu1 %v7301_v25  ;;  %v7600_v27 = vld [vmem:[%s8632_s9 + $0x50] sm:$0xff]  ;;  %v7607_v9 = vld [vmem:[%s8632_s9 + $0x48] sm:$0xff] }
0x1b7d   :  { %2191 = vrot.lane.b32.xlu1 %v2190_v58, %s6263_s29  ;;  %1798 = vrot.lane.b32.xlu0 %v1789_v18, %s6263_s29  ;;  %v7616_v58 = vld [vmem:[%s8632_s9 + $0x40] sm:$0xff]  ;;  %v7623_v18 = vld [vmem:[%s8632_s9 + $0x38] sm:$0xff] }
0x1b7e   :  { %5419 = vmatprep.subr.mxu1 %v8650_v23 }
0x1b7f   :  { %5420 = vmatpush3.msra.mxu1 %v7305_v62 }
0x1b80   :  { %v2428_v20 = vld [vmem:[#allocation5] sm:$0x3]  ;;  %5421 = vmatprep.subr.mxu1 %v8650_v23 }
0x1b81   :  { %1803 = vrot.lane.b32.xlu1 %v5976_v19, %s6262_s5  ;;  %2437 = vrot.lane.b32.xlu0 %v2428_v20, %s6263_s29  ;;  %v7629_v19 = vld [vmem:[%s8632_s9 + $0x30] sm:$0xff]  ;;  %v7635_v20 = vld [vmem:[%s8632_s9 + $0x28] sm:$0xff] }
0x1b82   :  { %5422 = vmatpush3.msra.mxu1 %v7309_v63 }
0x1b83   :  { %5423 = vmatprep.subr.mxu1 %v8650_v23 }
0x1b84   :  { %5424 = vmatpush3.msra.mxu1 %v7313_v0 }
0x1b85   :  { %5425 = vmatprep.subr.mxu1 %v8650_v23 }
0x1b86   :  { %5426 = vmatpush3.msra.mxu1 %v7317_v2 }
0x1b87   :  { %5427 = vmatprep.subr.mxu1 %v8650_v23 }
0x1b88   :  { %5428 = vmatpush3.msra.mxu1 %v7321_v6 }
0x1b89   :  { %5429 = vmatprep.subr.mxu1 %v8650_v23 }
0x1b8a   :  { %5430 = vmatpush3.msra.mxu1 %v7326_v29  ;;  %v2181_v29 = vld [vmem:[#allocation8] sm:$0x3] }
0x1b8b   :  { %5463 = vmatprep.subr.mxu1 %v8650_v23 }
0x1bef   :  { %v7470_v21 = vpop.permute.xlu1 %2191  ;;  %v1799_v60 = vpop.permute.xlu0 %1798 }
0x1bf0   :  { %8651 = vst [vmem:[#allocation33_spill] sm:$0xff] %v7470_v21  ;;  %2194 = vst.msk [vmem:[#allocation4] sm:$0x3] %vm685_vm14, %v7470_v21 }
0x1bf1   :  { %2337 = vst.msk [vmem:[#allocation4] sm:$0x3] %vm131_vm5, %v2336_v24  ;;  %v7642_v24 = vld [vmem:[%s8632_s9 + $0x20] sm:$0xff] }
0x1bf3   :  { %v1804_v51 = vpop.permute.xlu1 %1803  ;;  %v2438_v7 = vpop.permute.xlu0 %2437 }
0x1bf8   :  { %v2338_v26 = vld [vmem:[#allocation4] sm:$0x3] }
0x1bf9   :  { %5461 = vmatmul.mubr.msk.f32.vlgmr.msra.gmra.mxu0 %vm332_vm7, %v2338_v26  ;;  %v7649_v26 = vld [vmem:[%s8632_s9 + $0x18] sm:$0xff] }
0x1bfa   :  { %5539 = vmatprep.mubr.msk.f32.mxu0 %vm6261_vm6, %v8650_v23 }
0x1cb9   :  { %v2424_v50 = vpop.f32.mrf.mxu0 }
0x1cba   :  { %5979 = vtanh.f32 %v2424_v50  ;;  %v4519_v53 = vmul.f32 -1.442695, %v2424_v50 }
0x1cbb   :  { %v5462_v44 = vpop.f32.mrf.mxu0  ;;  %5981 = vrcp.f32 %v1793_v47  ;;  %v7670_v47 = vld [vmem:[%s8632_s9] sm:$0xff] }
0x1cbc   :  { %5983 = vpow2.f32 %v4519_v53 }
0x1cc7   :  { %v5980_v46 = vpop.eup %5979 }
0x1cc8   :  { %2442 = vrot.lane.b32.xlu1 %v5980_v46, %s6262_s5  ;;  %v5982_v56 = vpop.eup %5981  ;;  %v2478_v46 = vld [vmem:[%s8625_s2] sm:$0x3] }
0x1cc9   :  { %v1806_v52 = vmul.f32 %v5982_v56, %v1804_v51  ;;  %v5984_v57 = vpop.eup %5983  ;;  %v1801_v36 = vmul.f32 %v5982_v56, %v1799_v60 }
0x1cca   :  { %v2432_v59 = vadd.f32 1.0, %v5984_v57  ;;  %v2569_v57 = vld [vmem:[%s8626_s3] sm:$0x3] }
0x1ccc   :  { %1808 = vrot.lane.b32.xlu1 %v1806_v52, %s6263_s29  ;;  %5985 = vrcp.f32 %v2432_v59 }
0x1cd9   :  { %v5986_v17 = vpop.eup %5985 }
0x1cda   :  { %v2440_v35 = vmul.f32 %v5986_v17, %v2438_v7 }
0x1d3a   :  { %v2443_v61 = vpop.permute.xlu1 %2442 }
0x1d3b   :  { %v2445_v11 = vmul.f32 %v5986_v17, %v2443_v61 }
0x1d3d   :  { %2447 = vrot.lane.b32.xlu1 %v2445_v11, %s6263_s29 }
0x1d3e   :  { %v1809_v38 = vpop.permute.xlu1 %1808 }
0x1d3f   :  { %v7482_v40 = vadd.f32 %v1809_v38, %v1801_v36 }
0x1d41   :  { %5987 = vtanh.f32 %v7482_v40 }
0x1d4e   :  { %v5988_v49 = vpop.eup %5987 }
0x1d4f   :  { %1814 = vrot.lane.b32.xlu0 %v5988_v49, %s6262_s5 }
0x1daf   :  { %v2448_v8 = vpop.permute.xlu1 %2447 }
0x1db0   :  { %v7512_v14 = vadd.f32 %v2448_v8, %v2440_v35 }
0x1db2   :  { %5989 = vtanh.f32 %v7512_v14 }
0x1dbf   :  { %v5990_v33 = vpop.eup %5989 }
0x1dc0   :  { %2453 = vrot.lane.b32.xlu1 %v5990_v33, %s6262_s5 }
0x1dc1   :  { %v1815_v25 = vpop.permute.xlu0 %1814 }
0x1dc2   :  { %v7516_v62 = vmul.f32 %v5982_v56, %v1815_v25 }
0x1dc4   :  { %8652 = vst [vmem:[#allocation34_spill] sm:$0xff] %v7516_v62  ;;  %1824 = vrot.lane.b32.xlu0 %v7516_v62, %s6265_s16  ;;  %2197 = vrot.lane.b32.xlu1 %v7340_v45, %s6263_s29 }
0x1dc8   :  { %2183 = vrot.lane.b32.xlu0 %v7412_v30, %s6254_s14  ;;  %v7533_v30 = vld [vmem:[#allocation17 + $0x28] sm:$0xff] }
0x1e32   :  { %v2454_v63 = vpop.permute.xlu1 %2453 }
0x1e33   :  { %v7524_v0 = vmul.f32 %v5986_v17, %v2454_v63  ;;  %v2854_v63 = vld [vmem:[%s8629_s6 + $0x60] sm:$0x1] }
0x1e35   :  { %2467 = vrot.lane.b32.xlu1 %v7524_v0, %s6264_s15 }
0x1e36   :  { %v1825_v2 = vpop.permute.xlu0 %1824  ;;  %v2198_v6 = vpop.permute.xlu1 %2197 }
0x1e37   :  { %1827 = vst.msk [vmem:[#allocation6] sm:$0x3] %vm448_vm12, %v1825_v2  ;;  %v7706_v2 = vld [vmem:[%s8629_s6 + $0x58] sm:$0xff] }
0x1e38   :  { %2200 = vst.msk [vmem:[#allocation6] sm:$0x3] %vm131_vm5, %v2198_v6  ;;  %v7715_v6 = vld [vmem:[%s8629_s6 + $0x50] sm:$0xff] }
0x1e39   :  { %2201 = vst.msk [vmem:[#allocation6] sm:$0x3] %vm685_vm14, %v7470_v21 }
0x1e3a   :  { %v2184_v45 = vpop.permute.xlu0 %2183 }
0x1e3b   :  { %v2186_v31 = vadd.f32 %v2184_v45, %v2181_v29  ;;  %v7722_v29 = vld [vmem:[%s8629_s6 + $0x48] sm:$0xff]  ;;  %v7738_v45 = vld [vmem:[%s8629_s6 + $0x38] sm:$0xff] }
0x1e3d   :  { %2187 = vst.msk [vmem:[#allocation8] sm:$0x3] %vm676_vm15, %v2186_v31  ;;  %v7752_v31 = vld [vmem:[%s8629_s6 + $0x28] sm:$0xff] }
0x1e40   :  { %v2202_v12 = vld [vmem:[#allocation6] sm:$0x3] }
0x1e41   :  { %5432 = vmatmul.mubr.msk.f32.vlgmr.msra.gmra.mxu1 %vm332_vm7, %v2202_v12  ;;  %v7758_v12 = vld [vmem:[#allocation12 + $0x8] sm:$0xff] }
0x1e42   :  { %5464 = vmatpush3.msra.mxu1 %v7533_v30  ;;  %5475 = vmatprep.mubr.msk.f32.mxu1 %vm6261_vm6, %v8650_v23 }
0x1e43   :  { %5465 = vmatprep.subr.mxu1 %v8650_v23 }
0x1e44   :  { %5466 = vmatpush3.msra.mxu1 %v7536_v4 }
0x1e45   :  { %5467 = vmatprep.subr.mxu1 %v8650_v23 }
0x1e46   :  { %5468 = vmatpush3.msra.mxu1 %v7542_v5 }
0x1e47   :  { %5469 = vmatprep.subr.mxu1 %v8650_v23 }
0x1e48   :  { %5470 = vmatpush3.msra.mxu1 %v7546_v43 }
0x1e49   :  { %5471 = vmatprep.subr.mxu1 %v8650_v23 }
0x1e4a   :  { %5472 = vmatpush3.msra.mxu1 %v7550_v13 }
0x1e4b   :  { %5473 = vmatprep.subr.mxu1 %v8650_v23 }
0x1e4c   :  { %5474 = vmatpush3.msra.mxu1 %v7554_v10 }
0x1e4d   :  { %5478 = vmatprep.subr.mxu1 %v8650_v23 }
0x1ea7   :  { %v2468_v3 = vpop.permute.xlu1 %2467 }
0x1ea8   :  { %2470 = vst.msk [vmem:[#allocation8] sm:$0x3] %vm453_vm9, %v2468_v3  ;;  %v7760_v3 = vld [vmem:[#allocation12] sm:$0xff] }
0x1eaf   :  { %v2471_v48 = vld [vmem:[#allocation8] sm:$0x3] }
0x1eb0   :  { %5476 = vmatmul.mubr.msk.f32.vlgmr.msra.gmra.mxu1 %vm463_vm10, %v2471_v48 }
0x1eb1   :  { %5479 = vmatpush3.msra.mxu1 %v7564_v16  ;;  %5510 = vmatprep.mubr.msk.f32.mxu1 %vm6261_vm6, %v8650_v23 }
0x1eb2   :  { %5480 = vmatprep.subr.mxu1 %v8650_v23 }
0x1eb3   :  { %5481 = vmatpush3.msra.mxu1 %v7570_v15 }
0x1eb4   :  { %5482 = vmatprep.subr.mxu1 %v8650_v23 }
0x1eb5   :  { %5483 = vmatpush3.msra.mxu1 %v7579_v28 }
0x1eb6   :  { %5484 = vmatprep.subr.mxu1 %v8650_v23 }
0x1eb7   :  { %5485 = vmatpush3.msra.mxu1 %v7586_v32 }
0x1eb8   :  { %5486 = vmatprep.subr.mxu1 %v8650_v23 }
0x1eb9   :  { %5487 = vmatpush3.msra.mxu1 %v7593_v39 }
0x1eba   :  { %5488 = vmatprep.subr.mxu1 %v8650_v23 }
0x1ebb   :  { %5489 = vmatpush3.msra.mxu1 %v7600_v27 }
0x1ebc   :  { %5490 = vmatprep.subr.mxu1 %v8650_v23 }
0x1ebd   :  { %5491 = vmatpush3.msra.mxu1 %v7607_v9 }
0x1ebe   :  { %5492 = vmatprep.subr.mxu1 %v8650_v23 }
0x1ebf   :  { %5493 = vmatpush3.msra.mxu1 %v7616_v58 }
0x1ec0   :  { %5494 = vmatprep.subr.mxu1 %v8650_v23 }
0x1ec1   :  { %5495 = vmatpush3.msra.mxu1 %v7623_v18 }
0x1ec2   :  { %5496 = vmatprep.subr.mxu1 %v8650_v23 }
0x1ec3   :  { %5497 = vmatpush3.msra.mxu1 %v7629_v19 }
0x1ec4   :  { %5498 = vmatprep.subr.mxu1 %v8650_v23 }
0x1ec5   :  { %5499 = vmatpush3.msra.mxu1 %v7635_v20 }
0x1ec6   :  { %5500 = vmatprep.subr.mxu1 %v8650_v23 }
0x1ec7   :  { %5501 = vmatpush3.msra.mxu1 %v7642_v24 }
0x1ec8   :  { %5502 = vmatprep.subr.mxu1 %v8650_v23 }
0x1ec9   :  { %5503 = vmatpush3.msra.mxu1 %v7649_v26 }
0x1eca   :  { %5504 = vmatprep.subr.mxu1 %v8650_v23 }
0x1ecb   :  { %5505 = vmatpush3.msra.mxu1 %v7656_v34 }
0x1ecc   :  { %5506 = vmatprep.subr.mxu1 %v8650_v23 }
0x1ecd   :  { %5507 = vmatpush3.msra.mxu1 %v7663_v55 }
0x1ece   :  { %5508 = vmatprep.subr.mxu1 %v8650_v23 }
0x1ecf   :  { %5509 = vmatpush3.msra.mxu1 %v7670_v47 }
0x1ed0   :  { %5542 = vmatprep.subr.mxu1 %v8650_v23 }
0x1f01   :  { %v7674_v50 = vpop.f32.mrf.mxu1 }
0x1f03   :  { %v5433_v44 = vpop.f32.mrf.mxu1 }
0x1f70   :  { %v2548_v51 = vpop.f32.mrf.mxu1 }
0x1f71   :  { %v2549_v56 = vadd.f32 %v2548_v51, %v2478_v46 }
0x1f72   :  { %v5477_v52 = vpop.f32.mrf.mxu1 }
0x1f73   :  { %5991 = vtanh.f32 %v2549_v56 }
0x1f80   :  { %v5992_v53 = vpop.eup %5991 }
0x1f81   :  { %5511 = vmatmul.mubr.f32.vlgmr.msra.gmra.mxu1 %v5992_v53 }
0x1f82   :  { %5568 = vmatprep.mubr.msk.f32.mxu1 %vm6261_vm6, %v8650_v23  ;;  %5543 = vmatpush3.msk.msra.mxu1 %vm336_vm1, %v2854_v63 }
0x1f83   :  { %5544 = vmatprep.subr.mxu1 %v8650_v23 }
0x1f84   :  { %5545 = vmatpush3.msra.mxu1 %v7706_v2 }
0x1f85   :  { %5546 = vmatprep.subr.mxu1 %v8650_v23 }
0x1f86   :  { %5547 = vmatpush3.msra.mxu1 %v7715_v6 }
0x1f87   :  { %5548 = vmatprep.subr.mxu1 %v8650_v23 }
0x1f88   :  { %5549 = vmatpush3.msra.mxu1 %v7722_v29 }
0x1f89   :  { %5550 = vmatprep.subr.mxu1 %v8650_v23 }
0x2041   :  { %v2636_v59 = vpop.f32.mrf.mxu1 }
0x2042   :  { %v2637_v17 = vadd.f32 %v2636_v59, %v2569_v57 }
0x2043   :  { %v5512_v60 = vpop.f32.mrf.mxu1 }
0x2044   :  { %v2640_v61 = vsel %vm625_vm11, %v2637_v17, -inf  ;;  %v7776_v60 = vld [vmem:[%s8629_s6 + $0x18] sm:$0xff] }
0x2045   :  { %2641 = vmax.xlane.f32.xlu0 %v2640_v61 }
0x20ce   :  { %v2642_v11 = vpop.xlane.xlu0 %2641 }
0x20cf   :  { %v2643_v36 = vsub.f32 %v2637_v17, %v2642_v11  ;;  %v7769_v17 = vld [vmem:[%s8629_s6 + $0x20] sm:$0xff] }
0x20d1   :  { %v2644_v38 = vmul.f32 1.442695, %v2643_v36 }
0x20d3   :  { %5993 = vpow2.f32 %v2644_v38 }
0x20e0   :  { %v5994_v22 = vpop.eup %5993 }
0x20e1   :  { %v2646_v49 = vsel %vm625_vm11, %v5994_v22, 0.0 }
0x20e2   :  { %2647 = vadd.xlane.f32.xlu1 %v2646_v49  ;;  %v7785_v49 = vld [vmem:[%s8629_s6 + $0x10] sm:$0xff] }
0x216b   :  { %v2648_v7 = vpop.xlane.xlu1 %2647 }
0x216c   :  { %5995 = vrcp.f32 %v2648_v7  ;;  %v7790_v7 = vld [vmem:[%s8629_s6 + $0x8] sm:$0xff] }
0x216d   :  { %5997 = vtanh.f32 %v7674_v50 }
0x2179   :  { %v5996_v35 = vpop.eup %5995 }
0x217a   :  { %v7688_v8 = vmul.f32 %v5996_v35, %v5994_v22 }
0x217c   :  { %v2661_v33 = vrot.slane %v7688_v8, %v6658_v41  ;;  %2699 = vst.msk [vmem:[#allocation21 + $0x8] sm:$0x3] %vm625_vm11, %v7688_v8  ;;  %2683 = vst.msk [vmem:[#allocation8] sm:$0x3] %vm625_vm11, %v7688_v8  ;;  %v2654_v25 = vrot.slane %v7688_v8, %v6660_v42 }
0x217e   :  { %2663 = vbcast.lane.b32.xlu1 %v2661_v33, 256  ;;  %2656 = vbcast.lane.b32.xlu0 %v2654_v25, 256  ;;  %v7798_v25 = vld [vmem:[%s8629_s6] sm:$0xff] }
0x2182   :  { %2463 = vrot.lane.b32.xlu0 %v7524_v0, %s6265_s16 }
0x2186   :  { %1819 = vrot.lane.b32.xlu0 %v7482_v40, %s6265_s16  ;;  %v7731_v40 = vld [vmem:[%s8629_s6 + $0x40] sm:$0xff] }
0x2187   :  { %5551 = vmatpush3.msra.mxu1 %v7731_v40 }
0x2188   :  { %5552 = vmatprep.subr.mxu1 %v8650_v23 }
0x2189   :  { %5553 = vmatpush3.msra.mxu1 %v7738_v45 }
0x218a   :  { %2458 = vrot.lane.b32.xlu0 %v7512_v14, %s6265_s16  ;;  %v7745_v14 = vld [vmem:[%s8629_s6 + $0x30] sm:$0xff]  ;;  %5554 = vmatprep.subr.mxu1 %v8650_v23 }
0x218b   :  { %5555 = vmatpush3.msra.mxu1 %v7745_v14 }
0x218c   :  { %5556 = vmatprep.subr.mxu1 %v8650_v23 }
0x218d   :  { %5557 = vmatpush3.msra.mxu1 %v7752_v31 }
0x218e   :  { %5558 = vmatprep.subr.mxu1 %v8650_v23 }
0x218f   :  { %5559 = vmatpush3.msra.mxu1 %v7769_v17 }
0x2190   :  { %5560 = vmatprep.subr.mxu1 %v8650_v23 }
0x2191   :  { %5561 = vmatpush3.msra.mxu1 %v7776_v60 }
0x2192   :  { %5562 = vmatprep.subr.mxu1 %v8650_v23 }
0x2193   :  { %5563 = vmatpush3.msra.mxu1 %v7785_v49 }
0x2194   :  { %5564 = vmatprep.subr.mxu1 %v8650_v23 }
0x2195   :  { %5565 = vmatpush3.msra.mxu1 %v7790_v7 }
0x2196   :  { %5566 = vmatprep.subr.mxu1 %v8650_v23 }
0x2197   :  { %5567 = vmatpush3.msra.mxu1 %v7798_v25 }
0x2198   :  { %5621 = vmatprep.subr.mxu1 %v8650_v23 }
0x21f0   :  { %v2664_v48 = vpop.permute.xlu1 %2663  ;;  %v2657_v44 = vpop.permute.xlu0 %2656 }
0x21f1   :  { %v2668_v46 = vmul.f32 %v7758_v12, %v2664_v48  ;;  %v2667_v51 = vmul.f32 %v7760_v3, %v2657_v44 }
0x21f3   :  { %v2676_v56 = vsel %vm230_vm2, %v2668_v46, 0.0  ;;  %v2669_v52 = vsel %vm230_vm2, %v2667_v51, 0.0 }
0x21f4   :  { %v2677_v53 = vrot.slane %v2676_v56, 4  ;;  %v2670_v57 = vrot.slane %v2669_v52, 4  ;;  %v2464_v59 = vpop.permute.xlu0 %2463 }
0x21f5   :  { %2466 = vst.msk [vmem:[#allocation4] sm:$0x3] %vm448_vm12, %v2464_v59 }
0x21f6   :  { %v2678_v61 = vadd.f32 %v2677_v53, %v2676_v56  ;;  %v2671_v11 = vadd.f32 %v2670_v57, %v2669_v52  ;;  %v5998_v53 = vpop.eup %5997 }
0x21f8   :  { %v2679_v36 = vrot.slane %v2678_v61, 2  ;;  %v2672_v38 = vrot.slane %v2671_v11, 2  ;;  %v1820_v22 = vpop.permute.xlu0 %1819 }
0x21f9   :  { %1822 = vst.msk [vmem:[#allocation7] sm:$0x3] %vm131_vm5, %v1820_v22 }
0x21fa   :  { %v2680_v35 = vadd.f32 %v2679_v36, %v2678_v61  ;;  %v2673_v33 = vadd.f32 %v2672_v38, %v2671_v11  ;;  %v2839_v61 = vld [vmem:[#allocation2 + $0xa] sm:$0x3]  ;;  %v4516_v36 = vmul.f32 -1.442695, %v7674_v50 }
0x21fc   :  { %v2681_v63 = vrot.slane %v2680_v35, 1  ;;  %v2674_v48 = vrot.slane %v2673_v33, 1  ;;  %v2459_v44 = vpop.permute.xlu0 %2458  ;;  %5999 = vpow2.f32 %v4516_v36 }
0x21fd   :  { %2461 = vst.msk [vmem:[#allocation5] sm:$0x3] %vm131_vm5, %v2459_v44 }
0x21fe   :  { %v2675_v46 = vadd.f32 %v2674_v48, %v2673_v33  ;;  %v2682_v51 = vadd.f32 %v2681_v63, %v2680_v35 }
0x2200   :  { %v2693_v56 = vsel %vm680_vm13, %v2682_v51, %v2675_v46  ;;  %v2292_v52 = vld [vmem:[#allocation7] sm:$0x3] }
0x2201   :  { %2694 = vrot.lane.b32.xlu1 %v2693_v56, %s6263_s29  ;;  %2301 = vrot.lane.b32.xlu0 %v2292_v52, %s6263_s29 }
0x2204   :  { %v2931_v57 = vld [vmem:[#allocation5] sm:$0x3] }
0x2205   :  { %2306 = vrot.lane.b32.xlu1 %v5998_v53, %s6262_s5  ;;  %2940 = vrot.lane.b32.xlu0 %v2931_v57, %s6263_s29 }
0x2209   :  { %v6000_v38 = vpop.eup %5999 }
0x220a   :  { %v2296_v22 = vadd.f32 1.0, %v6000_v38 }
0x2273   :  { %v7810_v59 = vpop.permute.xlu1 %2694  ;;  %v2302_v53 = vpop.permute.xlu0 %2301 }
0x2274   :  { %2697 = vst.msk [vmem:[#allocation4] sm:$0x3] %vm685_vm14, %v7810_v59 }
0x2275   :  { %2840 = vst.msk [vmem:[#allocation4] sm:$0x3] %vm131_vm5, %v2839_v61 }
0x2277   :  { %v2307_v48 = vpop.permute.xlu1 %2306 }
0x227c   :  { %v2841_v11 = vld [vmem:[#allocation4] sm:$0x3] }
0x227d   :  { %5569 = vmatmul.mubr.msk.f32.vlgmr.msra.gmra.mxu1 %vm332_vm7, %v2841_v11 }
0x227e   :  { %5647 = vmatprep.mubr.msk.f32.mxu1 %vm6261_vm6, %v8650_v23 }
0x233d   :  { %v2927_v35 = vpop.f32.mrf.mxu1 }
0x233e   :  { %6001 = vtanh.f32 %v2927_v35  ;;  %v4526_v51 = vmul.f32 -1.442695, %v2927_v35  ;;  %v7832_v35 = vld [vmem:[#allocation15 + $0x58] sm:$0xff] }
0x233f   :  { %v5570_v33 = vpop.f32.mrf.mxu1  ;;  %6003 = vrcp.f32 %v2296_v22  ;;  %v2718_v22 = vld [vmem:[#allocation15 + $0x60] sm:$0x1] }
0x2340   :  { %6005 = vpow2.f32 %v4526_v51  ;;  %5514 = vmatpush3.msk.msra.mxu0 %vm336_vm1, %v2718_v22  ;;  %v7836_v33 = vld [vmem:[#allocation15 + $0x50] sm:$0xff]  ;;  %v7849_v51 = vld [vmem:[#allocation15 + $0x38] sm:$0xff] }
0x2341   :  { %5515 = vmatprep.subr.mxu0 %v8650_v23  ;;  %v7870_v22 = vld [vmem:[#allocation15 + $0x18] sm:$0xff] }
0x2342   :  { %5516 = vmatpush3.msra.mxu0 %v7832_v35 }
0x2343   :  { %5517 = vmatprep.subr.mxu0 %v8650_v23 }
0x2344   :  { %5518 = vmatpush3.msra.mxu0 %v7836_v33 }
0x2345   :  { %5519 = vmatprep.subr.mxu0 %v8650_v23 }
0x234b   :  { %v6002_v63 = vpop.eup %6001 }
0x234c   :  { %2945 = vrot.lane.b32.xlu1 %v6002_v63, %s6262_s5  ;;  %v7820_v44 = vpop.eup %6003  ;;  %v7840_v63 = vld [vmem:[#allocation15 + $0x48] sm:$0xff] }
0x234d   :  { %v2309_v46 = vmul.f32 %v7820_v44, %v2307_v48  ;;  %v6006_v50 = vpop.eup %6005  ;;  %v2304_v11 = vmul.f32 %v7820_v44, %v2302_v53  ;;  %5520 = vmatpush3.msra.mxu0 %v7840_v63 }
0x234e   :  { %v2935_v56 = vadd.f32 1.0, %v6006_v50  ;;  %5521 = vmatprep.subr.mxu0 %v8650_v23  ;;  %v2941_v50 = vpop.permute.xlu0 %2940 }
0x2350   :  { %2311 = vrot.lane.b32.xlu1 %v2309_v46, %s6263_s29  ;;  %6007 = vrcp.f32 %v2935_v56  ;;  %v7844_v46 = vld [vmem:[#allocation15 + $0x40] sm:$0xff] }
0x2351   :  { %5522 = vmatpush3.msra.mxu0 %v7844_v46 }
0x2352   :  { %5523 = vmatprep.subr.mxu0 %v8650_v23 }
0x2353   :  { %5524 = vmatpush3.msra.mxu0 %v7849_v51 }
0x2354   :  { %5525 = vmatprep.subr.mxu0 %v8650_v23 }
0x235d   :  { %v7824_v52 = vpop.eup %6007 }
0x235e   :  { %v2943_v56 = vmul.f32 %v7824_v52, %v2941_v50  ;;  %v7878_v50 = vld [vmem:[#allocation15 + $0x8] sm:$0xff] }
0x23be   :  { %v2946_v57 = vpop.permute.xlu1 %2945 }
0x23bf   :  { %v2948_v61 = vmul.f32 %v7824_v52, %v2946_v57 }
0x23c1   :  { %2950 = vrot.lane.b32.xlu1 %v2948_v61, %s6263_s29  ;;  %v7859_v61 = vld [vmem:[#allocation15 + $0x30] sm:$0xff] }
0x23c2   :  { %v2312_v36 = vpop.permute.xlu1 %2311  ;;  %5526 = vmatpush3.msra.mxu0 %v7859_v61 }
0x23c3   :  { %v7829_v38 = vadd.f32 %v2312_v36, %v2304_v11  ;;  %5527 = vmatprep.subr.mxu0 %v8650_v23  ;;  %v7863_v11 = vld [vmem:[#allocation15 + $0x28] sm:$0xff]  ;;  %v7867_v36 = vld [vmem:[#allocation15 + $0x20] sm:$0xff] }
0x23c4   :  { %5528 = vmatpush3.msra.mxu0 %v7863_v11 }
0x23c5   :  { %6009 = vtanh.f32 %v7829_v38  ;;  %5529 = vmatprep.subr.mxu0 %v8650_v23 }
0x23c6   :  { %5530 = vmatpush3.msra.mxu0 %v7867_v36 }
0x23c7   :  { %5531 = vmatprep.subr.mxu0 %v8650_v23 }
0x23c8   :  { %5532 = vmatpush3.msra.mxu0 %v7870_v22 }
0x23c9   :  { %5533 = vmatprep.subr.mxu0 %v8650_v23 }
0x23d2   :  { %v6010_v48 = vpop.eup %6009 }
0x23d3   :  { %2317 = vrot.lane.b32.xlu0 %v6010_v48, %s6262_s5  ;;  %v7875_v48 = vld [vmem:[#allocation15 + $0x10] sm:$0xff] }
0x23d4   :  { %5534 = vmatpush3.msra.mxu0 %v7875_v48 }
0x23d5   :  { %5535 = vmatprep.subr.mxu0 %v8650_v23 }
0x23d6   :  { %5536 = vmatpush3.msra.mxu0 %v7878_v50 }
0x23d7   :  { %5537 = vmatprep.subr.mxu0 %v8650_v23 }
0x2433   :  { %v2951_v53 = vpop.permute.xlu1 %2950 }
0x2434   :  { %v7856_v57 = vadd.f32 %v2951_v53, %v2943_v56  ;;  %v7881_v56 = vld [vmem:[#allocation15] sm:$0xff] }
0x2435   :  { %5538 = vmatpush3.msra.mxu0 %v7881_v56 }
0x2436   :  { %6011 = vtanh.f32 %v7856_v57  ;;  %5571 = vmatprep.subr.mxu0 %v8650_v23 }
0x2443   :  { %v6012_v53 = vpop.eup %6011 }
0x2444   :  { %2956 = vrot.lane.b32.xlu1 %v6012_v53, %s6262_s5 }
0x2445   :  { %v2318_v21 = vpop.permute.xlu0 %2317 }
0x2446   :  { %v7888_v1 = vmul.f32 %v7820_v44, %v2318_v21 }
0x2448   :  { %8653 = vst [vmem:[#allocation35_spill] sm:$0xff] %v7888_v1  ;;  %2327 = vrot.lane.b32.xlu0 %v7888_v1, %s6265_s16  ;;  %2700 = vrot.lane.b32.xlu1 %v7524_v0, %s6263_s29  ;;  %v2684_v0 = vld [vmem:[#allocation8] sm:$0x3] }
0x244c   :  { %2686 = vrot.lane.b32.xlu0 %v7688_v8, %s6254_s14 }
0x24b6   :  { %v2957_v53 = vpop.permute.xlu1 %2956 }
0x24b7   :  { %v7898_v54 = vmul.f32 %v7824_v52, %v2957_v53  ;;  %v3357_v52 = vld [vmem:[%s8629_s6 + $0x60] sm:$0x1] }
0x24b9   :  { %2970 = vrot.lane.b32.xlu1 %v7898_v54, %s6264_s15 }
0x24ba   :  { %v2328_v21 = vpop.permute.xlu0 %2327  ;;  %v2701_v44 = vpop.permute.xlu1 %2700 }
0x24bb   :  { %2330 = vst.msk [vmem:[#allocation6] sm:$0x3] %vm448_vm12, %v2328_v21 }
0x24bc   :  { %2703 = vst.msk [vmem:[#allocation6] sm:$0x3] %vm131_vm5, %v2701_v44 }
0x24bd   :  { %2704 = vst.msk [vmem:[#allocation6] sm:$0x3] %vm685_vm14, %v7810_v59 }
0x24be   :  { %v2687_v1 = vpop.permute.xlu0 %2686 }
0x24bf   :  { %v2689_v62 = vadd.f32 %v2687_v1, %v2684_v0 }
0x24c1   :  { %2690 = vst.msk [vmem:[#allocation8] sm:$0x3] %vm676_vm15, %v2689_v62 }
0x24c4   :  { %v2705_v8 = vld [vmem:[#allocation6] sm:$0x3] }
0x24c5   :  { %5540 = vmatmul.mubr.msk.f32.vlgmr.msra.gmra.mxu0 %vm332_vm7, %v2705_v8 }
0x24c6   :  { %5572 = vmatpush3.msra.mxu0 %v7533_v30  ;;  %5583 = vmatprep.mubr.msk.f32.mxu0 %vm6261_vm6, %v8650_v23 }
0x24c7   :  { %5573 = vmatprep.subr.mxu0 %v8650_v23 }
0x24c8   :  { %5574 = vmatpush3.msra.mxu0 %v7536_v4 }
0x24c9   :  { %5575 = vmatprep.subr.mxu0 %v8650_v23 }
0x24ca   :  { %5576 = vmatpush3.msra.mxu0 %v7542_v5  ;;  %v2981_v5 = vld [vmem:[%s8625_s2] sm:$0x3] }
0x24cb   :  { %5577 = vmatprep.subr.mxu0 %v8650_v23 }
0x24cc   :  { %5578 = vmatpush3.msra.mxu0 %v7546_v43 }
0x24cd   :  { %5579 = vmatprep.subr.mxu0 %v8650_v23 }
0x24ce   :  { %5580 = vmatpush3.msra.mxu0 %v7550_v13 }
0x24cf   :  { %5581 = vmatprep.subr.mxu0 %v8650_v23 }
0x24d0   :  { %5582 = vmatpush3.msra.mxu0 %v7554_v10 }
0x24d1   :  { %5586 = vmatprep.subr.mxu0 %v8650_v23 }
0x252b   :  { %v2971_v1 = vpop.permute.xlu1 %2970 }
0x252c   :  { %2973 = vst.msk [vmem:[#allocation8] sm:$0x3] %vm453_vm9, %v2971_v1 }
0x2533   :  { %v2974_v62 = vld [vmem:[#allocation8] sm:$0x3] }
0x2534   :  { %5584 = vmatmul.mubr.msk.f32.vlgmr.msra.gmra.mxu0 %vm463_vm10, %v2974_v62 }
0x2535   :  { %5587 = vmatpush3.msra.mxu0 %v7564_v16  ;;  %5618 = vmatprep.mubr.msk.f32.mxu0 %vm6261_vm6, %v8650_v23 }
0x2536   :  { %5588 = vmatprep.subr.mxu0 %v8650_v23 }
0x2537   :  { %5589 = vmatpush3.msra.mxu0 %v7570_v15  ;;  %v3072_v15 = vld [vmem:[%s8626_s3] sm:$0x3] }
0x2538   :  { %5590 = vmatprep.subr.mxu0 %v8650_v23 }
0x2539   :  { %5591 = vmatpush3.msra.mxu0 %v7579_v28 }
0x253a   :  { %5592 = vmatprep.subr.mxu0 %v8650_v23 }
0x253b   :  { %5593 = vmatpush3.msra.mxu0 %v7586_v32 }
0x253c   :  { %5594 = vmatprep.subr.mxu0 %v8650_v23 }
0x253d   :  { %5595 = vmatpush3.msra.mxu0 %v7593_v39 }
0x253e   :  { %5596 = vmatprep.subr.mxu0 %v8650_v23 }
0x253f   :  { %5597 = vmatpush3.msra.mxu0 %v7600_v27 }
0x2540   :  { %5598 = vmatprep.subr.mxu0 %v8650_v23 }
0x2541   :  { %5599 = vmatpush3.msra.mxu0 %v7607_v9 }
0x2542   :  { %5600 = vmatprep.subr.mxu0 %v8650_v23 }
0x2543   :  { %5601 = vmatpush3.msra.mxu0 %v7616_v58 }
0x2544   :  { %5602 = vmatprep.subr.mxu0 %v8650_v23 }
0x2545   :  { %5603 = vmatpush3.msra.mxu0 %v7623_v18 }
0x2546   :  { %5604 = vmatprep.subr.mxu0 %v8650_v23 }
0x2547   :  { %5605 = vmatpush3.msra.mxu0 %v7629_v19 }
0x2548   :  { %5606 = vmatprep.subr.mxu0 %v8650_v23 }
0x2549   :  { %5607 = vmatpush3.msra.mxu0 %v7635_v20 }
0x254a   :  { %5608 = vmatprep.subr.mxu0 %v8650_v23 }
0x254b   :  { %5609 = vmatpush3.msra.mxu0 %v7642_v24 }
0x254c   :  { %5610 = vmatprep.subr.mxu0 %v8650_v23 }
0x254d   :  { %5611 = vmatpush3.msra.mxu0 %v7649_v26 }
0x254e   :  { %5612 = vmatprep.subr.mxu0 %v8650_v23 }
0x254f   :  { %5613 = vmatpush3.msra.mxu0 %v7656_v34 }
0x2550   :  { %5614 = vmatprep.subr.mxu0 %v8650_v23 }
0x2551   :  { %5615 = vmatpush3.msra.mxu0 %v7663_v55 }
0x2552   :  { %5616 = vmatprep.subr.mxu0 %v8650_v23 }
0x2553   :  { %5617 = vmatpush3.msra.mxu0 %v7670_v47 }
0x2554   :  { %5650 = vmatprep.subr.mxu0 %v8650_v23 }
0x2585   :  { %v7958_v30 = vpop.f32.mrf.mxu0 }
0x2587   :  { %v5541_v4 = vpop.f32.mrf.mxu0 }
0x25f4   :  { %v3051_v43 = vpop.f32.mrf.mxu0 }
0x25f5   :  { %v3052_v13 = vadd.f32 %v3051_v43, %v2981_v5 }
0x25f6   :  { %v5585_v10 = vpop.f32.mrf.mxu0 }
0x25f7   :  { %6013 = vtanh.f32 %v3052_v13  ;;  %v3342_v13 = vld [vmem:[#allocation2 + $0xc] sm:$0x3] }
0x2604   :  { %v6014_v16 = vpop.eup %6013 }
0x2605   :  { %5619 = vmatmul.mubr.f32.vlgmr.msra.gmra.mxu0 %v6014_v16  ;;  %v4523_v16 = vmul.f32 -1.442695, %v7958_v30 }
0x2606   :  { %5676 = vmatprep.mubr.msk.f32.mxu0 %vm6261_vm6, %v8650_v23  ;;  %5651 = vmatpush3.msk.msra.mxu0 %vm336_vm1, %v3357_v52 }
0x2607   :  { %5652 = vmatprep.subr.mxu0 %v8650_v23 }
0x2608   :  { %5653 = vmatpush3.msra.mxu0 %v7706_v2 }
0x2609   :  { %5654 = vmatprep.subr.mxu0 %v8650_v23 }
0x260a   :  { %5655 = vmatpush3.msra.mxu0 %v7715_v6 }
0x260b   :  { %5656 = vmatprep.subr.mxu0 %v8650_v23 }
0x260c   :  { %5657 = vmatpush3.msra.mxu0 %v7722_v29 }
0x260d   :  { %5658 = vmatprep.subr.mxu0 %v8650_v23 }
0x260e   :  { %5659 = vmatpush3.msra.mxu0 %v7731_v40 }
0x260f   :  { %5660 = vmatprep.subr.mxu0 %v8650_v23 }
0x2610   :  { %5661 = vmatpush3.msra.mxu0 %v7738_v45 }
0x2611   :  { %5662 = vmatprep.subr.mxu0 %v8650_v23 }
0x2612   :  { %5663 = vmatpush3.msra.mxu0 %v7745_v14 }
0x2613   :  { %5664 = vmatprep.subr.mxu0 %v8650_v23 }
0x2614   :  { %5665 = vmatpush3.msra.mxu0 %v7752_v31 }
0x2615   :  { %5666 = vmatprep.subr.mxu0 %v8650_v23 }
0x2616   :  { %5667 = vmatpush3.msra.mxu0 %v7769_v17 }
0x2617   :  { %5668 = vmatprep.subr.mxu0 %v8650_v23 }
0x2618   :  { %5669 = vmatpush3.msra.mxu0 %v7776_v60 }
0x2619   :  { %5670 = vmatprep.subr.mxu0 %v8650_v23 }
0x261a   :  { %5671 = vmatpush3.msra.mxu0 %v7785_v49 }
0x261b   :  { %5672 = vmatprep.subr.mxu0 %v8650_v23 }
0x261c   :  { %5673 = vmatpush3.msra.mxu0 %v7790_v7 }
0x261d   :  { %5674 = vmatprep.subr.mxu0 %v8650_v23 }
0x261e   :  { %5675 = vmatpush3.msra.mxu0 %v7798_v25 }
0x261f   :  { %5729 = vmatprep.subr.mxu0 %v8650_v23 }
0x26c5   :  { %v3139_v28 = vpop.f32.mrf.mxu0 }
0x26c6   :  { %v3140_v32 = vadd.f32 %v3139_v28, %v3072_v15 }
0x26c7   :  { %v5620_v39 = vpop.f32.mrf.mxu0 }
0x26c8   :  { %v3143_v27 = vsel %vm625_vm11, %v3140_v32, -inf }
0x26c9   :  { %3144 = vmax.xlane.f32.xlu0 %v3143_v27 }
0x2752   :  { %v3145_v9 = vpop.xlane.xlu0 %3144 }
0x2753   :  { %v3146_v58 = vsub.f32 %v3140_v32, %v3145_v9 }
0x2755   :  { %v3147_v18 = vmul.f32 1.442695, %v3146_v58 }
0x2757   :  { %6015 = vpow2.f32 %v3147_v18 }
0x2764   :  { %v6016_v19 = vpop.eup %6015 }
0x2765   :  { %v3149_v20 = vsel %vm625_vm11, %v6016_v19, 0.0 }
0x2766   :  { %3150 = vadd.xlane.f32.xlu1 %v3149_v20 }
0x27ef   :  { %v3151_v24 = vpop.xlane.xlu1 %3150 }
0x27f0   :  { %6017 = vrcp.f32 %v3151_v24 }
0x27f1   :  { %6019 = vtanh.f32 %v7958_v30 }
0x27f2   :  { %6021 = vpow2.f32 %v4523_v16  ;;  %v8221_v16 = vld [vmem:[%s8632_s9 + $0x8] sm:$0xff] }
0x27fd   :  { %v6018_v26 = vpop.eup %6017 }
0x27fe   :  { %v7970_v34 = vmul.f32 %v6018_v26, %v6016_v19  ;;  %v6020_v4 = vpop.eup %6019 }
0x27ff   :  { %v6022_v15 = vpop.eup %6021 }
0x2800   :  { %3202 = vst.msk [vmem:[#allocation21 + $0xa] sm:$0x3] %vm625_vm11, %v7970_v34  ;;  %3186 = vst.msk [vmem:[#allocation8] sm:$0x3] %vm625_vm11, %v7970_v34  ;;  %v3164_v55 = vrot.slane %v7970_v34, %v6658_v41  ;;  %v3157_v47 = vrot.slane %v7970_v34, %v6660_v42  ;;  %v2799_v28 = vadd.f32 1.0, %v6022_v15  ;;  %v8228_v15 = vld [vmem:[%s8632_s9] sm:$0xff] }
0x2802   :  { %3166 = vbcast.lane.b32.xlu1 %v3164_v55, 256  ;;  %3159 = vbcast.lane.b32.xlu0 %v3157_v47, 256 }
0x2806   :  { %2966 = vrot.lane.b32.xlu0 %v7898_v54, %s6265_s16 }
0x280a   :  { %2322 = vrot.lane.b32.xlu0 %v7829_v38, %s6265_s16 }
0x280e   :  { %2961 = vrot.lane.b32.xlu0 %v7856_v57, %s6265_s16 }
0x2874   :  { %v3167_v2 = vpop.permute.xlu1 %3166  ;;  %v3160_v6 = vpop.permute.xlu0 %3159 }
0x2875   :  { %v3171_v29 = vmul.f32 %v3167_v2, %v7758_v12  ;;  %v3170_v40 = vmul.f32 %v3160_v6, %v7760_v3 }
0x2877   :  { %v3179_v45 = vsel %vm230_vm2, %v3171_v29, 0.0  ;;  %v3172_v14 = vsel %vm230_vm2, %v3170_v40, 0.0  ;;  %v3221_v29 = vld [vmem:[#allocation15 + $0x60] sm:$0x1] }
0x2878   :  { %v3180_v31 = vrot.slane %v3179_v45, 4  ;;  %v3173_v17 = vrot.slane %v3172_v14, 4  ;;  %v2967_v60 = vpop.permute.xlu0 %2966  ;;  %5622 = vmatpush3.msk.msra.mxu1 %vm336_vm1, %v3221_v29 }
0x2879   :  { %2969 = vst.msk [vmem:[#allocation4] sm:$0x3] %vm448_vm12, %v2967_v60  ;;  %5623 = vmatprep.subr.mxu1 %v8650_v23  ;;  %v8104_v60 = vld [vmem:[#allocation17 + $0x10] sm:$0xff] }
0x287a   :  { %v3181_v49 = vadd.f32 %v3180_v31, %v3179_v45  ;;  %v3174_v7 = vadd.f32 %v3173_v17, %v3172_v14  ;;  %5624 = vmatpush3.msra.mxu1 %v7832_v35  ;;  %v8094_v31 = vld [vmem:[#allocation17 + $0x20] sm:$0xff]  ;;  %v8100_v17 = vld [vmem:[#allocation17 + $0x18] sm:$0xff] }
0x287b   :  { %5625 = vmatprep.subr.mxu1 %v8650_v23 }
0x287c   :  { %v3182_v25 = vrot.slane %v3181_v49, 2  ;;  %v3175_v38 = vrot.slane %v3174_v7, 2  ;;  %v2323_v57 = vpop.permute.xlu0 %2322  ;;  %5626 = vmatpush3.msra.mxu1 %v7836_v33 }
0x287d   :  { %2325 = vst.msk [vmem:[#allocation7] sm:$0x3] %vm131_vm5, %v2323_v57  ;;  %5627 = vmatprep.subr.mxu1 %v8650_v23 }
0x287e   :  { %v3183_v12 = vadd.f32 %v3182_v25, %v3181_v49  ;;  %v3176_v3 = vadd.f32 %v3175_v38, %v3174_v7  ;;  %5628 = vmatpush3.msra.mxu1 %v7840_v63  ;;  %v8108_v49 = vld [vmem:[#allocation17 + $0x8] sm:$0xff]  ;;  %v8112_v7 = vld [vmem:[#allocation17] sm:$0xff]  ;;  %v8122_v38 = vld [vmem:[%s8632_s9 + $0x78] sm:$0xff] }
0x287f   :  { %5629 = vmatprep.subr.mxu1 %v8650_v23 }
0x2880   :  { %v3184_v53 = vrot.slane %v3183_v12, 1  ;;  %v3177_v21 = vrot.slane %v3176_v3, 1  ;;  %v2962_v44 = vpop.permute.xlu0 %2961  ;;  %5630 = vmatpush3.msra.mxu1 %v7844_v46 }
0x2881   :  { %2964 = vst.msk [vmem:[#allocation5] sm:$0x3] %vm131_vm5, %v2962_v44  ;;  %5631 = vmatprep.subr.mxu1 %v8650_v23  ;;  %v8158_v44 = vld [vmem:[%s8632_s9 + $0x50] sm:$0xff] }
0x2882   :  { %v3185_v0 = vadd.f32 %v3184_v53, %v3183_v12  ;;  %v3178_v8 = vadd.f32 %v3177_v21, %v3176_v3  ;;  %5632 = vmatpush3.msra.mxu1 %v7849_v51  ;;  %v8128_v12 = vld [vmem:[%s8632_s9 + $0x70] sm:$0xff]  ;;  %v8137_v3 = vld [vmem:[%s8632_s9 + $0x68] sm:$0xff]  ;;  %v8144_v53 = vld [vmem:[%s8632_s9 + $0x60] sm:$0xff] }
0x2883   :  { %5633 = vmatprep.subr.mxu1 %v8650_v23  ;;  %v8151_v21 = vld [vmem:[%s8632_s9 + $0x58] sm:$0xff] }
0x2884   :  { %v3196_v1 = vsel %vm680_vm13, %v3185_v0, %v3178_v8  ;;  %v2795_v62 = vld [vmem:[#allocation7] sm:$0x3]  ;;  %5634 = vmatpush3.msra.mxu1 %v7859_v61  ;;  %v8165_v0 = vld [vmem:[%s8632_s9 + $0x48] sm:$0xff] }
0x2885   :  { %3197 = vrot.lane.b32.xlu1 %v3196_v1, %s6263_s29  ;;  %2804 = vrot.lane.b32.xlu0 %v2795_v62, %s6263_s29  ;;  %v8174_v8 = vld [vmem:[%s8632_s9 + $0x40] sm:$0xff]  ;;  %v8181_v1 = vld [vmem:[%s8632_s9 + $0x38] sm:$0xff] }
0x2886   :  { %5635 = vmatprep.subr.mxu1 %v8650_v23  ;;  %v8187_v62 = vld [vmem:[%s8632_s9 + $0x30] sm:$0xff] }
0x2887   :  { %5636 = vmatpush3.msra.mxu1 %v7863_v11 }
0x2888   :  { %v3434_v5 = vld [vmem:[#allocation5] sm:$0x3]  ;;  %5637 = vmatprep.subr.mxu1 %v8650_v23 }
0x2889   :  { %2809 = vrot.lane.b32.xlu1 %v6020_v4, %s6262_s5  ;;  %3443 = vrot.lane.b32.xlu0 %v3434_v5, %s6263_s29  ;;  %v8193_v4 = vld [vmem:[%s8632_s9 + $0x28] sm:$0xff]  ;;  %v8200_v5 = vld [vmem:[%s8632_s9 + $0x20] sm:$0xff] }
0x288a   :  { %5638 = vmatpush3.msra.mxu1 %v7867_v36 }
0x288b   :  { %5639 = vmatprep.subr.mxu1 %v8650_v23 }
0x288c   :  { %5640 = vmatpush3.msra.mxu1 %v7870_v22 }
0x288d   :  { %5641 = vmatprep.subr.mxu1 %v8650_v23 }
0x288e   :  { %5642 = vmatpush3.msra.mxu1 %v7875_v48 }
0x288f   :  { %5643 = vmatprep.subr.mxu1 %v8650_v23 }
0x2890   :  { %5644 = vmatpush3.msra.mxu1 %v7878_v50 }
0x2891   :  { %5645 = vmatprep.subr.mxu1 %v8650_v23 }
0x2892   :  { %5646 = vmatpush3.msra.mxu1 %v7881_v56  ;;  %v3187_v56 = vld [vmem:[#allocation8] sm:$0x3] }
0x2893   :  { %5679 = vmatprep.subr.mxu1 %v8650_v23 }
0x28f7   :  { %v8028_v43 = vpop.permute.xlu1 %3197  ;;  %v2805_v26 = vpop.permute.xlu0 %2804 }
0x28f8   :  { %3200 = vst.msk [vmem:[#allocation4] sm:$0x3] %vm685_vm14, %v8028_v43 }
0x28f9   :  { %3343 = vst.msk [vmem:[#allocation4] sm:$0x3] %vm131_vm5, %v3342_v13  ;;  %v8207_v13 = vld [vmem:[%s8632_s9 + $0x18] sm:$0xff] }
0x28fb   :  { %v2810_v9 = vpop.permute.xlu1 %2809  ;;  %v3444_v35 = vpop.permute.xlu0 %3443 }
0x2900   :  { %v3344_v10 = vld [vmem:[#allocation4] sm:$0x3] }
0x2901   :  { %5677 = vmatmul.mubr.msk.f32.vlgmr.msra.gmra.mxu0 %vm332_vm7, %v3344_v10  ;;  %v8214_v10 = vld [vmem:[%s8632_s9 + $0x10] sm:$0xff] }
0x2902   :  { %5755 = vmatprep.mubr.msk.f32.mxu0 %vm6261_vm6, %v8650_v23 }
0x29c1   :  { %v3430_v32 = vpop.f32.mrf.mxu0 }
0x29c2   :  { %6023 = vtanh.f32 %v3430_v32  ;;  %v4533_v19 = vmul.f32 -1.442695, %v3430_v32 }
0x29c3   :  { %v5678_v39 = vpop.f32.mrf.mxu0  ;;  %6025 = vrcp.f32 %v2799_v28 }
0x29c4   :  { %6027 = vpow2.f32 %v4533_v19  ;;  %v3484_v39 = vld [vmem:[%s8625_s2] sm:$0x3] }
0x29c5   :  { %v3575_v19 = vld [vmem:[%s8626_s3] sm:$0x3] }
0x29cf   :  { %v6024_v27 = vpop.eup %6023 }
0x29d0   :  { %3448 = vrot.lane.b32.xlu1 %v6024_v27, %s6262_s5  ;;  %v6026_v58 = vpop.eup %6025 }
0x29d1   :  { %v2812_v18 = vmul.f32 %v6026_v58, %v2810_v9  ;;  %v6028_v20 = vpop.eup %6027  ;;  %v2807_v52 = vmul.f32 %v6026_v58, %v2805_v26 }
0x29d2   :  { %v3438_v24 = vadd.f32 1.0, %v6028_v20 }
0x29d4   :  { %2814 = vrot.lane.b32.xlu1 %v2812_v18, %s6263_s29  ;;  %6029 = vrcp.f32 %v3438_v24 }
0x29e1   :  { %v6030_v30 = vpop.eup %6029 }
0x29e2   :  { %v3446_v33 = vmul.f32 %v6030_v30, %v3444_v35 }
0x2a42   :  { %v3449_v55 = vpop.permute.xlu1 %3448 }
0x2a43   :  { %v3451_v47 = vmul.f32 %v6030_v30, %v3449_v55 }
0x2a45   :  { %3453 = vrot.lane.b32.xlu1 %v3451_v47, %s6263_s29 }
0x2a46   :  { %v2815_v2 = vpop.permute.xlu1 %2814 }
0x2a47   :  { %v8040_v6 = vadd.f32 %v2815_v2, %v2807_v52 }
0x2a49   :  { %6031 = vtanh.f32 %v8040_v6 }
0x2a56   :  { %v6032_v40 = vpop.eup %6031 }
0x2a57   :  { %2820 = vrot.lane.b32.xlu0 %v6032_v40, %s6262_s5 }
0x2ab7   :  { %v3454_v63 = vpop.permute.xlu1 %3453 }
0x2ab8   :  { %v8070_v46 = vadd.f32 %v3454_v63, %v3446_v33 }
0x2aba   :  { %6033 = vtanh.f32 %v8070_v46 }
0x2ac7   :  { %v6034_v51 = vpop.eup %6033 }
0x2ac8   :  { %3459 = vrot.lane.b32.xlu1 %v6034_v51, %s6262_s5 }
0x2ac9   :  { %v2821_v61 = vpop.permute.xlu0 %2820 }
0x2aca   :  { %v8074_v11 = vmul.f32 %v6026_v58, %v2821_v61  ;;  %v3860_v61 = vld [vmem:[%s8629_s6 + $0x60] sm:$0x1] }
0x2acc   :  { %2830 = vrot.lane.b32.xlu0 %v8074_v11, %s6265_s16  ;;  %3203 = vrot.lane.b32.xlu1 %v7898_v54, %s6263_s29 }
0x2ad0   :  { %3189 = vrot.lane.b32.xlu0 %v7970_v34, %s6254_s14  ;;  %v8091_v34 = vld [vmem:[#allocation17 + $0x28] sm:$0xff] }
0x2b3a   :  { %v3460_v36 = vpop.permute.xlu1 %3459 }
0x2b3b   :  { %v8082_v22 = vmul.f32 %v6030_v30, %v3460_v36  ;;  %v3859_v36 = vld [vmem:[%s8629_s6 + $0x58] sm:$0xff] }
0x2b3d   :  { %3473 = vrot.lane.b32.xlu1 %v8082_v22, %s6264_s15 }
0x2b3e   :  { %v2831_v48 = vpop.permute.xlu0 %2830  ;;  %v3204_v50 = vpop.permute.xlu1 %3203 }
0x2b3f   :  { %2833 = vst.msk [vmem:[#allocation6] sm:$0x3] %vm448_vm12, %v2831_v48  ;;  %v3858_v48 = vld [vmem:[%s8629_s6 + $0x50] sm:$0xff] }
0x2b40   :  { %3206 = vst.msk [vmem:[#allocation6] sm:$0x3] %vm131_vm5, %v3204_v50  ;;  %v3857_v50 = vld [vmem:[%s8629_s6 + $0x48] sm:$0xff] }
0x2b41   :  { %3207 = vst.msk [vmem:[#allocation6] sm:$0x3] %vm685_vm14, %v8028_v43 }
0x2b42   :  { %v3190_v54 = vpop.permute.xlu0 %3189 }
0x2b43   :  { %v3192_v45 = vadd.f32 %v3190_v54, %v3187_v56  ;;  %v3855_v56 = vld [vmem:[%s8629_s6 + $0x38] sm:$0xff]  ;;  %v3853_v54 = vld [vmem:[%s8629_s6 + $0x28] sm:$0xff] }
0x2b45   :  { %3193 = vst.msk [vmem:[#allocation8] sm:$0x3] %vm676_vm15, %v3192_v45  ;;  %v8295_v45 = vld [vmem:[#allocation12 + $0x8] sm:$0xff] }
0x2b48   :  { %v3208_v14 = vld [vmem:[#allocation6] sm:$0x3] }
0x2b49   :  { %5648 = vmatmul.mubr.msk.f32.vlgmr.msra.gmra.mxu1 %vm332_vm7, %v3208_v14  ;;  %v8297_v14 = vld [vmem:[#allocation12] sm:$0xff] }
0x2b4a   :  { %5680 = vmatpush3.msra.mxu1 %v8091_v34  ;;  %5691 = vmatprep.mubr.msk.f32.mxu1 %vm6261_vm6, %v8650_v23 }
0x2b4b   :  { %5681 = vmatprep.subr.mxu1 %v8650_v23 }
0x2b4c   :  { %5682 = vmatpush3.msra.mxu1 %v8094_v31 }
0x2b4d   :  { %5683 = vmatprep.subr.mxu1 %v8650_v23 }
0x2b4e   :  { %5684 = vmatpush3.msra.mxu1 %v8100_v17 }
0x2b4f   :  { %5685 = vmatprep.subr.mxu1 %v8650_v23 }
0x2b50   :  { %5686 = vmatpush3.msra.mxu1 %v8104_v60 }
0x2b51   :  { %5687 = vmatprep.subr.mxu1 %v8650_v23 }
0x2b52   :  { %5688 = vmatpush3.msra.mxu1 %v8108_v49 }
0x2b53   :  { %5689 = vmatprep.subr.mxu1 %v8650_v23 }
0x2b54   :  { %5690 = vmatpush3.msra.mxu1 %v8112_v7 }
0x2b55   :  { %5694 = vmatprep.subr.mxu1 %v8650_v23 }
0x2baf   :  { %v3474_v25 = vpop.permute.xlu1 %3473 }
0x2bb0   :  { %3476 = vst.msk [vmem:[#allocation8] sm:$0x3] %vm453_vm9, %v3474_v25 }
0x2bb7   :  { %v3477_v57 = vld [vmem:[#allocation8] sm:$0x3] }
0x2bb8   :  { %5692 = vmatmul.mubr.msk.f32.vlgmr.msra.gmra.mxu1 %vm463_vm10, %v3477_v57 }
0x2bb9   :  { %5695 = vmatpush3.msra.mxu1 %v8122_v38  ;;  %5726 = vmatprep.mubr.msk.f32.mxu1 %vm6261_vm6, %v8650_v23 }
0x2bba   :  { %5696 = vmatprep.subr.mxu1 %v8650_v23 }
0x2bbb   :  { %5697 = vmatpush3.msra.mxu1 %v8128_v12 }
0x2bbc   :  { %5698 = vmatprep.subr.mxu1 %v8650_v23 }
0x2bbd   :  { %5699 = vmatpush3.msra.mxu1 %v8137_v3 }
0x2bbe   :  { %5700 = vmatprep.subr.mxu1 %v8650_v23 }
0x2bbf   :  { %5701 = vmatpush3.msra.mxu1 %v8144_v53 }
0x2bc0   :  { %5702 = vmatprep.subr.mxu1 %v8650_v23 }
0x2bc1   :  { %5703 = vmatpush3.msra.mxu1 %v8151_v21 }
0x2bc2   :  { %5704 = vmatprep.subr.mxu1 %v8650_v23 }
0x2bc3   :  { %5705 = vmatpush3.msra.mxu1 %v8158_v44 }
0x2bc4   :  { %5706 = vmatprep.subr.mxu1 %v8650_v23 }
0x2bc5   :  { %5707 = vmatpush3.msra.mxu1 %v8165_v0 }
0x2bc6   :  { %5708 = vmatprep.subr.mxu1 %v8650_v23 }
0x2bc7   :  { %5709 = vmatpush3.msra.mxu1 %v8174_v8 }
0x2bc8   :  { %5710 = vmatprep.subr.mxu1 %v8650_v23 }
0x2bc9   :  { %5711 = vmatpush3.msra.mxu1 %v8181_v1 }
0x2bca   :  { %5712 = vmatprep.subr.mxu1 %v8650_v23 }
0x2bcb   :  { %5713 = vmatpush3.msra.mxu1 %v8187_v62 }
0x2bcc   :  { %5714 = vmatprep.subr.mxu1 %v8650_v23 }
0x2bcd   :  { %5715 = vmatpush3.msra.mxu1 %v8193_v4 }
0x2bce   :  { %5716 = vmatprep.subr.mxu1 %v8650_v23 }
0x2bcf   :  { %5717 = vmatpush3.msra.mxu1 %v8200_v5 }
0x2bd0   :  { %5718 = vmatprep.subr.mxu1 %v8650_v23 }
0x2bd1   :  { %5719 = vmatpush3.msra.mxu1 %v8207_v13 }
0x2bd2   :  { %5720 = vmatprep.subr.mxu1 %v8650_v23 }
0x2bd3   :  { %5721 = vmatpush3.msra.mxu1 %v8214_v10 }
0x2bd4   :  { %5722 = vmatprep.subr.mxu1 %v8650_v23 }
0x2bd5   :  { %5723 = vmatpush3.msra.mxu1 %v8221_v16 }
0x2bd6   :  { %5724 = vmatprep.subr.mxu1 %v8650_v23 }
0x2bd7   :  { %5725 = vmatpush3.msra.mxu1 %v8228_v15 }
0x2bd8   :  { %5758 = vmatprep.subr.mxu1 %v8650_v23 }
0x2c09   :  { %v8232_v28 = vpop.f32.mrf.mxu1 }
0x2c0b   :  { %v5649_v32 = vpop.f32.mrf.mxu1 }
0x2c78   :  { %v3554_v27 = vpop.f32.mrf.mxu1 }
0x2c79   :  { %v3555_v9 = vadd.f32 %v3554_v27, %v3484_v39 }
0x2c7a   :  { %v5693_v58 = vpop.f32.mrf.mxu1 }
0x2c7b   :  { %6035 = vtanh.f32 %v3555_v9 }
0x2c88   :  { %v6036_v18 = vpop.eup %6035 }
0x2c89   :  { %5727 = vmatmul.mubr.f32.vlgmr.msra.gmra.mxu1 %v6036_v18 }
0x2c8a   :  { %5784 = vmatprep.mubr.msk.f32.mxu1 %vm6261_vm6, %v8650_v23  ;;  %5759 = vmatpush3.msk.msra.mxu1 %vm336_vm1, %v3860_v61 }
0x2c8b   :  { %5760 = vmatprep.subr.mxu1 %v8650_v23 }
0x2c8c   :  { %5761 = vmatpush3.msra.mxu1 %v3859_v36 }
0x2c8d   :  { %5762 = vmatprep.subr.mxu1 %v8650_v23 }
0x2c8e   :  { %5763 = vmatpush3.msra.mxu1 %v3858_v48 }
0x2c8f   :  { %5764 = vmatprep.subr.mxu1 %v8650_v23 }
0x2c90   :  { %5765 = vmatpush3.msra.mxu1 %v3857_v50 }
0x2c91   :  { %5766 = vmatprep.subr.mxu1 %v8650_v23 }
0x2d49   :  { %v3642_v20 = vpop.f32.mrf.mxu1 }
0x2d4a   :  { %v3643_v24 = vadd.f32 %v3642_v20, %v3575_v19  ;;  %v3852_v20 = vld [vmem:[%s8629_s6 + $0x20] sm:$0xff] }
0x2d4b   :  { %v5728_v30 = vpop.f32.mrf.mxu1 }
0x2d4c   :  { %v3646_v26 = vsel %vm625_vm11, %v3643_v24, -inf }
0x2d4d   :  { %3647 = vmax.xlane.f32.xlu0 %v3646_v26 }
0x2dd6   :  { %v3648_v55 = vpop.xlane.xlu0 %3647 }
0x2dd7   :  { %v3649_v47 = vsub.f32 %v3643_v24, %v3648_v55  ;;  %v3851_v24 = vld [vmem:[%s8629_s6 + $0x18] sm:$0xff] }
0x2dd9   :  { %v3650_v52 = vmul.f32 1.442695, %v3649_v47 }
0x2ddb   :  { %6037 = vpow2.f32 %v3650_v52 }
0x2de8   :  { %v6038_v2 = vpop.eup %6037 }
0x2de9   :  { %v3652_v29 = vsel %vm625_vm11, %v6038_v2, 0.0 }
0x2dea   :  { %3653 = vadd.xlane.f32.xlu1 %v3652_v29  ;;  %v3849_v29 = vld [vmem:[%s8629_s6 + $0x8] sm:$0xff] }
0x2e73   :  { %v3654_v40 = vpop.xlane.xlu1 %3653 }
0x2e74   :  { %6039 = vrcp.f32 %v3654_v40 }
0x2e75   :  { %6041 = vtanh.f32 %v8232_v28 }
0x2e81   :  { %v6040_v35 = vpop.eup %6039 }
0x2e82   :  { %v8246_v33 = vmul.f32 %v6040_v35, %v6038_v2  ;;  %v3850_v2 = vld [vmem:[%s8629_s6 + $0x10] sm:$0xff] }
0x2e84   :  { %3705 = vst.msk [vmem:[#allocation21 + $0xc] sm:$0x3] %vm625_vm11, %v8246_v33  ;;  %3689 = vst.msk [vmem:[#allocation8] sm:$0x3] %vm625_vm11, %v8246_v33  ;;  %v3667_v63 = vrot.slane %v8246_v33, %v6658_v41  ;;  %v3660_v51 = vrot.slane %v8246_v33, %v6660_v42 }
0x2e86   :  { %3669 = vbcast.lane.b32.xlu1 %v3667_v63, 256  ;;  %3662 = vbcast.lane.b32.xlu0 %v3660_v51, 256  ;;  %v3848_v63 = vld [vmem:[%s8629_s6] sm:$0xff] }
0x2e8a   :  { %3469 = vrot.lane.b32.xlu0 %v8082_v22, %s6265_s16 }
0x2e8e   :  { %2825 = vrot.lane.b32.xlu0 %v8040_v6, %s6265_s16  ;;  %v3856_v6 = vld [vmem:[%s8629_s6 + $0x40] sm:$0xff] }
0x2e8f   :  { %5767 = vmatpush3.msra.mxu1 %v3856_v6 }
0x2e90   :  { %5768 = vmatprep.subr.mxu1 %v8650_v23 }
0x2e91   :  { %5769 = vmatpush3.msra.mxu1 %v3855_v56 }
0x2e92   :  { %3464 = vrot.lane.b32.xlu0 %v8070_v46, %s6265_s16  ;;  %v3854_v46 = vld [vmem:[%s8629_s6 + $0x30] sm:$0xff]  ;;  %5770 = vmatprep.subr.mxu1 %v8650_v23 }
0x2e93   :  { %5771 = vmatpush3.msra.mxu1 %v3854_v46  ;;  %v6042_v46 = vpop.eup %6041 }
0x2e94   :  { %5772 = vmatprep.subr.mxu1 %v8650_v23 }
0x2e95   :  { %5773 = vmatpush3.msra.mxu1 %v3853_v54 }
0x2e96   :  { %5774 = vmatprep.subr.mxu1 %v8650_v23 }
0x2e97   :  { %5775 = vmatpush3.msra.mxu1 %v3852_v20 }
0x2e98   :  { %5776 = vmatprep.subr.mxu1 %v8650_v23 }
0x2e99   :  { %5777 = vmatpush3.msra.mxu1 %v3851_v24 }
0x2e9a   :  { %5778 = vmatprep.subr.mxu1 %v8650_v23 }
0x2e9b   :  { %5779 = vmatpush3.msra.mxu1 %v3850_v2 }
0x2e9c   :  { %5780 = vmatprep.subr.mxu1 %v8650_v23 }
0x2e9d   :  { %5781 = vmatpush3.msra.mxu1 %v3849_v29 }
0x2e9e   :  { %5782 = vmatprep.subr.mxu1 %v8650_v23 }
0x2e9f   :  { %5783 = vmatpush3.msra.mxu1 %v3848_v63 }
0x2ea0   :  { %5837 = vmatprep.subr.mxu1 %v8650_v23 }
0x2ef8   :  { %v3670_v25 = vpop.permute.xlu1 %3669  ;;  %v3663_v57 = vpop.permute.xlu0 %3662 }
0x2ef9   :  { %v3674_v32 = vmul.f32 %v8295_v45, %v3670_v25  ;;  %v3673_v39 = vmul.f32 %v8297_v14, %v3663_v57  ;;  %v3845_v57 = vld [vmem:[#allocation2 + $0xe] sm:$0x3] }
0x2efb   :  { %v3682_v27 = vsel %vm230_vm2, %v3674_v32, 0.0  ;;  %v3675_v9 = vsel %vm230_vm2, %v3673_v39, 0.0  ;;  %v4530_v39 = vmul.f32 -1.442695, %v8232_v28 }
0x2efc   :  { %v3683_v58 = vrot.slane %v3682_v27, 4  ;;  %v3676_v18 = vrot.slane %v3675_v9, 4  ;;  %v3470_v19 = vpop.permute.xlu0 %3469 }
0x2efd   :  { %3472 = vst.msk [vmem:[#allocation4] sm:$0x3] %vm448_vm12, %v3470_v19  ;;  %6043 = vpow2.f32 %v4530_v39  ;;  %v8381_v39 = vld [vmem:[#allocation15 + $0x30] sm:$0xff] }
0x2efe   :  { %v3684_v30 = vadd.f32 %v3683_v58, %v3682_v27  ;;  %v3677_v26 = vadd.f32 %v3676_v18, %v3675_v9 }
0x2f00   :  { %v3685_v55 = vrot.slane %v3684_v30, 2  ;;  %v3678_v47 = vrot.slane %v3677_v26, 2  ;;  %v2826_v52 = vpop.permute.xlu0 %2825 }
0x2f01   :  { %2828 = vst.msk [vmem:[#allocation7] sm:$0x3] %vm131_vm5, %v2826_v52 }
0x2f02   :  { %v3686_v40 = vadd.f32 %v3685_v55, %v3684_v30  ;;  %v3679_v35 = vadd.f32 %v3678_v47, %v3677_v26 }
0x2f04   :  { %v3687_v51 = vrot.slane %v3686_v40, 1  ;;  %v3680_v61 = vrot.slane %v3679_v35, 1  ;;  %v3465_v36 = vpop.permute.xlu0 %3464 }
0x2f05   :  { %3467 = vst.msk [vmem:[#allocation5] sm:$0x3] %vm131_vm5, %v3465_v36  ;;  %v8358_v36 = vld [vmem:[#allocation15 + $0x50] sm:$0xff] }
0x2f06   :  { %v3688_v48 = vadd.f32 %v3687_v51, %v3686_v40  ;;  %v3681_v50 = vadd.f32 %v3680_v61, %v3679_v35  ;;  %v3724_v51 = vld [vmem:[#allocation15 + $0x60] sm:$0x1]  ;;  %v8354_v61 = vld [vmem:[#allocation15 + $0x58] sm:$0xff] }
0x2f07   :  { %5730 = vmatpush3.msk.msra.mxu0 %vm336_vm1, %v3724_v51 }
0x2f08   :  { %v3699_v6 = vsel %vm680_vm13, %v3688_v48, %v3681_v50  ;;  %v3298_v56 = vld [vmem:[#allocation7] sm:$0x3]  ;;  %5731 = vmatprep.subr.mxu0 %v8650_v23 }
0x2f09   :  { %3700 = vrot.lane.b32.xlu1 %v3699_v6, %s6263_s29  ;;  %3307 = vrot.lane.b32.xlu0 %v3298_v56, %s6263_s29  ;;  %v8362_v48 = vld [vmem:[#allocation15 + $0x48] sm:$0xff]  ;;  %v8366_v6 = vld [vmem:[#allocation15 + $0x40] sm:$0xff]  ;;  %v8371_v56 = vld [vmem:[#allocation15 + $0x38] sm:$0xff] }
0x2f0a   :  { %v6044_v27 = vpop.eup %6043  ;;  %5732 = vmatpush3.msra.mxu0 %v8354_v61 }
0x2f0b   :  { %v3302_v9 = vadd.f32 1.0, %v6044_v27  ;;  %5733 = vmatprep.subr.mxu0 %v8650_v23  ;;  %v8385_v27 = vld [vmem:[#allocation15 + $0x28] sm:$0xff] }
0x2f0c   :  { %v3937_v54 = vld [vmem:[#allocation5] sm:$0x3]  ;;  %5734 = vmatpush3.msra.mxu0 %v8358_v36 }
0x2f0d   :  { %3312 = vrot.lane.b32.xlu1 %v6042_v46, %s6262_s5  ;;  %3946 = vrot.lane.b32.xlu0 %v3937_v54, %s6263_s29 }
0x2f0e   :  { %5735 = vmatprep.subr.mxu0 %v8650_v23 }
0x2f0f   :  { %5736 = vmatpush3.msra.mxu0 %v8362_v48 }
0x2f10   :  { %5737 = vmatprep.subr.mxu0 %v8650_v23 }
0x2f11   :  { %5738 = vmatpush3.msra.mxu0 %v8366_v6 }
0x2f12   :  { %5739 = vmatprep.subr.mxu0 %v8650_v23 }
0x2f13   :  { %5740 = vmatpush3.msra.mxu0 %v8371_v56 }
0x2f14   :  { %5741 = vmatprep.subr.mxu0 %v8650_v23 }
0x2f15   :  { %5742 = vmatpush3.msra.mxu0 %v8381_v39 }
0x2f16   :  { %5743 = vmatprep.subr.mxu0 %v8650_v23 }
0x2f17   :  { %5744 = vmatpush3.msra.mxu0 %v8385_v27 }
0x2f18   :  { %5745 = vmatprep.subr.mxu0 %v8650_v23 }
0x2f7b   :  { %v8332_v25 = vpop.permute.xlu1 %3700  ;;  %v3308_v52 = vpop.permute.xlu0 %3307 }
0x2f7c   :  { %3703 = vst.msk [vmem:[#allocation4] sm:$0x3] %vm685_vm14, %v8332_v25 }
0x2f7d   :  { %3846 = vst.msk [vmem:[#allocation4] sm:$0x3] %vm131_vm5, %v3845_v57 }
0x2f7f   :  { %v3313_v20 = vpop.permute.xlu1 %3312  ;;  %v3947_v46 = vpop.permute.xlu0 %3946 }
0x2f84   :  { %v3847_v32 = vld [vmem:[#allocation4] sm:$0x3] }
0x2f85   :  { %5785 = vmatmul.mubr.msk.f32.vlgmr.msra.gmra.mxu1 %vm332_vm7, %v3847_v32 }
0x2f86   :  { %5863 = vmatprep.mubr.msk.f32.mxu1 %vm6261_vm6, %v8650_v23 }
0x3045   :  { %v3933_v58 = vpop.f32.mrf.mxu1 }
0x3046   :  { %6045 = vtanh.f32 %v3933_v58  ;;  %v4540_v26 = vmul.f32 -1.442695, %v3933_v58  ;;  %v8392_v58 = vld [vmem:[#allocation15 + $0x18] sm:$0xff] }
0x3047   :  { %v5786_v18 = vpop.f32.mrf.mxu1  ;;  %6047 = vrcp.f32 %v3302_v9  ;;  %v8389_v9 = vld [vmem:[#allocation15 + $0x20] sm:$0xff] }
0x3048   :  { %6049 = vpow2.f32 %v4540_v26  ;;  %5746 = vmatpush3.msra.mxu0 %v8389_v9  ;;  %v8397_v18 = vld [vmem:[#allocation15 + $0x10] sm:$0xff] }
0x3049   :  { %5747 = vmatprep.subr.mxu0 %v8650_v23 }
0x304a   :  { %5748 = vmatpush3.msra.mxu0 %v8392_v58 }
0x304b   :  { %5749 = vmatprep.subr.mxu0 %v8650_v23 }
0x304c   :  { %5750 = vmatpush3.msra.mxu0 %v8397_v18 }
0x304d   :  { %5751 = vmatprep.subr.mxu0 %v8650_v23 }
0x3053   :  { %v6046_v19 = vpop.eup %6045 }
0x3054   :  { %3951 = vrot.lane.b32.xlu1 %v6046_v19, %s6262_s5  ;;  %v8342_v24 = vpop.eup %6047  ;;  %v8400_v19 = vld [vmem:[#allocation15 + $0x8] sm:$0xff] }
0x3055   :  { %v3315_v30 = vmul.f32 %v8342_v24, %v3313_v20  ;;  %v6050_v28 = vpop.eup %6049  ;;  %v3310_v40 = vmul.f32 %v8342_v24, %v3308_v52  ;;  %v8403_v20 = vld [vmem:[#allocation15] sm:$0xff]  ;;  %5752 = vmatpush3.msra.mxu0 %v8400_v19 }
0x3056   :  { %v3941_v55 = vadd.f32 1.0, %v6050_v28  ;;  %5753 = vmatprep.subr.mxu0 %v8650_v23 }
0x3057   :  { %5754 = vmatpush3.msra.mxu0 %v8403_v20 }
0x3058   :  { %3317 = vrot.lane.b32.xlu1 %v3315_v30, %s6263_s29  ;;  %6051 = vrcp.f32 %v3941_v55  ;;  %5787 = vmatprep.subr.mxu0 %v8650_v23 }
0x3065   :  { %v8346_v47 = vpop.eup %6051 }
0x3066   :  { %v3949_v54 = vmul.f32 %v8346_v47, %v3947_v46 }
0x30c6   :  { %v3952_v2 = vpop.permute.xlu1 %3951 }
0x30c7   :  { %v3954_v29 = vmul.f32 %v8346_v47, %v3952_v2 }
0x30c9   :  { %3956 = vrot.lane.b32.xlu1 %v3954_v29, %s6263_s29 }
0x30ca   :  { %v3318_v35 = vpop.permute.xlu1 %3317 }
0x30cb   :  { %v8351_v63 = vadd.f32 %v3318_v35, %v3310_v40 }
0x30cd   :  { %6053 = vtanh.f32 %v8351_v63 }
0x30da   :  { %v6054_v50 = vpop.eup %6053 }
0x30db   :  { %3323 = vrot.lane.b32.xlu0 %v6054_v50, %s6262_s5 }
0x313b   :  { %v3957_v57 = vpop.permute.xlu1 %3956 }
0x313c   :  { %v8378_v32 = vadd.f32 %v3957_v57, %v3949_v54 }
0x313e   :  { %6055 = vtanh.f32 %v8378_v32 }
0x314b   :  { %v6056_v30 = vpop.eup %6055 }
0x314c   :  { %3962 = vrot.lane.b32.xlu1 %v6056_v30, %s6262_s5 }
0x314d   :  { %v3324_v26 = vpop.permute.xlu0 %3323 }
0x314e   :  { %v8410_v28 = vmul.f32 %v8342_v24, %v3324_v26 }
0x3150   :  { %3333 = vrot.lane.b32.xlu0 %v8410_v28, %s6265_s16  ;;  %3706 = vrot.lane.b32.xlu1 %v8082_v22, %s6263_s29  ;;  %v3690_v22 = vld [vmem:[#allocation8] sm:$0x3] }
0x3154   :  { %3692 = vrot.lane.b32.xlu0 %v8246_v33, %s6254_s14 }
0x31be   :  { %v3963_v55 = vpop.permute.xlu1 %3962 }
0x31bf   :  { %v8420_v52 = vmul.f32 %v8346_v47, %v3963_v55 }
0x31c1   :  { %3976 = vrot.lane.b32.xlu1 %v8420_v52, %s6264_s15 }
0x31c2   :  { %v3334_v24 = vpop.permute.xlu0 %3333  ;;  %v3707_v2 = vpop.permute.xlu1 %3706 }
0x31c3   :  { %3336 = vst.msk [vmem:[#allocation6] sm:$0x3] %vm448_vm12, %v3334_v24 }
0x31c4   :  { %3709 = vst.msk [vmem:[#allocation6] sm:$0x3] %vm131_vm5, %v3707_v2 }
0x31c5   :  { %3710 = vst.msk [vmem:[#allocation6] sm:$0x3] %vm685_vm14, %v8332_v25  ;;  %3328 = vrot.lane.b32.xlu1 %v8351_v63, %s6265_s16 }
0x31c6   :  { %v3693_v33 = vpop.permute.xlu0 %3692 }
0x31c7   :  { %v3695_v29 = vadd.f32 %v3693_v33, %v3690_v22 }
0x31c9   :  { %3696 = vst.msk [vmem:[#allocation8] sm:$0x3] %vm676_vm15, %v3695_v29 }
0x31cc   :  { %v3711_v47 = vld [vmem:[#allocation6] sm:$0x3] }
0x31cd   :  { %5756 = vmatmul.mubr.msk.f32.vlgmr.msra.gmra.mxu0 %vm332_vm7, %v3711_v47  ;;  %v4227_v47 = vld [vmem:[#allocation15 + $0x60] sm:$0x1] }
0x31ce   :  { %5788 = vmatpush3.msra.mxu0 %v8091_v34  ;;  %5799 = vmatprep.mubr.msk.f32.mxu0 %vm6261_vm6, %v8650_v23 }
0x31cf   :  { %5789 = vmatprep.subr.mxu0 %v8650_v23  ;;  %5838 = vmatpush3.msk.msra.mxu1 %vm336_vm1, %v4227_v47  ;;  %v4351_v47 = vld [vmem:[#allocation18 + $0x8] sm:$0xff] }
0x31d0   :  { %5790 = vmatpush3.msra.mxu0 %v8094_v31  ;;  %5839 = vmatprep.subr.mxu1 %v8650_v23 }
0x31d1   :  { %5791 = vmatprep.subr.mxu0 %v8650_v23  ;;  %5840 = vmatpush3.msra.mxu1 %v8354_v61 }
0x31d2   :  { %5792 = vmatpush3.msra.mxu0 %v8100_v17  ;;  %5841 = vmatprep.subr.mxu1 %v8650_v23 }
0x31d3   :  { %5793 = vmatprep.subr.mxu0 %v8650_v23  ;;  %5842 = vmatpush3.msra.mxu1 %v8358_v36 }
0x31d4   :  { %5794 = vmatpush3.msra.mxu0 %v8104_v60  ;;  %5843 = vmatprep.subr.mxu1 %v8650_v23 }
0x31d5   :  { %5795 = vmatprep.subr.mxu0 %v8650_v23  ;;  %5844 = vmatpush3.msra.mxu1 %v8362_v48 }
0x31d6   :  { %5796 = vmatpush3.msra.mxu0 %v8108_v49  ;;  %5845 = vmatprep.subr.mxu1 %v8650_v23 }
0x31d7   :  { %5797 = vmatprep.subr.mxu0 %v8650_v23  ;;  %5846 = vmatpush3.msra.mxu1 %v8366_v6 }
0x31d8   :  { %5798 = vmatpush3.msra.mxu0 %v8112_v7  ;;  %5847 = vmatprep.subr.mxu1 %v8650_v23 }
0x31d9   :  { %5802 = vmatprep.subr.mxu0 %v8650_v23  ;;  %5848 = vmatpush3.msra.mxu1 %v8371_v56 }
0x31da   :  { %5849 = vmatprep.subr.mxu1 %v8650_v23 }
0x31db   :  { %5850 = vmatpush3.msra.mxu1 %v8381_v39 }
0x31dc   :  { %5851 = vmatprep.subr.mxu1 %v8650_v23 }
0x31dd   :  { %5852 = vmatpush3.msra.mxu1 %v8385_v27 }
0x31de   :  { %5853 = vmatprep.subr.mxu1 %v8650_v23 }
0x31df   :  { %5854 = vmatpush3.msra.mxu1 %v8389_v9 }
0x31e0   :  { %5855 = vmatprep.subr.mxu1 %v8650_v23 }
0x31e1   :  { %5856 = vmatpush3.msra.mxu1 %v8392_v58 }
0x31e2   :  { %5857 = vmatprep.subr.mxu1 %v8650_v23 }
0x31e3   :  { %5858 = vmatpush3.msra.mxu1 %v8397_v18 }
0x31e4   :  { %5859 = vmatprep.subr.mxu1 %v8650_v23 }
0x31e5   :  { %5860 = vmatpush3.msra.mxu1 %v8400_v19 }
0x31e6   :  { %5861 = vmatprep.subr.mxu1 %v8650_v23 }
0x31e7   :  { %5862 = vmatpush3.msra.mxu1 %v8403_v20 }
0x3233   :  { %v3977_v34 = vpop.permute.xlu1 %3976 }
0x3234   :  { %3979 = vst.msk [vmem:[#allocation8] sm:$0x3] %vm453_vm9, %v3977_v34 }
0x3237   :  { %v3329_v31 = vpop.permute.xlu1 %3328 }
0x3238   :  { %3331 = vst.msk [vmem:[#allocation7] sm:$0x3] %vm131_vm5, %v3329_v31 }
0x323b   :  { %v3980_v17 = vld [vmem:[#allocation8] sm:$0x3] }
0x323c   :  { %5800 = vmatmul.mubr.msk.f32.vlgmr.msra.gmra.mxu0 %vm463_vm10, %v3980_v17 }
0x323d   :  { %5803 = vmatpush3.msra.mxu0 %v8122_v38  ;;  %5834 = vmatprep.mubr.msk.f32.mxu0 %vm6261_vm6, %v8650_v23  ;;  %v3987_v38 = vld [vmem:[%s8625_s2] sm:$0x3]  ;;  %s6266_s2 = smov [#allocation21]  }
0x323e   :  { %5804 = vmatprep.subr.mxu0 %v8650_v23 }
0x323f   :  { %5805 = vmatpush3.msra.mxu0 %v8128_v12 }
0x3240   :  { %5806 = vmatprep.subr.mxu0 %v8650_v23 }
0x3241   :  { %5807 = vmatpush3.msra.mxu0 %v8137_v3 }
0x3242   :  { %5808 = vmatprep.subr.mxu0 %v8650_v23 }
0x3243   :  { %5809 = vmatpush3.msra.mxu0 %v8144_v53 }
0x3244   :  { %5810 = vmatprep.subr.mxu0 %v8650_v23 }
0x3245   :  { %5811 = vmatpush3.msra.mxu0 %v8151_v21 }
0x3246   :  { %5812 = vmatprep.subr.mxu0 %v8650_v23 }
0x3247   :  { %5813 = vmatpush3.msra.mxu0 %v8158_v44  ;;  %v4078_v44 = vld [vmem:[%s8626_s3] sm:$0x3]  ;;  %s4466_s3 = sshll.u32 %s6266_s2, 4  ;;  %s4467_s3 = int_to_ptr.vmem [resolvable:$true] %s4466_s3 }
0x3248   :  { %5814 = vmatprep.subr.mxu0 %v8650_v23  ;;  %p6204_p3 = scmp.lt.s32.totalorder %s4467_s3, %s4467_s3 }
0x3249   :  { %5815 = vmatpush3.msra.mxu0 %v8165_v0 }
0x324a   :  { %5816 = vmatprep.subr.mxu0 %v8650_v23 }
0x324b   :  { %5817 = vmatpush3.msra.mxu0 %v8174_v8 }
0x324c   :  { %5818 = vmatprep.subr.mxu0 %v8650_v23 }
0x324d   :  { %5819 = vmatpush3.msra.mxu0 %v8181_v1 }
0x324e   :  { %5820 = vmatprep.subr.mxu0 %v8650_v23 }
0x324f   :  { %5821 = vmatpush3.msra.mxu0 %v8187_v62 }
0x3250   :  { %5822 = vmatprep.subr.mxu0 %v8650_v23 }
0x3251   :  { %5823 = vmatpush3.msra.mxu0 %v8193_v4  ;;  %v3801_v4 = vld [vmem:[#allocation7] sm:$0x3] }
0x3252   :  { %5824 = vmatprep.subr.mxu0 %v8650_v23 }
0x3253   :  { %5825 = vmatpush3.msra.mxu0 %v8200_v5 }
0x3254   :  { %5826 = vmatprep.subr.mxu0 %v8650_v23 }
0x3255   :  { %5827 = vmatpush3.msra.mxu0 %v8207_v13 }
0x3256   :  { %5828 = vmatprep.subr.mxu0 %v8650_v23 }
0x3257   :  { %5829 = vmatpush3.msra.mxu0 %v8214_v10 }
0x3258   :  { %5830 = vmatprep.subr.mxu0 %v8650_v23 }
0x3259   :  { %5831 = vmatpush3.msra.mxu0 %v8221_v16 }
0x325a   :  { %5832 = vmatprep.subr.mxu0 %v8650_v23 }
0x325b   :  { %5833 = vmatpush3.msra.mxu0 %v8228_v15 }
0x328d   :  { %v3797_v60 = vpop.f32.mrf.mxu0 }
0x328e   :  { %6057 = vtanh.f32 %v3797_v60  ;;  %v4537_v5 = vmul.f32 -1.442695, %v3797_v60 }
0x328f   :  { %v5757_v49 = vpop.f32.mrf.mxu0 }
0x329b   :  { %v6058_v7 = vpop.eup %6057 }
0x329c   :  { %3815 = vrot.lane.b32.xlu1 %v6058_v7, %s6262_s5 }
0x32fc   :  { %v4057_v12 = vpop.f32.mrf.mxu0 }
0x32fd   :  { %v4058_v3 = vadd.f32 %v4057_v12, %v3987_v38 }
0x32fe   :  { %v5801_v53 = vpop.f32.mrf.mxu0 }
0x32ff   :  { %6059 = vtanh.f32 %v4058_v3 }
0x3300   :  { %6061 = vpow2.f32 %v4537_v5 }
0x330c   :  { %v6060_v21 = vpop.eup %6059 }
0x330d   :  { %5835 = vmatmul.mubr.f32.vlgmr.msra.gmra.mxu0 %v6060_v21  ;;  %v6062_v15 = vpop.eup %6061 }
0x330e   :  { %v3805_v40 = vadd.f32 1.0, %v6062_v15  ;;  %v3816_v51 = vpop.permute.xlu1 %3815 }
0x33cd   :  { %v4145_v0 = vpop.f32.mrf.mxu0 }
0x33ce   :  { %v4146_v8 = vadd.f32 %v4145_v0, %v4078_v44 }
0x33cf   :  { %v5836_v1 = vpop.f32.mrf.mxu0 }
0x33d0   :  { %v4149_v62 = vsel %vm625_vm11, %v4146_v8, -inf }
0x33d1   :  { %4150 = vmax.xlane.f32.xlu0 %v4149_v62 }
0x33e7   :  { %3810 = vrot.lane.b32.xlu0 %v3801_v4, %s6263_s29 }
0x345a   :  { %v4151_v13 = vpop.xlane.xlu0 %4150 }
0x345b   :  { %v4152_v10 = vsub.f32 %v4146_v8, %v4151_v13 }
0x345d   :  { %v4153_v16 = vmul.f32 1.442695, %v4152_v10  ;;  %v8654_v10 = vld [vmem:[#allocation34_spill] sm:$0xff] }
0x345e   :  { %v3811_v57 = vpop.permute.xlu0 %3810 }
0x345f   :  { %6063 = vpow2.f32 %v4153_v16 }
0x3460   :  { %6065 = vrcp.f32 %v3805_v40 }
0x346c   :  { %v6064_v35 = vpop.eup %6063 }
0x346d   :  { %v4155_v63 = vsel %vm625_vm11, %v6064_v35, 0.0  ;;  %v6066_v50 = vpop.eup %6065 }
0x346e   :  { %4156 = vadd.xlane.f32.xlu1 %v4155_v63  ;;  %v3818_v46 = vmul.f32 %v6066_v50, %v3816_v51  ;;  %v3813_v26 = vmul.f32 %v6066_v50, %v3811_v57  ;;  %v8655_v63 = vld [vmem:[#allocation29_spill] sm:$0xff]  ;;  %v8656_v51 = vld [vmem:[#allocation31_spill] sm:$0xff] }
0x347f   :  { %3820 = vrot.lane.b32.xlu1 %v3818_v46, %s6263_s29 }
0x34f7   :  { %v4157_v54 = vpop.xlane.xlu1 %4156 }
0x34f8   :  { %6067 = vrcp.f32 %v4157_v54 }
0x34fb   :  { %v3821_v30 = vpop.permute.xlu1 %3820 }
0x34fc   :  { %v3823_v55 = vadd.f32 %v3821_v30, %v3813_v26  ;;  %v8657_v26 = vld [vmem:[#allocation32_spill] sm:$0xff] }
0x34fe   :  { %6069 = vtanh.f32 %v3823_v55 }
0x3505   :  { %v6068_v24 = vpop.eup %6067 }
0x3506   :  { %v8493_v2 = vmul.f32 %v6068_v24, %v6064_v35  ;;  %v4356_v24 = vld [vmem:[#allocation18 + $0x30] sm:$0xff] }
0x3508   :  { %4208 = vst.msk [vmem:[#allocation21 + $0xe] sm:$0x3] %vm625_vm11, %v8493_v2  ;;  %4192 = vst.msk [vmem:[#allocation8] sm:$0x3] %vm625_vm11, %v8493_v2  ;;  %v4163_v22 = vrot.slane %v8493_v2, %v6660_v42  ;;  %v4170_v33 = vrot.slane %v8493_v2, %v6658_v41 }
0x350a   :  { %4165 = vbcast.lane.b32.xlu0 %v4163_v22, 256  ;;  %v8658_v22 = vld [vmem:[#allocation35_spill] sm:$0xff] }
0x350b   :  { %v6070_v29 = vpop.eup %6069 }
0x350e   :  { %4172 = vbcast.lane.b32.xlu0 %v4170_v33, 256  ;;  %v4353_v33 = vld [vmem:[#allocation18 + $0x18] sm:$0xff] }
0x350f   :  { %v4193_v54 = vld [vmem:[#allocation8] sm:$0x3] }
0x3512   :  { %3826 = vrot.lane.b32.xlu0 %v6070_v29, %s6262_s5  ;;  %v4352_v29 = vld [vmem:[#allocation18 + $0x10] sm:$0xff] }
0x3516   :  { %4209 = vrot.lane.b32.xlu0 %v8420_v52, %s6263_s29 }
0x351a   :  { %3831 = vrot.lane.b32.xlu0 %v3823_v55, %s6265_s16  ;;  %v4357_v55 = vld [vmem:[#allocation18 + $0x38] sm:$0xff] }
0x351b   :  { %5866 = vmatprep.subr.mxu0 %v4357_v55 }
0x351c   :  { %5867 = vmatpush3.msra.mxu0 %v4357_v55 }
0x351d   :  { %5868 = vmatprep.subr.mxu0 %v4356_v24 }
0x351e   :  { %5869 = vmatpush3.msra.mxu0 %v4356_v24 }
0x357c   :  { %v4166_v41 = vpop.permute.xlu0 %4165 }
0x357d   :  { %v4176_v42 = vmul.f32 %v4166_v41, %v8297_v14  ;;  %v4350_v41 = vld [vmem:[#allocation18] sm:$0xff] }
0x357f   :  { %v4178_v61 = vsel %vm230_vm2, %v4176_v42, 0.0 }
0x3580   :  { %v4179_v36 = vrot.slane %v4178_v61, 4  ;;  %v4173_v48 = vpop.permute.xlu0 %4172 }
0x3581   :  { %v4177_v6 = vmul.f32 %v4173_v48, %v8295_v45 }
0x3582   :  { %v4180_v56 = vadd.f32 %v4179_v36, %v4178_v61  ;;  %v8659_v36 = vld [vmem:[#allocation30_spill] sm:$0xff] }
0x3583   :  { %v4185_v39 = vsel %vm230_vm2, %v4177_v6, 0.0  ;;  %v8660_v6 = vld [vmem:[#allocation33_spill] sm:$0xff] }
0x3584   :  { %v4181_v27 = vrot.slane %v4180_v56, 2  ;;  %v4186_v9 = vrot.slane %v4185_v39, 4  ;;  %v3827_v58 = vpop.permute.xlu0 %3826 }
0x3585   :  { %v3829_v18 = vmul.f32 %v6066_v50, %v3827_v58 }
0x3586   :  { %v4182_v19 = vadd.f32 %v4181_v27, %v4180_v56  ;;  %v4187_v23 = vadd.f32 %v4186_v9, %v4185_v39 }
0x3587   :  { %3836 = vrot.lane.b32.xlu1 %v3829_v18, %s6265_s16 }
0x3588   :  { %v4188_v20 = vrot.slane %v4187_v23, 2  ;;  %v4210_v34 = vpop.permute.xlu0 %4209  ;;  %v4183_v14 = vrot.slane %v4182_v19, 1 }
0x358a   :  { %v4189_v31 = vadd.f32 %v4188_v20, %v4187_v23  ;;  %v4184_v45 = vadd.f32 %v4183_v14, %v4182_v19 }
0x358c   :  { %v4190_v17 = vrot.slane %v4189_v31, 1  ;;  %v3832_v60 = vpop.permute.xlu0 %3831 }
0x358d   :  { %3834 = vst.msk [vmem:[#allocation7] sm:$0x3] %vm131_vm5, %v3832_v60 }
0x358e   :  { %v4191_v49 = vadd.f32 %v4190_v17, %v4189_v31 }
0x3590   :  { %v4202_v7 = vsel %vm680_vm13, %v4191_v49, %v4184_v45 }
0x3591   :  { %4203 = vrot.lane.b32.xlu1 %v4202_v7, %s6263_s29 }
0x3594   :  { %v4304_v38 = vld [vmem:[#allocation7] sm:$0x3] }
0x3595   :  { %4313 = vrot.lane.b32.xlu0 %v4304_v38, %s6263_s29 }
0x35f9   :  { %v3837_v12 = vpop.permute.xlu1 %3836 }
0x35fa   :  { %3839 = vst.msk [vmem:[#allocation6] sm:$0x3] %vm448_vm12, %v3837_v12 }
0x35fb   :  { %4212 = vst.msk [vmem:[#allocation6] sm:$0x3] %vm131_vm5, %v4210_v34 }
0x3603   :  { %v8543_v3 = vpop.permute.xlu1 %4203 }
0x3604   :  { %4213 = vst.msk [vmem:[#allocation6] sm:$0x3] %vm685_vm14, %v8543_v3 }
0x3607   :  { %v4314_v16 = vpop.permute.xlu0 %4313 }
0x360b   :  { %v4214_v53 = vld [vmem:[#allocation6] sm:$0x3] }
0x360c   :  { %5864 = vmatmul.mubr.msk.f32.vlgmr.msra.gmra.mxu1 %vm332_vm7, %v4214_v53 }
0x36cc   :  { %v4300_v21 = vpop.f32.mrf.mxu1 }
0x36cd   :  { %6071 = vtanh.f32 %v4300_v21  ;;  %v4544_v8 = vmul.f32 -1.442695, %v4300_v21 }
0x36ce   :  { %v5865_v44 = vpop.f32.mrf.mxu1 }
0x36cf   :  { %6073 = vpow2.f32 %v4544_v8 }
0x36da   :  { %v6072_v0 = vpop.eup %6071 }
0x36db   :  { %4318 = vrot.lane.b32.xlu1 %v6072_v0, %s6262_s5 }
0x36dc   :  { %v6074_v1 = vpop.eup %6073 }
0x36dd   :  { %v4308_v62 = vadd.f32 1.0, %v6074_v1 }
0x36df   :  { %6075 = vrcp.f32 %v4308_v62 }
0x36ec   :  { %v8549_v4 = vpop.eup %6075 }
0x36ed   :  { %v4316_v15 = vmul.f32 %v8549_v4, %v4314_v16 }
0x374d   :  { %v4319_v5 = vpop.permute.xlu1 %4318 }
0x374e   :  { %v4321_v13 = vmul.f32 %v8549_v4, %v4319_v5 }
0x3750   :  { %4323 = vrot.lane.b32.xlu1 %v4321_v13, %s6263_s29 }
0x3754   :  { %822 = vrot.lane.b32.xlu1 %v6958_v37, %s6263_s29 }
0x3758   :  { %1828 = vrot.lane.b32.xlu1 %v8654_v10, %s6263_s29 }
0x375c   :  { %2834 = vrot.lane.b32.xlu1 %v8074_v11, %s6263_s29 }
0x3760   :  { %3840 = vrot.lane.b32.xlu1 %v3829_v18, %s6263_s29 }
0x3764   :  { %4195 = vrot.lane.b32.xlu1 %v8493_v2, %s6254_s14 }
0x3768   :  { %3967 = vrot.lane.b32.xlu1 %v8378_v32, %s6265_s16 }
0x37c2   :  { %v4324_v40 = vpop.permute.xlu1 %4323 }
0x37c3   :  { %v4326_v35 = vadd.f32 %v4324_v40, %v4316_v15 }
0x37c5   :  { %6077 = vtanh.f32 %v4326_v35 }
0x37c6   :  { %v823_v37 = vpop.permute.xlu1 %822 }
0x37c7   :  { %825 = vst.msk [vmem:[#allocation3] sm:$0x3] %vm131_vm5, %v823_v37 }
0x37c8   :  { %826 = vst.msk [vmem:[#allocation3] sm:$0x3] %vm685_vm14, %v8655_v63 }
0x37ca   :  { %v1829_v11 = vpop.permute.xlu1 %1828 }
0x37cb   :  { %1831 = vst.msk [vmem:[#allocation3 + $0x4] sm:$0x3] %vm131_vm5, %v1829_v11 }
0x37cc   :  { %1832 = vst.msk [vmem:[#allocation3 + $0x4] sm:$0x3] %vm685_vm14, %v8656_v51 }
0x37ce   :  { %v2835_v50 = vpop.permute.xlu1 %2834 }
0x37cf   :  { %2837 = vst.msk [vmem:[#allocation3 + $0x8] sm:$0x3] %vm131_vm5, %v2835_v50 }
0x37d0   :  { %2838 = vst.msk [vmem:[#allocation3 + $0x8] sm:$0x3] %vm685_vm14, %v7810_v59  ;;  %v4355_v59 = vld [vmem:[#allocation18 + $0x28] sm:$0xff] }
0x37d1   :  { %5870 = vmatprep.subr.mxu0 %v4355_v59 }
0x37d2   :  { %v6078_v32 = vpop.eup %6077  ;;  %v3841_v46 = vpop.permute.xlu1 %3840  ;;  %5871 = vmatpush3.msra.mxu0 %v4355_v59 }
0x37d3   :  { %3843 = vst.msk [vmem:[#allocation3 + $0xc] sm:$0x3] %vm131_vm5, %v3841_v46  ;;  %4329 = vrot.lane.b32.xlu0 %v6078_v32, %s6262_s5  ;;  %s6199_s5 = scalar_lea.vmem %s4467_s3, 256 }
0x37d4   :  { %3844 = vst.msk [vmem:[#allocation3 + $0xc] sm:$0x3] %vm685_vm14, %v8332_v25  ;;  %v4354_v25 = vld [vmem:[#allocation18 + $0x20] sm:$0xff]  ;;  %p6200_p2 = scmp.ne.s32.totalorder %s4467_s3, %s6199_s5  ;;  %p6205_p4 = scmp.lt.s32.totalorder %s6199_s5, %s6199_s5 }
0x37d5   :  { %5872 = vmatprep.subr.mxu0 %v4354_v25 }
0x37d6   :  { %v4196_v57 = vpop.permute.xlu1 %4195  ;;  %5873 = vmatpush3.msra.mxu0 %v4354_v25  ;;  %p6206_p5 = por %p6205_p4, %p6204_p3 }
0x37d7   :  { %v4198_v30 = vadd.f32 %v4196_v57, %v4193_v54  ;;  %1325 = vrot.lane.b32.xlu0 %v8657_v26, %s6263_s29  ;;  %5874 = vmatprep.subr.mxu0 %v4353_v33 }
0x37d8   :  { %5875 = vmatpush3.msra.mxu0 %v4353_v33  ;;  %p6207_p6 = pnand %p6206_p5, %p6200_p2 }
0x37d9   :  { %4199 = vst.msk [vmem:[#allocation8] sm:$0x3] %vm676_vm15, %v4198_v30  ;;  %5876 = vmatprep.subr.mxu0 %v4352_v29 }
0x37da   :  { %v3968_v2 = vpop.permute.xlu1 %3967  ;;  %5877 = vmatpush3.msra.mxu0 %v4352_v29 }
0x37db   :  { %3970 = vst.msk [vmem:[#allocation5] sm:$0x3] %vm131_vm5, %v3968_v2  ;;  %2331 = vrot.lane.b32.xlu0 %v8658_v22, %s6263_s29  ;;  %5878 = vmatprep.subr.mxu0 %v4351_v47 }
0x37dc   :  { %5879 = vmatpush3.msra.mxu0 %v4351_v47 }
0x37dd   :  { %5880 = vmatprep.subr.mxu0 %v4350_v41 }
0x37de   :  { %5881 = vmatpush3.msra.mxu0 %v4350_v41 }
0x37df   :  { %3337 = vrot.lane.b32.xlu0 %v8410_v28, %s6263_s29 }
0x3845   :  { %v4330_v42 = vpop.permute.xlu0 %4329 }
0x3846   :  { %v4332_v61 = vmul.f32 %v8549_v4, %v4330_v42 }
0x3848   :  { %4339 = vrot.lane.b32.xlu1 %v4332_v61, %s6265_s16  ;;  %4343 = vrot.lane.b32.xlu0 %v4332_v61, %s6263_s29 }
0x3849   :  { %v1326_v28 = vpop.permute.xlu0 %1325 }
0x384a   :  { %1328 = vst.msk [vmem:[#allocation3 + $0x2] sm:$0x3] %vm131_vm5, %v1326_v28 }
0x384b   :  { %1329 = vst.msk [vmem:[#allocation3 + $0x2] sm:$0x3] %vm685_vm14, %v8659_v36 }
0x384c   :  { %3972 = vrot.lane.b32.xlu0 %v8420_v52, %s6265_s16 }
0x384d   :  { %v2332_v48 = vpop.permute.xlu0 %2331 }
0x384e   :  { %2334 = vst.msk [vmem:[#allocation3 + $0x6] sm:$0x3] %vm131_vm5, %v2332_v48 }
0x384f   :  { %2335 = vst.msk [vmem:[#allocation3 + $0x6] sm:$0x3] %vm685_vm14, %v8660_v6 }
0x3850   :  { %4334 = vrot.lane.b32.xlu0 %v4326_v35, %s6265_s16 }
0x3851   :  { %v3338_v56 = vpop.permute.xlu0 %3337 }
0x3852   :  { %3340 = vst.msk [vmem:[#allocation3 + $0xa] sm:$0x3] %vm131_vm5, %v3338_v56 }
0x3853   :  { %3341 = vst.msk [vmem:[#allocation3 + $0xa] sm:$0x3] %vm685_vm14, %v8028_v43 }
0x3856   :  { %v4348_v39 = vld [vmem:[#allocation3] sm:$0xff] }
0x3857   :  { %5882 = vmatprep.mubr.msk.f32.mxu0 %vm4365_vm0, %v4348_v39 }
0x38ba   :  { %v4340_v27 = vpop.permute.xlu1 %4339  ;;  %v4344_v9 = vpop.permute.xlu0 %4343 }
0x38bb   :  { %4342 = vst.msk [vmem:[#allocation6] sm:$0x3] %vm448_vm12, %v4340_v27 }
0x38bc   :  { %4346 = vst.msk [vmem:[#allocation3 + $0xe] sm:$0x3] %vm131_vm5, %v4344_v9 }
0x38bd   :  { %4347 = vst.msk [vmem:[#allocation3 + $0xe] sm:$0x3] %vm685_vm14, %v8543_v3 }
0x38be   :  { %v3973_v52 = vpop.permute.xlu0 %3972 }
0x38bf   :  { %3975 = vst.msk [vmem:[#allocation4] sm:$0x3] %vm448_vm12, %v3973_v52 }
0x38c0   :  { %4206 = vst.msk [vmem:[#allocation4] sm:$0x3] %vm685_vm14, %v8543_v3 }
0x38c2   :  { %v4335_v58 = vpop.permute.xlu0 %4334 }
0x38c3   :  { %4337 = vst.msk [vmem:[#allocation7] sm:$0x3] %vm131_vm5, %v4335_v58 }
0x38c4   :  { %v4349_v43 = vld [vmem:[#allocation3 + $0x8] sm:$0xff] }
0x38c5   :  { %5883 = vmatmul.mubr.msk.f32.vlgmr.msra.gmra.mxu0 %vm4365_vm0, %v4349_v43 }
0x38c6   :  { %6210 = shalt.err (!%p6207_p6)
}
0x38c7   :  { %s6267_s16 = smov 2   ;;  %v4545_v18 = vld [vmem:[%s8634_s11] ss:$0 sm:$0xff]  ;;  %s6268_s23 = smov [#allocation20]  }
0x38c8   :  { %4472 = dma.vmem_to_hbm [thread:$0]  %s4467_s3, 256, %s8636_s13, [#allocation22], %s6263_s29, %s6263_s29, %s6267_s16  }
0x38c9   :  { %s4454_s1 = sshll.u32 %s6268_s23, 4  ;;  %s4455_s1 = int_to_ptr.vmem [resolvable:$true] %s4454_s1 }
0x38ca   :  { %s6219_s24 = scalar_lea.vmem %s4455_s1, 256  ;;  %p6224_p8 = scmp.lt.s32.totalorder %s4455_s1, %s4455_s1 }
0x38cb   :  { %p6220_p7 = scmp.ne.s32.totalorder %s4455_s1, %s6219_s24  ;;  %p6225_p9 = scmp.lt.s32.totalorder %s6219_s24, %s6219_s24 }
0x38cd   :  { %p6226_p10 = por %p6225_p9, %p6224_p8 }
0x38cf   :  { %p6227_p11 = pnand %p6226_p10, %p6220_p7 }
0x3985   :  { %v5884_v19 = vpop.f32.mrf.mxu0 }
0x3986   :  { %v4444_v23 = vadd.f32 %v5884_v19, %v4545_v18 }
0x3987   :  { %v4438_v20 = vpop.f32.mrf.mxu0 }
0x3988   :  { %4448 = vst [vmem:[#allocation20 + $0x8] sm:$0xff] %v4444_v23  ;;  %v4439_v34 = vadd.f32 %v4545_v18, %v4438_v20 }
0x398a   :  { %4447 = vst [vmem:[#allocation20] sm:$0xff] %v4439_v34 }
0x398b   :  { %6230 = shalt.err (!%p6227_p11)
}
0x398c   :  { %4460 = dma.vmem_to_hbm [thread:$0]  %s4455_s1, 256, %s8635_s12, [#allocation11], %s6253_s30, %s6253_s30, %s6254_s14  }
0x398d   :  { %6247 = dma.done.wait [#allocation11], 256  }
0x398e   :  { %6248 = vsyncadd [#allocation11], 4294967040 }
0x398f   :  { %6249 = dma.done.wait [#allocation22], 256  }
0x3990   :  { %6250 = vsyncadd [#allocation22], 4294967040 }
0x3991   :  { %4479 = vsyncpa [#allocation10], 1 }
0x3992   :  { %4480 = vsyncpa [#allocation13], 1 }
0x3993   :  { %4481 = vsyncpa [#allocation16], 1 }
0x3994   :  { %4482 = vsyncpa [#allocation19], 1 }
0x3995   :  { %4483 = vsyncpa [#allocation11], 1 }
0x3996   :  { %4484 = vsyncpa [#allocation22], 1 }

</bundles_post_ra>
